<compile_context>
chip_gen: v7x
topology: tpu7x:2x2x1
jax: 0.10.0
libtpu: 0.0.40
codegen_flags: <defaults>
</compile_context>

<pallas_src>
import functools

import jax
import jax.numpy as jnp
from jax.experimental import pallas as pl
from jax.experimental.pallas import tpu as pltpu


def _round_up(v, m):
    return (v + m - 1) // m * m


def _pick_td(d_total, td_request):
    """Largest divisor of d_total that is <= td_request."""
    td_request = max(1, min(int(td_request), int(d_total)))
    for td in range(td_request, 0, -1):
        if d_total % td == 0:
            return td
    return 1


def _enc_block_kernel(w_ref, b_ref, body_ref, h1_ref, h2_ref, o_ref, stk_ref, *,
                      cin_p, wp, halo, m_out, td, neg_slope):
    """Compute one (batch, Td-output-depth-planes) tile.

    w_ref   : (9, Cout_p, 3*Cin_p)   3x3 spatial taps; depth taps folded into K;
                                     WS scale folded in (compute dtype)
    b_ref   : (Cout_p, 1)            bias, f32
    body_ref: (1, Td*Cin_p, me)      padded planes t*Td .. t*Td+Td-1 (channel-major)
    h1_ref  : (1, Cin_p, me)         padded plane  t*Td + Td
    h2_ref  : (1, Cin_p, me)         padded plane  t*Td + Td + 1
    o_ref   : (1, Td, Cout_p, M_out) output planes (compute dtype), flattened over
                                     the padded (Hp, Wp) grid
    stk_ref : ((Td+2)*Cin_p, me)     VMEM scratch holding the stacked depth window
    """
    tdc = td * cin_p
    # Stack the Td+2 planes so the depth taps sit on the K (sublane) axis.
    stk_ref[0:tdc] = body_ref[0]
    stk_ref[tdc:tdc + cin_p] = h1_ref[0]
    stk_ref[tdc + cin_p:tdc + 2 * cin_p] = h2_ref[0]

    for j in range(td):                              # output depth plane in the tile
        lo = j * cin_p                               # window = planes j, j+1, j+2
        acc = None
        for kh in range(3):
            for kw in range(3):
                off = halo + (kh - 1) * wp + (kw - 1)              # static lane shift
                rhs = stk_ref[lo:lo + 3 * cin_p, off:off + m_out]  # (3*Cin_p, M_out)
                part = jnp.dot(w_ref[kh * 3 + kw], rhs,
                               preferred_element_type=jnp.float32)  # MXU, f32 acc
                acc = part if acc is None else acc + part
        y = acc + b_ref[...]                                        # f32 epilogue
        o_ref[0, j] = jnp.where(y > 0, y, neg_slope * y).astype(o_ref.dtype)


def enc_block_forward(x_ncdhw, weight, bias, *, kernel_size=3, stride=1, padding=1,
                      neg_slope=0.2, compute_dtype=jnp.bfloat16, depth_tile=4):
    """x_ncdhw: (N, Cin, D, H, W); weight: (Cout, Cin, 3, 3, 3); bias: (Cout,)."""
    assert kernel_size == 3 and stride == 1 and padding == 1, \
        "this kernel implements the k=3, s=1, p=1 configuration used by EncBlock"
    N, Cin, D, H, W = x_ncdhw.shape
    Cout = weight.shape[0]
    # WSConv3d uses kernel_size**2 (not **3) in its fan-in -- matches the source.
    scale = float((2.0 / (Cin * kernel_size ** 2)) ** 0.5)

    Dp, Hp, Wp = D + 2, H + 2, W + 2
    M = Hp * Wp                               # flattened padded-plane size
    m_out = _round_up(M, 128)                 # lane-aligned output width (unmasked vst)
    halo = Wp + 1                             # max |lane shift| over the 3x3 (kh, kw) taps
    me = _round_up(m_out + 2 * halo, 128)     # extended, 128-multiple plane width
    cin_p = _round_up(Cin, 8)                 # sublane-align channel dims
    cout_p = _round_up(Cout, 8)
    td = _pick_td(D, depth_tile)              # output depth planes per grid step

    # ---- wrapper glue (runs once in XLA; ~1x input footprint, no im2col) ----
    xpad = jnp.pad(x_ncdhw, ((0, 0), (0, cin_p - Cin), (1, 1), (1, 1), (1, 1)))
    planes = jnp.transpose(xpad, (0, 2, 1, 3, 4)).reshape(N, Dp, cin_p, M)
    planes = jnp.pad(planes, ((0, 0), (0, 0), (0, 0), (halo, me - halo - M)))
    planes = planes.reshape(N, Dp * cin_p, me).astype(compute_dtype)

    # Weights: (9, Cout_p, 3*Cin_p), K ordered (kd, cin); WS scale folded in.
    w_t = jnp.transpose(weight, (3, 4, 0, 2, 1)) * scale          # (KH, KW, O, KD, I)
    w_t = jnp.pad(w_t, ((0, 0), (0, 0), (0, cout_p - Cout), (0, 0), (0, cin_p - Cin)))
    w_t = w_t.reshape(9, cout_p, 3 * cin_p).astype(compute_dtype)
    b2d = jnp.pad(bias.astype(jnp.float32), (0, cout_p - Cout)).reshape(cout_p, 1)

    # Explicit VMEM budget from the per-step footprint (with margin), clamped to
    # a range that is safe on v5e/v6e (128 MiB) and v7x (64 MiB physical).
    isz = jnp.dtype(compute_dtype).itemsize
    per_step = (2 * (td + 2) * cin_p * me * isz          # double-buffered input window
                + 2 * td * cout_p * m_out * isz          # double-buffered output tile
                + (td + 2) * cin_p * me * isz            # stacking scratch
                + 2 * 9 * cout_p * 3 * cin_p * isz       # weights
                + 2 * cout_p * m_out * 4)                # f32 partial-sum slabs
    vmem_limit = int(min(max(per_step * 3 // 2 + (8 << 20), 32 << 20), 96 << 20))

    kernel = functools.partial(_enc_block_kernel, cin_p=cin_p, wp=Wp, halo=halo,
                               m_out=m_out, td=td, neg_slope=neg_slope)
    out = pl.pallas_call(
        kernel,
        out_shape=jax.ShapeDtypeStruct((N, D, cout_p, m_out), compute_dtype),
        grid_spec=pltpu.PrefetchScalarGridSpec(
            num_scalar_prefetch=0,
            grid=(N, D // td),
            in_specs=[
                # Weights / bias: constant index map -> resident, never re-DMA'd.
                pl.BlockSpec((9, cout_p, 3 * cin_p), lambda n, t: (0, 0, 0)),
                pl.BlockSpec((cout_p, 1), lambda n, t: (0, 0)),
                # Body: Td padded planes starting at padded depth t*Td.
                pl.BlockSpec((1, td * cin_p, me), lambda n, t: (n, t, 0)),
                # Depth-halo planes t*Td+Td and t*Td+Td+1 (block size 1 plane).
                pl.BlockSpec((1, cin_p, me), lambda n, t: (n, t * td + td, 0)),
                pl.BlockSpec((1, cin_p, me), lambda n, t: (n, t * td + td + 1, 0)),
            ],
            out_specs=pl.BlockSpec((1, td, cout_p, m_out), lambda n, t: (n, t, 0, 0)),
            scratch_shapes=[pltpu.VMEM(((td + 2) * cin_p, me), compute_dtype)],
        ),
        compiler_params=pltpu.CompilerParams(
            dimension_semantics=("parallel", "parallel"),
            vmem_limit_bytes=vmem_limit),
    )(w_t, b2d, planes, planes, planes)

    # (N, D, Cout_p, m_out) -> drop channel/lane padding, un-flatten the padded
    # plane, drop the H/W halo, and reorder to NCDHW.
    out = out[:, :, :Cout, :M].reshape(N, D, Cout, Hp, Wp)[:, :, :, 1:H + 1, 1:W + 1]
    return jnp.transpose(out, (0, 2, 1, 3, 4)).astype(x_ncdhw.dtype)


def _reference(x_ncdhw, weight, bias, *, kernel_size=3, neg_slope=0.2):
    Cin = x_ncdhw.shape[1]
    scale = (2.0 / (Cin * kernel_size ** 2)) ** 0.5
    y = jax.lax.conv_general_dilated(
        x_ncdhw * scale, weight, window_strides=(1, 1, 1),
        padding=[(1, 1)] * 3,
        dimension_numbers=("NCDHW", "OIDHW", "NCDHW"),
        precision=jax.lax.Precision.HIGHEST)
    y = y + bias.reshape(1, -1, 1, 1, 1)
    return jnp.where(y > 0, y, neg_slope * y)


if __name__ == "__main__":
    key = jax.random.PRNGKey(0)
    kx, kw, kb = jax.random.split(key, 3)

    N, Cin, Cout, D, H, W = 2, 4, 8, 8, 16, 16
    x = jax.random.normal(kx, (N, Cin, D, H, W), dtype=jnp.float32)
    # nn.init.normal_(conv.weight); the bias is init-zeroed but trainable, so
    # validate the bias path with a nonzero value.
    weight = jax.random.normal(kw, (Cout, Cin, 3, 3, 3), dtype=jnp.float32)
    bias = 0.1 * jax.random.normal(kb, (Cout,), dtype=jnp.float32)

    ref = _reference(x, weight, bias)

    # f32 compute path: tight check against the f32 reference.
    out_f32 = jax.block_until_ready(
        enc_block_forward(x, weight, bias, compute_dtype=jnp.float32))
    assert out_f32.shape == (N, Cout, D, H, W)
    assert jnp.allclose(out_f32, ref, atol=2e-3, rtol=2e-3), "f32 mismatch vs reference"

    # bf16-operand / bf16-output fast path (f32 accumulation inside the MXU).
    out_bf16 = jax.block_until_ready(enc_block_forward(x, weight, bias))
    assert out_bf16.shape == (N, Cout, D, H, W)
    assert jnp.allclose(out_bf16, ref, atol=1.5e-1, rtol=5e-2), "bf16 mismatch vs reference"

    print("KERNEL_OK")
</pallas_src>

<mosaic_0001>
module attributes {stable_mosaic.version = 11 : i64} {
  func.func @_enc_block_kernel(%arg0: i32, %arg1: i32, %arg2: memref<9x8x24xf32, #tpu.memory_space<vmem>>, %arg3: memref<8x1xf32, #tpu.memory_space<vmem>>, %arg4: memref<1x32x512xf32, #tpu.memory_space<vmem>>, %arg5: memref<1x8x512xf32, #tpu.memory_space<vmem>>, %arg6: memref<1x8x512xf32, #tpu.memory_space<vmem>>, %arg7: memref<1x4x8x384xf32, #tpu.memory_space<vmem>>, %arg8: memref<48x512xf32, #tpu.memory_space<vmem>>) attributes {dimension_semantics = [#tpu.dimension_semantics<parallel>, #tpu.dimension_semantics<parallel>], iteration_bounds = array<i64: 2, 2>, scalar_prefetch = 0 : i64, scratch_operands = 1 : i64, tpu.core_type = #tpu.core_type<tc>, window_params = [{pipeline_mode = #tpu.pipeline_mode<synchronous>, transform_indices = @transform_0, window_bounds = array<i64: 9, 8, 24>}, {pipeline_mode = #tpu.pipeline_mode<synchronous>, transform_indices = @transform_1, window_bounds = array<i64: 8, 1>}, {transform_indices = @transform_2, window_bounds = array<i64: 1, 32, 512>}, {transform_indices = @transform_3, window_bounds = array<i64: 1, 8, 512>}, {transform_indices = @transform_4, window_bounds = array<i64: 1, 8, 512>}, {transform_indices = @transform_5, window_bounds = array<i64: 1, 4, 8, 384>}]} {
    %c0 = arith.constant 0 : index
    %c0_0 = arith.constant 0 : index
    %c0_1 = arith.constant 0 : index
    %0 = vector.load %arg4[%c0, %c0_0, %c0_1] : memref<1x32x512xf32, #tpu.memory_space<vmem>>, vector<1x32x512xf32>
    %1 = vector.shape_cast %0 : vector<1x32x512xf32> to vector<32x512xf32>
    %c0_2 = arith.constant 0 : index
    %c0_3 = arith.constant 0 : index
    %2 = vector.load %arg8[%c0_2, %c0_3] : memref<48x512xf32, #tpu.memory_space<vmem>>, vector<32x512xf32>
    tpu.vector_store %arg8[%c0_2, %c0_3], %1 {strides = array<i32>} : memref<48x512xf32, #tpu.memory_space<vmem>>, vector<32x512xf32>,
    %c0_4 = arith.constant 0 : index
    %c0_5 = arith.constant 0 : index
    %c0_6 = arith.constant 0 : index
    %3 = vector.load %arg5[%c0_4, %c0_5, %c0_6] : memref<1x8x512xf32, #tpu.memory_space<vmem>>, vector<1x8x512xf32>
    %4 = vector.shape_cast %3 : vector<1x8x512xf32> to vector<8x512xf32>
    %c32 = arith.constant 32 : index
    %c0_7 = arith.constant 0 : index
    %5 = vector.load %arg8[%c32, %c0_7] : memref<48x512xf32, #tpu.memory_space<vmem>>, vector<8x512xf32>
    tpu.vector_store %arg8[%c32, %c0_7], %4 {strides = array<i32>} : memref<48x512xf32, #tpu.memory_space<vmem>>, vector<8x512xf32>,
    %c0_8 = arith.constant 0 : index
    %c0_9 = arith.constant 0 : index
    %c0_10 = arith.constant 0 : index
    %6 = vector.load %arg6[%c0_8, %c0_9, %c0_10] : memref<1x8x512xf32, #tpu.memory_space<vmem>>, vector<1x8x512xf32>
    %7 = vector.shape_cast %6 : vector<1x8x512xf32> to vector<8x512xf32>
    %c40 = arith.constant 40 : index
    %c0_11 = arith.constant 0 : index
    %8 = vector.load %arg8[%c40, %c0_11] : memref<48x512xf32, #tpu.memory_space<vmem>>, vector<8x512xf32>
    tpu.vector_store %arg8[%c40, %c0_11], %7 {strides = array<i32>} : memref<48x512xf32, #tpu.memory_space<vmem>>, vector<8x512xf32>,
    %c0_12 = arith.constant 0 : index
    %c0_13 = arith.constant 0 : index
    %9 = vector.load %arg8[%c0_12, %c0_13] : memref<48x512xf32, #tpu.memory_space<vmem>>, vector<24x384xf32>
    %c0_14 = arith.constant 0 : index
    %c0_15 = arith.constant 0 : index
    %c0_16 = arith.constant 0 : index
    %10 = vector.load %arg2[%c0_14, %c0_15, %c0_16] : memref<9x8x24xf32, #tpu.memory_space<vmem>>, vector<1x8x24xf32>
    %11 = vector.shape_cast %10 : vector<1x8x24xf32> to vector<8x24xf32>
    %cst = arith.constant dense<0.000000e+00> : vector<8x384xf32>
    %12 = tpu.matmul %11, %9, %cst {dimension_numbers = #tpu.dot_dimension_numbers<[1], [0], [0], [1], [0, 0, 1, 1], [], []>} : vector<8x24xf32>, vector<24x384xf32>, vector<8x384xf32> -> vector<8x384xf32>
    %c0_17 = arith.constant 0 : index
    %c1 = arith.constant 1 : index
    %13 = vector.load %arg8[%c0_17, %c1] : memref<48x512xf32, #tpu.memory_space<vmem>>, vector<24x384xf32>
    %c1_18 = arith.constant 1 : index
    %c0_19 = arith.constant 0 : index
    %c0_20 = arith.constant 0 : index
    %14 = vector.load %arg2[%c1_18, %c0_19, %c0_20] : memref<9x8x24xf32, #tpu.memory_space<vmem>>, vector<1x8x24xf32>
    %15 = vector.shape_cast %14 : vector<1x8x24xf32> to vector<8x24xf32>
    %cst_21 = arith.constant dense<0.000000e+00> : vector<8x384xf32>
    %16 = tpu.matmul %15, %13, %cst_21 {dimension_numbers = #tpu.dot_dimension_numbers<[1], [0], [0], [1], [0, 0, 1, 1], [], []>} : vector<8x24xf32>, vector<24x384xf32>, vector<8x384xf32> -> vector<8x384xf32>
    %17 = arith.addf %12, %16 : vector<8x384xf32>
    %c0_22 = arith.constant 0 : index
    %c2 = arith.constant 2 : index
    %18 = vector.load %arg8[%c0_22, %c2] : memref<48x512xf32, #tpu.memory_space<vmem>>, vector<24x384xf32>
    %c2_23 = arith.constant 2 : index
    %c0_24 = arith.constant 0 : index
    %c0_25 = arith.constant 0 : index
    %19 = vector.load %arg2[%c2_23, %c0_24, %c0_25] : memref<9x8x24xf32, #tpu.memory_space<vmem>>, vector<1x8x24xf32>
    %20 = vector.shape_cast %19 : vector<1x8x24xf32> to vector<8x24xf32>
    %cst_26 = arith.constant dense<0.000000e+00> : vector<8x384xf32>
    %21 = tpu.matmul %20, %18, %cst_26 {dimension_numbers = #tpu.dot_dimension_numbers<[1], [0], [0], [1], [0, 0, 1, 1], [], []>} : vector<8x24xf32>, vector<24x384xf32>, vector<8x384xf32> -> vector<8x384xf32>
    %22 = arith.addf %17, %21 : vector<8x384xf32>
    %c0_27 = arith.constant 0 : index
    %c18 = arith.constant 18 : index
    %23 = vector.load %arg8[%c0_27, %c18] : memref<48x512xf32, #tpu.memory_space<vmem>>, vector<24x384xf32>
    %c3 = arith.constant 3 : index
    %c0_28 = arith.constant 0 : index
    %c0_29 = arith.constant 0 : index
    %24 = vector.load %arg2[%c3, %c0_28, %c0_29] : memref<9x8x24xf32, #tpu.memory_space<vmem>>, vector<1x8x24xf32>
    %25 = vector.shape_cast %24 : vector<1x8x24xf32> to vector<8x24xf32>
    %cst_30 = arith.constant dense<0.000000e+00> : vector<8x384xf32>
    %26 = tpu.matmul %25, %23, %cst_30 {dimension_numbers = #tpu.dot_dimension_numbers<[1], [0], [0], [1], [0, 0, 1, 1], [], []>} : vector<8x24xf32>, vector<24x384xf32>, vector<8x384xf32> -> vector<8x384xf32>
    %27 = arith.addf %22, %26 : vector<8x384xf32>
    %c0_31 = arith.constant 0 : index
    %c19 = arith.constant 19 : index
    %28 = vector.load %arg8[%c0_31, %c19] : memref<48x512xf32, #tpu.memory_space<vmem>>, vector<24x384xf32>
    %c4 = arith.constant 4 : index
    %c0_32 = arith.constant 0 : index
    %c0_33 = arith.constant 0 : index
    %29 = vector.load %arg2[%c4, %c0_32, %c0_33] : memref<9x8x24xf32, #tpu.memory_space<vmem>>, vector<1x8x24xf32>
    %30 = vector.shape_cast %29 : vector<1x8x24xf32> to vector<8x24xf32>
    %cst_34 = arith.constant dense<0.000000e+00> : vector<8x384xf32>
    %31 = tpu.matmul %30, %28, %cst_34 {dimension_numbers = #tpu.dot_dimension_numbers<[1], [0], [0], [1], [0, 0, 1, 1], [], []>} : vector<8x24xf32>, vector<24x384xf32>, vector<8x384xf32> -> vector<8x384xf32>
    %32 = arith.addf %27, %31 : vector<8x384xf32>
    %c0_35 = arith.constant 0 : index
    %c20 = arith.constant 20 : index
    %33 = vector.load %arg8[%c0_35, %c20] : memref<48x512xf32, #tpu.memory_space<vmem>>, vector<24x384xf32>
    %c5 = arith.constant 5 : index
    %c0_36 = arith.constant 0 : index
    %c0_37 = arith.constant 0 : index
    %34 = vector.load %arg2[%c5, %c0_36, %c0_37] : memref<9x8x24xf32, #tpu.memory_space<vmem>>, vector<1x8x24xf32>
    %35 = vector.shape_cast %34 : vector<1x8x24xf32> to vector<8x24xf32>
    %cst_38 = arith.constant dense<0.000000e+00> : vector<8x384xf32>
    %36 = tpu.matmul %35, %33, %cst_38 {dimension_numbers = #tpu.dot_dimension_numbers<[1], [0], [0], [1], [0, 0, 1, 1], [], []>} : vector<8x24xf32>, vector<24x384xf32>, vector<8x384xf32> -> vector<8x384xf32>
    %37 = arith.addf %32, %36 : vector<8x384xf32>
    %c0_39 = arith.constant 0 : index
    %c36 = arith.constant 36 : index
    %38 = vector.load %arg8[%c0_39, %c36] : memref<48x512xf32, #tpu.memory_space<vmem>>, vector<24x384xf32>
    %c6 = arith.constant 6 : index
    %c0_40 = arith.constant 0 : index
    %c0_41 = arith.constant 0 : index
    %39 = vector.load %arg2[%c6, %c0_40, %c0_41] : memref<9x8x24xf32, #tpu.memory_space<vmem>>, vector<1x8x24xf32>
    %40 = vector.shape_cast %39 : vector<1x8x24xf32> to vector<8x24xf32>
    %cst_42 = arith.constant dense<0.000000e+00> : vector<8x384xf32>
    %41 = tpu.matmul %40, %38, %cst_42 {dimension_numbers = #tpu.dot_dimension_numbers<[1], [0], [0], [1], [0, 0, 1, 1], [], []>} : vector<8x24xf32>, vector<24x384xf32>, vector<8x384xf32> -> vector<8x384xf32>
    %42 = arith.addf %37, %41 : vector<8x384xf32>
    %c0_43 = arith.constant 0 : index
    %c37 = arith.constant 37 : index
    %43 = vector.load %arg8[%c0_43, %c37] : memref<48x512xf32, #tpu.memory_space<vmem>>, vector<24x384xf32>
    %c7 = arith.constant 7 : index
    %c0_44 = arith.constant 0 : index
    %c0_45 = arith.constant 0 : index
    %44 = vector.load %arg2[%c7, %c0_44, %c0_45] : memref<9x8x24xf32, #tpu.memory_space<vmem>>, vector<1x8x24xf32>
    %45 = vector.shape_cast %44 : vector<1x8x24xf32> to vector<8x24xf32>
    %cst_46 = arith.constant dense<0.000000e+00> : vector<8x384xf32>
    %46 = tpu.matmul %45, %43, %cst_46 {dimension_numbers = #tpu.dot_dimension_numbers<[1], [0], [0], [1], [0, 0, 1, 1], [], []>} : vector<8x24xf32>, vector<24x384xf32>, vector<8x384xf32> -> vector<8x384xf32>
    %47 = arith.addf %42, %46 : vector<8x384xf32>
    %c0_47 = arith.constant 0 : index
    %c38 = arith.constant 38 : index
    %48 = vector.load %arg8[%c0_47, %c38] : memref<48x512xf32, #tpu.memory_space<vmem>>, vector<24x384xf32>
    %c8 = arith.constant 8 : index
    %c0_48 = arith.constant 0 : index
    %c0_49 = arith.constant 0 : index
    %49 = vector.load %arg2[%c8, %c0_48, %c0_49] : memref<9x8x24xf32, #tpu.memory_space<vmem>>, vector<1x8x24xf32>
    %50 = vector.shape_cast %49 : vector<1x8x24xf32> to vector<8x24xf32>
    %cst_50 = arith.constant dense<0.000000e+00> : vector<8x384xf32>
    %51 = tpu.matmul %50, %48, %cst_50 {dimension_numbers = #tpu.dot_dimension_numbers<[1], [0], [0], [1], [0, 0, 1, 1], [], []>} : vector<8x24xf32>, vector<24x384xf32>, vector<8x384xf32> -> vector<8x384xf32>
    %52 = arith.addf %47, %51 : vector<8x384xf32>
    %c0_51 = arith.constant 0 : index
    %c0_52 = arith.constant 0 : index
    %53 = vector.load %arg3[%c0_51, %c0_52] : memref<8x1xf32, #tpu.memory_space<vmem>>, vector<8x1xf32>
    %54 = vector.broadcast %53 : vector<8x1xf32> to vector<8x384xf32>
    %55 = arith.addf %52, %54 : vector<8x384xf32>
    %cst_53 = arith.constant 0.000000e+00 : f32
    %56 = vector.broadcast %cst_53 : f32 to vector<8x384xf32>
    %57 = arith.cmpf ogt, %55, %56 : vector<8x384xf32>
    %cst_54 = arith.constant 2.000000e-01 : f32
    %58 = vector.broadcast %cst_54 : f32 to vector<8x384xf32>
    %59 = arith.mulf %58, %55 : vector<8x384xf32>
    %60 = arith.select %57, %55, %59 : vector<8x384xi1>, vector<8x384xf32>
    %c0_55 = arith.constant 0 : index
    %c0_56 = arith.constant 0 : index
    %c0_57 = arith.constant 0 : index
    %c0_58 = arith.constant 0 : index
    %61 = vector.load %arg7[%c0_55, %c0_56, %c0_57, %c0_58] : memref<1x4x8x384xf32, #tpu.memory_space<vmem>>, vector<1x1x8x384xf32>
    %62 = vector.shape_cast %61 : vector<1x1x8x384xf32> to vector<8x384xf32>
    %63 = vector.shape_cast %60 : vector<8x384xf32> to vector<1x1x8x384xf32>
    tpu.vector_store %arg7[%c0_55, %c0_56, %c0_57, %c0_58], %63 {strides = array<i32>} : memref<1x4x8x384xf32, #tpu.memory_space<vmem>>, vector<1x1x8x384xf32>,
    %c8_59 = arith.constant 8 : index
    %c0_60 = arith.constant 0 : index
    %64 = vector.load %arg8[%c8_59, %c0_60] : memref<48x512xf32, #tpu.memory_space<vmem>>, vector<24x384xf32>
    %c0_61 = arith.constant 0 : index
    %c0_62 = arith.constant 0 : index
    %c0_63 = arith.constant 0 : index
    %65 = vector.load %arg2[%c0_61, %c0_62, %c0_63] : memref<9x8x24xf32, #tpu.memory_space<vmem>>, vector<1x8x24xf32>
    %66 = vector.shape_cast %65 : vector<1x8x24xf32> to vector<8x24xf32>
    %cst_64 = arith.constant dense<0.000000e+00> : vector<8x384xf32>
    %67 = tpu.matmul %66, %64, %cst_64 {dimension_numbers = #tpu.dot_dimension_numbers<[1], [0], [0], [1], [0, 0, 1, 1], [], []>} : vector<8x24xf32>, vector<24x384xf32>, vector<8x384xf32> -> vector<8x384xf32>
    %c8_65 = arith.constant 8 : index
    %c1_66 = arith.constant 1 : index
    %68 = vector.load %arg8[%c8_65, %c1_66] : memref<48x512xf32, #tpu.memory_space<vmem>>, vector<24x384xf32>
    %c1_67 = arith.constant 1 : index
    %c0_68 = arith.constant 0 : index
    %c0_69 = arith.constant 0 : index
    %69 = vector.load %arg2[%c1_67, %c0_68, %c0_69] : memref<9x8x24xf32, #tpu.memory_space<vmem>>, vector<1x8x24xf32>
    %70 = vector.shape_cast %69 : vector<1x8x24xf32> to vector<8x24xf32>
    %cst_70 = arith.constant dense<0.000000e+00> : vector<8x384xf32>
    %71 = tpu.matmul %70, %68, %cst_70 {dimension_numbers = #tpu.dot_dimension_numbers<[1], [0], [0], [1], [0, 0, 1, 1], [], []>} : vector<8x24xf32>, vector<24x384xf32>, vector<8x384xf32> -> vector<8x384xf32>
    %72 = arith.addf %67, %71 : vector<8x384xf32>
    %c8_71 = arith.constant 8 : index
    %c2_72 = arith.constant 2 : index
    %73 = vector.load %arg8[%c8_71, %c2_72] : memref<48x512xf32, #tpu.memory_space<vmem>>, vector<24x384xf32>
    %c2_73 = arith.constant 2 : index
    %c0_74 = arith.constant 0 : index
    %c0_75 = arith.constant 0 : index
    %74 = vector.load %arg2[%c2_73, %c0_74, %c0_75] : memref<9x8x24xf32, #tpu.memory_space<vmem>>, vector<1x8x24xf32>
    %75 = vector.shape_cast %74 : vector<1x8x24xf32> to vector<8x24xf32>
    %cst_76 = arith.constant dense<0.000000e+00> : vector<8x384xf32>
    %76 = tpu.matmul %75, %73, %cst_76 {dimension_numbers = #tpu.dot_dimension_numbers<[1], [0], [0], [1], [0, 0, 1, 1], [], []>} : vector<8x24xf32>, vector<24x384xf32>, vector<8x384xf32> -> vector<8x384xf32>
    %77 = arith.addf %72, %76 : vector<8x384xf32>
    %c8_77 = arith.constant 8 : index
    %c18_78 = arith.constant 18 : index
    %78 = vector.load %arg8[%c8_77, %c18_78] : memref<48x512xf32, #tpu.memory_space<vmem>>, vector<24x384xf32>
    %c3_79 = arith.constant 3 : index
    %c0_80 = arith.constant 0 : index
    %c0_81 = arith.constant 0 : index
    %79 = vector.load %arg2[%c3_79, %c0_80, %c0_81] : memref<9x8x24xf32, #tpu.memory_space<vmem>>, vector<1x8x24xf32>
    %80 = vector.shape_cast %79 : vector<1x8x24xf32> to vector<8x24xf32>
    %cst_82 = arith.constant dense<0.000000e+00> : vector<8x384xf32>
    %81 = tpu.matmul %80, %78, %cst_82 {dimension_numbers = #tpu.dot_dimension_numbers<[1], [0], [0], [1], [0, 0, 1, 1], [], []>} : vector<8x24xf32>, vector<24x384xf32>, vector<8x384xf32> -> vector<8x384xf32>
    %82 = arith.addf %77, %81 : vector<8x384xf32>
    %c8_83 = arith.constant 8 : index
    %c19_84 = arith.constant 19 : index
    %83 = vector.load %arg8[%c8_83, %c19_84] : memref<48x512xf32, #tpu.memory_space<vmem>>, vector<24x384xf32>
    %c4_85 = arith.constant 4 : index
    %c0_86 = arith.constant 0 : index
    %c0_87 = arith.constant 0 : index
    %84 = vector.load %arg2[%c4_85, %c0_86, %c0_87] : memref<9x8x24xf32, #tpu.memory_space<vmem>>, vector<1x8x24xf32>
    %85 = vector.shape_cast %84 : vector<1x8x24xf32> to vector<8x24xf32>
    %cst_88 = arith.constant dense<0.000000e+00> : vector<8x384xf32>
    %86 = tpu.matmul %85, %83, %cst_88 {dimension_numbers = #tpu.dot_dimension_numbers<[1], [0], [0], [1], [0, 0, 1, 1], [], []>} : vector<8x24xf32>, vector<24x384xf32>, vector<8x384xf32> -> vector<8x384xf32>
    %87 = arith.addf %82, %86 : vector<8x384xf32>
    %c8_89 = arith.constant 8 : index
    %c20_90 = arith.constant 20 : index
    %88 = vector.load %arg8[%c8_89, %c20_90] : memref<48x512xf32, #tpu.memory_space<vmem>>, vector<24x384xf32>
    %c5_91 = arith.constant 5 : index
    %c0_92 = arith.constant 0 : index
    %c0_93 = arith.constant 0 : index
    %89 = vector.load %arg2[%c5_91, %c0_92, %c0_93] : memref<9x8x24xf32, #tpu.memory_space<vmem>>, vector<1x8x24xf32>
    %90 = vector.shape_cast %89 : vector<1x8x24xf32> to vector<8x24xf32>
    %cst_94 = arith.constant dense<0.000000e+00> : vector<8x384xf32>
    %91 = tpu.matmul %90, %88, %cst_94 {dimension_numbers = #tpu.dot_dimension_numbers<[1], [0], [0], [1], [0, 0, 1, 1], [], []>} : vector<8x24xf32>, vector<24x384xf32>, vector<8x384xf32> -> vector<8x384xf32>
    %92 = arith.addf %87, %91 : vector<8x384xf32>
    %c8_95 = arith.constant 8 : index
    %c36_96 = arith.constant 36 : index
    %93 = vector.load %arg8[%c8_95, %c36_96] : memref<48x512xf32, #tpu.memory_space<vmem>>, vector<24x384xf32>
    %c6_97 = arith.constant 6 : index
    %c0_98 = arith.constant 0 : index
    %c0_99 = arith.constant 0 : index
    %94 = vector.load %arg2[%c6_97, %c0_98, %c0_99] : memref<9x8x24xf32, #tpu.memory_space<vmem>>, vector<1x8x24xf32>
    %95 = vector.shape_cast %94 : vector<1x8x24xf32> to vector<8x24xf32>
    %cst_100 = arith.constant dense<0.000000e+00> : vector<8x384xf32>
    %96 = tpu.matmul %95, %93, %cst_100 {dimension_numbers = #tpu.dot_dimension_numbers<[1], [0], [0], [1], [0, 0, 1, 1], [], []>} : vector<8x24xf32>, vector<24x384xf32>, vector<8x384xf32> -> vector<8x384xf32>
    %97 = arith.addf %92, %96 : vector<8x384xf32>
    %c8_101 = arith.constant 8 : index
    %c37_102 = arith.constant 37 : index
    %98 = vector.load %arg8[%c8_101, %c37_102] : memref<48x512xf32, #tpu.memory_space<vmem>>, vector<24x384xf32>
    %c7_103 = arith.constant 7 : index
    %c0_104 = arith.constant 0 : index
    %c0_105 = arith.constant 0 : index
    %99 = vector.load %arg2[%c7_103, %c0_104, %c0_105] : memref<9x8x24xf32, #tpu.memory_space<vmem>>, vector<1x8x24xf32>
    %100 = vector.shape_cast %99 : vector<1x8x24xf32> to vector<8x24xf32>
    %cst_106 = arith.constant dense<0.000000e+00> : vector<8x384xf32>
    %101 = tpu.matmul %100, %98, %cst_106 {dimension_numbers = #tpu.dot_dimension_numbers<[1], [0], [0], [1], [0, 0, 1, 1], [], []>} : vector<8x24xf32>, vector<24x384xf32>, vector<8x384xf32> -> vector<8x384xf32>
    %102 = arith.addf %97, %101 : vector<8x384xf32>
    %c8_107 = arith.constant 8 : index
    %c38_108 = arith.constant 38 : index
    %103 = vector.load %arg8[%c8_107, %c38_108] : memref<48x512xf32, #tpu.memory_space<vmem>>, vector<24x384xf32>
    %c8_109 = arith.constant 8 : index
    %c0_110 = arith.constant 0 : index
    %c0_111 = arith.constant 0 : index
    %104 = vector.load %arg2[%c8_109, %c0_110, %c0_111] : memref<9x8x24xf32, #tpu.memory_space<vmem>>, vector<1x8x24xf32>
    %105 = vector.shape_cast %104 : vector<1x8x24xf32> to vector<8x24xf32>
    %cst_112 = arith.constant dense<0.000000e+00> : vector<8x384xf32>
    %106 = tpu.matmul %105, %103, %cst_112 {dimension_numbers = #tpu.dot_dimension_numbers<[1], [0], [0], [1], [0, 0, 1, 1], [], []>} : vector<8x24xf32>, vector<24x384xf32>, vector<8x384xf32> -> vector<8x384xf32>
    %107 = arith.addf %102, %106 : vector<8x384xf32>
    %c0_113 = arith.constant 0 : index
    %c0_114 = arith.constant 0 : index
    %108 = vector.load %arg3[%c0_113, %c0_114] : memref<8x1xf32, #tpu.memory_space<vmem>>, vector<8x1xf32>
    %109 = vector.broadcast %108 : vector<8x1xf32> to vector<8x384xf32>
    %110 = arith.addf %107, %109 : vector<8x384xf32>
    %cst_115 = arith.constant 0.000000e+00 : f32
    %111 = vector.broadcast %cst_115 : f32 to vector<8x384xf32>
    %112 = arith.cmpf ogt, %110, %111 : vector<8x384xf32>
    %cst_116 = arith.constant 2.000000e-01 : f32
    %113 = vector.broadcast %cst_116 : f32 to vector<8x384xf32>
    %114 = arith.mulf %113, %110 : vector<8x384xf32>
    %115 = arith.select %112, %110, %114 : vector<8x384xi1>, vector<8x384xf32>
    %c0_117 = arith.constant 0 : index
    %c1_118 = arith.constant 1 : index
    %c0_119 = arith.constant 0 : index
    %c0_120 = arith.constant 0 : index
    %116 = vector.load %arg7[%c0_117, %c1_118, %c0_119, %c0_120] : memref<1x4x8x384xf32, #tpu.memory_space<vmem>>, vector<1x1x8x384xf32>
    %117 = vector.shape_cast %116 : vector<1x1x8x384xf32> to vector<8x384xf32>
    %118 = vector.shape_cast %115 : vector<8x384xf32> to vector<1x1x8x384xf32>
    tpu.vector_store %arg7[%c0_117, %c1_118, %c0_119, %c0_120], %118 {strides = array<i32>} : memref<1x4x8x384xf32, #tpu.memory_space<vmem>>, vector<1x1x8x384xf32>,
    %c16 = arith.constant 16 : index
    %c0_121 = arith.constant 0 : index
    %119 = vector.load %arg8[%c16, %c0_121] : memref<48x512xf32, #tpu.memory_space<vmem>>, vector<24x384xf32>
    %c0_122 = arith.constant 0 : index
    %c0_123 = arith.constant 0 : index
    %c0_124 = arith.constant 0 : index
    %120 = vector.load %arg2[%c0_122, %c0_123, %c0_124] : memref<9x8x24xf32, #tpu.memory_space<vmem>>, vector<1x8x24xf32>
    %121 = vector.shape_cast %120 : vector<1x8x24xf32> to vector<8x24xf32>
    %cst_125 = arith.constant dense<0.000000e+00> : vector<8x384xf32>
    %122 = tpu.matmul %121, %119, %cst_125 {dimension_numbers = #tpu.dot_dimension_numbers<[1], [0], [0], [1], [0, 0, 1, 1], [], []>} : vector<8x24xf32>, vector<24x384xf32>, vector<8x384xf32> -> vector<8x384xf32>
    %c16_126 = arith.constant 16 : index
    %c1_127 = arith.constant 1 : index
    %123 = vector.load %arg8[%c16_126, %c1_127] : memref<48x512xf32, #tpu.memory_space<vmem>>, vector<24x384xf32>
    %c1_128 = arith.constant 1 : index
    %c0_129 = arith.constant 0 : index
    %c0_130 = arith.constant 0 : index
    %124 = vector.load %arg2[%c1_128, %c0_129, %c0_130] : memref<9x8x24xf32, #tpu.memory_space<vmem>>, vector<1x8x24xf32>
    %125 = vector.shape_cast %124 : vector<1x8x24xf32> to vector<8x24xf32>
    %cst_131 = arith.constant dense<0.000000e+00> : vector<8x384xf32>
    %126 = tpu.matmul %125, %123, %cst_131 {dimension_numbers = #tpu.dot_dimension_numbers<[1], [0], [0], [1], [0, 0, 1, 1], [], []>} : vector<8x24xf32>, vector<24x384xf32>, vector<8x384xf32> -> vector<8x384xf32>
    %127 = arith.addf %122, %126 : vector<8x384xf32>
    %c16_132 = arith.constant 16 : index
    %c2_133 = arith.constant 2 : index
    %128 = vector.load %arg8[%c16_132, %c2_133] : memref<48x512xf32, #tpu.memory_space<vmem>>, vector<24x384xf32>
    %c2_134 = arith.constant 2 : index
    %c0_135 = arith.constant 0 : index
    %c0_136 = arith.constant 0 : index
    %129 = vector.load %arg2[%c2_134, %c0_135, %c0_136] : memref<9x8x24xf32, #tpu.memory_space<vmem>>, vector<1x8x24xf32>
    %130 = vector.shape_cast %129 : vector<1x8x24xf32> to vector<8x24xf32>
    %cst_137 = arith.constant dense<0.000000e+00> : vector<8x384xf32>
    %131 = tpu.matmul %130, %128, %cst_137 {dimension_numbers = #tpu.dot_dimension_numbers<[1], [0], [0], [1], [0, 0, 1, 1], [], []>} : vector<8x24xf32>, vector<24x384xf32>, vector<8x384xf32> -> vector<8x384xf32>
    %132 = arith.addf %127, %131 : vector<8x384xf32>
    %c16_138 = arith.constant 16 : index
    %c18_139 = arith.constant 18 : index
    %133 = vector.load %arg8[%c16_138, %c18_139] : memref<48x512xf32, #tpu.memory_space<vmem>>, vector<24x384xf32>
    %c3_140 = arith.constant 3 : index
    %c0_141 = arith.constant 0 : index
    %c0_142 = arith.constant 0 : index
    %134 = vector.load %arg2[%c3_140, %c0_141, %c0_142] : memref<9x8x24xf32, #tpu.memory_space<vmem>>, vector<1x8x24xf32>
    %135 = vector.shape_cast %134 : vector<1x8x24xf32> to vector<8x24xf32>
    %cst_143 = arith.constant dense<0.000000e+00> : vector<8x384xf32>
    %136 = tpu.matmul %135, %133, %cst_143 {dimension_numbers = #tpu.dot_dimension_numbers<[1], [0], [0], [1], [0, 0, 1, 1], [], []>} : vector<8x24xf32>, vector<24x384xf32>, vector<8x384xf32> -> vector<8x384xf32>
    %137 = arith.addf %132, %136 : vector<8x384xf32>
    %c16_144 = arith.constant 16 : index
    %c19_145 = arith.constant 19 : index
    %138 = vector.load %arg8[%c16_144, %c19_145] : memref<48x512xf32, #tpu.memory_space<vmem>>, vector<24x384xf32>
    %c4_146 = arith.constant 4 : index
    %c0_147 = arith.constant 0 : index
    %c0_148 = arith.constant 0 : index
    %139 = vector.load %arg2[%c4_146, %c0_147, %c0_148] : memref<9x8x24xf32, #tpu.memory_space<vmem>>, vector<1x8x24xf32>
    %140 = vector.shape_cast %139 : vector<1x8x24xf32> to vector<8x24xf32>
    %cst_149 = arith.constant dense<0.000000e+00> : vector<8x384xf32>
    %141 = tpu.matmul %140, %138, %cst_149 {dimension_numbers = #tpu.dot_dimension_numbers<[1], [0], [0], [1], [0, 0, 1, 1], [], []>} : vector<8x24xf32>, vector<24x384xf32>, vector<8x384xf32> -> vector<8x384xf32>
    %142 = arith.addf %137, %141 : vector<8x384xf32>
    %c16_150 = arith.constant 16 : index
    %c20_151 = arith.constant 20 : index
    %143 = vector.load %arg8[%c16_150, %c20_151] : memref<48x512xf32, #tpu.memory_space<vmem>>, vector<24x384xf32>
    %c5_152 = arith.constant 5 : index
    %c0_153 = arith.constant 0 : index
    %c0_154 = arith.constant 0 : index
    %144 = vector.load %arg2[%c5_152, %c0_153, %c0_154] : memref<9x8x24xf32, #tpu.memory_space<vmem>>, vector<1x8x24xf32>
    %145 = vector.shape_cast %144 : vector<1x8x24xf32> to vector<8x24xf32>
    %cst_155 = arith.constant dense<0.000000e+00> : vector<8x384xf32>
    %146 = tpu.matmul %145, %143, %cst_155 {dimension_numbers = #tpu.dot_dimension_numbers<[1], [0], [0], [1], [0, 0, 1, 1], [], []>} : vector<8x24xf32>, vector<24x384xf32>, vector<8x384xf32> -> vector<8x384xf32>
    %147 = arith.addf %142, %146 : vector<8x384xf32>
    %c16_156 = arith.constant 16 : index
    %c36_157 = arith.constant 36 : index
    %148 = vector.load %arg8[%c16_156, %c36_157] : memref<48x512xf32, #tpu.memory_space<vmem>>, vector<24x384xf32>
    %c6_158 = arith.constant 6 : index
    %c0_159 = arith.constant 0 : index
    %c0_160 = arith.constant 0 : index
    %149 = vector.load %arg2[%c6_158, %c0_159, %c0_160] : memref<9x8x24xf32, #tpu.memory_space<vmem>>, vector<1x8x24xf32>
    %150 = vector.shape_cast %149 : vector<1x8x24xf32> to vector<8x24xf32>
    %cst_161 = arith.constant dense<0.000000e+00> : vector<8x384xf32>
    %151 = tpu.matmul %150, %148, %cst_161 {dimension_numbers = #tpu.dot_dimension_numbers<[1], [0], [0], [1], [0, 0, 1, 1], [], []>} : vector<8x24xf32>, vector<24x384xf32>, vector<8x384xf32> -> vector<8x384xf32>
    %152 = arith.addf %147, %151 : vector<8x384xf32>
    %c16_162 = arith.constant 16 : index
    %c37_163 = arith.constant 37 : index
    %153 = vector.load %arg8[%c16_162, %c37_163] : memref<48x512xf32, #tpu.memory_space<vmem>>, vector<24x384xf32>
    %c7_164 = arith.constant 7 : index
    %c0_165 = arith.constant 0 : index
    %c0_166 = arith.constant 0 : index
    %154 = vector.load %arg2[%c7_164, %c0_165, %c0_166] : memref<9x8x24xf32, #tpu.memory_space<vmem>>, vector<1x8x24xf32>
    %155 = vector.shape_cast %154 : vector<1x8x24xf32> to vector<8x24xf32>
    %cst_167 = arith.constant dense<0.000000e+00> : vector<8x384xf32>
    %156 = tpu.matmul %155, %153, %cst_167 {dimension_numbers = #tpu.dot_dimension_numbers<[1], [0], [0], [1], [0, 0, 1, 1], [], []>} : vector<8x24xf32>, vector<24x384xf32>, vector<8x384xf32> -> vector<8x384xf32>
    %157 = arith.addf %152, %156 : vector<8x384xf32>
    %c16_168 = arith.constant 16 : index
    %c38_169 = arith.constant 38 : index
    %158 = vector.load %arg8[%c16_168, %c38_169] : memref<48x512xf32, #tpu.memory_space<vmem>>, vector<24x384xf32>
    %c8_170 = arith.constant 8 : index
    %c0_171 = arith.constant 0 : index
    %c0_172 = arith.constant 0 : index
    %159 = vector.load %arg2[%c8_170, %c0_171, %c0_172] : memref<9x8x24xf32, #tpu.memory_space<vmem>>, vector<1x8x24xf32>
    %160 = vector.shape_cast %159 : vector<1x8x24xf32> to vector<8x24xf32>
    %cst_173 = arith.constant dense<0.000000e+00> : vector<8x384xf32>
    %161 = tpu.matmul %160, %158, %cst_173 {dimension_numbers = #tpu.dot_dimension_numbers<[1], [0], [0], [1], [0, 0, 1, 1], [], []>} : vector<8x24xf32>, vector<24x384xf32>, vector<8x384xf32> -> vector<8x384xf32>
    %162 = arith.addf %157, %161 : vector<8x384xf32>
    %c0_174 = arith.constant 0 : index
    %c0_175 = arith.constant 0 : index
    %163 = vector.load %arg3[%c0_174, %c0_175] : memref<8x1xf32, #tpu.memory_space<vmem>>, vector<8x1xf32>
    %164 = vector.broadcast %163 : vector<8x1xf32> to vector<8x384xf32>
    %165 = arith.addf %162, %164 : vector<8x384xf32>
    %cst_176 = arith.constant 0.000000e+00 : f32
    %166 = vector.broadcast %cst_176 : f32 to vector<8x384xf32>
    %167 = arith.cmpf ogt, %165, %166 : vector<8x384xf32>
    %cst_177 = arith.constant 2.000000e-01 : f32
    %168 = vector.broadcast %cst_177 : f32 to vector<8x384xf32>
    %169 = arith.mulf %168, %165 : vector<8x384xf32>
    %170 = arith.select %167, %165, %169 : vector<8x384xi1>, vector<8x384xf32>
    %c0_178 = arith.constant 0 : index
    %c2_179 = arith.constant 2 : index
    %c0_180 = arith.constant 0 : index
    %c0_181 = arith.constant 0 : index
    %171 = vector.load %arg7[%c0_178, %c2_179, %c0_180, %c0_181] : memref<1x4x8x384xf32, #tpu.memory_space<vmem>>, vector<1x1x8x384xf32>
    %172 = vector.shape_cast %171 : vector<1x1x8x384xf32> to vector<8x384xf32>
    %173 = vector.shape_cast %170 : vector<8x384xf32> to vector<1x1x8x384xf32>
    tpu.vector_store %arg7[%c0_178, %c2_179, %c0_180, %c0_181], %173 {strides = array<i32>} : memref<1x4x8x384xf32, #tpu.memory_space<vmem>>, vector<1x1x8x384xf32>,
    %c24 = arith.constant 24 : index
    %c0_182 = arith.constant 0 : index
    %174 = vector.load %arg8[%c24, %c0_182] : memref<48x512xf32, #tpu.memory_space<vmem>>, vector<24x384xf32>
    %c0_183 = arith.constant 0 : index
    %c0_184 = arith.constant 0 : index
    %c0_185 = arith.constant 0 : index
    %175 = vector.load %arg2[%c0_183, %c0_184, %c0_185] : memref<9x8x24xf32, #tpu.memory_space<vmem>>, vector<1x8x24xf32>
    %176 = vector.shape_cast %175 : vector<1x8x24xf32> to vector<8x24xf32>
    %cst_186 = arith.constant dense<0.000000e+00> : vector<8x384xf32>
    %177 = tpu.matmul %176, %174, %cst_186 {dimension_numbers = #tpu.dot_dimension_numbers<[1], [0], [0], [1], [0, 0, 1, 1], [], []>} : vector<8x24xf32>, vector<24x384xf32>, vector<8x384xf32> -> vector<8x384xf32>
    %c24_187 = arith.constant 24 : index
    %c1_188 = arith.constant 1 : index
    %178 = vector.load %arg8[%c24_187, %c1_188] : memref<48x512xf32, #tpu.memory_space<vmem>>, vector<24x384xf32>
    %c1_189 = arith.constant 1 : index
    %c0_190 = arith.constant 0 : index
    %c0_191 = arith.constant 0 : index
    %179 = vector.load %arg2[%c1_189, %c0_190, %c0_191] : memref<9x8x24xf32, #tpu.memory_space<vmem>>, vector<1x8x24xf32>
    %180 = vector.shape_cast %179 : vector<1x8x24xf32> to vector<8x24xf32>
    %cst_192 = arith.constant dense<0.000000e+00> : vector<8x384xf32>
    %181 = tpu.matmul %180, %178, %cst_192 {dimension_numbers = #tpu.dot_dimension_numbers<[1], [0], [0], [1], [0, 0, 1, 1], [], []>} : vector<8x24xf32>, vector<24x384xf32>, vector<8x384xf32> -> vector<8x384xf32>
    %182 = arith.addf %177, %181 : vector<8x384xf32>
    %c24_193 = arith.constant 24 : index
    %c2_194 = arith.constant 2 : index
    %183 = vector.load %arg8[%c24_193, %c2_194] : memref<48x512xf32, #tpu.memory_space<vmem>>, vector<24x384xf32>
    %c2_195 = arith.constant 2 : index
    %c0_196 = arith.constant 0 : index
    %c0_197 = arith.constant 0 : index
    %184 = vector.load %arg2[%c2_195, %c0_196, %c0_197] : memref<9x8x24xf32, #tpu.memory_space<vmem>>, vector<1x8x24xf32>
    %185 = vector.shape_cast %184 : vector<1x8x24xf32> to vector<8x24xf32>
    %cst_198 = arith.constant dense<0.000000e+00> : vector<8x384xf32>
    %186 = tpu.matmul %185, %183, %cst_198 {dimension_numbers = #tpu.dot_dimension_numbers<[1], [0], [0], [1], [0, 0, 1, 1], [], []>} : vector<8x24xf32>, vector<24x384xf32>, vector<8x384xf32> -> vector<8x384xf32>
    %187 = arith.addf %182, %186 : vector<8x384xf32>
    %c24_199 = arith.constant 24 : index
    %c18_200 = arith.constant 18 : index
    %188 = vector.load %arg8[%c24_199, %c18_200] : memref<48x512xf32, #tpu.memory_space<vmem>>, vector<24x384xf32>
    %c3_201 = arith.constant 3 : index
    %c0_202 = arith.constant 0 : index
    %c0_203 = arith.constant 0 : index
    %189 = vector.load %arg2[%c3_201, %c0_202, %c0_203] : memref<9x8x24xf32, #tpu.memory_space<vmem>>, vector<1x8x24xf32>
    %190 = vector.shape_cast %189 : vector<1x8x24xf32> to vector<8x24xf32>
    %cst_204 = arith.constant dense<0.000000e+00> : vector<8x384xf32>
    %191 = tpu.matmul %190, %188, %cst_204 {dimension_numbers = #tpu.dot_dimension_numbers<[1], [0], [0], [1], [0, 0, 1, 1], [], []>} : vector<8x24xf32>, vector<24x384xf32>, vector<8x384xf32> -> vector<8x384xf32>
    %192 = arith.addf %187, %191 : vector<8x384xf32>
    %c24_205 = arith.constant 24 : index
    %c19_206 = arith.constant 19 : index
    %193 = vector.load %arg8[%c24_205, %c19_206] : memref<48x512xf32, #tpu.memory_space<vmem>>, vector<24x384xf32>
    %c4_207 = arith.constant 4 : index
    %c0_208 = arith.constant 0 : index
    %c0_209 = arith.constant 0 : index
    %194 = vector.load %arg2[%c4_207, %c0_208, %c0_209] : memref<9x8x24xf32, #tpu.memory_space<vmem>>, vector<1x8x24xf32>
    %195 = vector.shape_cast %194 : vector<1x8x24xf32> to vector<8x24xf32>
    %cst_210 = arith.constant dense<0.000000e+00> : vector<8x384xf32>
    %196 = tpu.matmul %195, %193, %cst_210 {dimension_numbers = #tpu.dot_dimension_numbers<[1], [0], [0], [1], [0, 0, 1, 1], [], []>} : vector<8x24xf32>, vector<24x384xf32>, vector<8x384xf32> -> vector<8x384xf32>
    %197 = arith.addf %192, %196 : vector<8x384xf32>
    %c24_211 = arith.constant 24 : index
    %c20_212 = arith.constant 20 : index
    %198 = vector.load %arg8[%c24_211, %c20_212] : memref<48x512xf32, #tpu.memory_space<vmem>>, vector<24x384xf32>
    %c5_213 = arith.constant 5 : index
    %c0_214 = arith.constant 0 : index
    %c0_215 = arith.constant 0 : index
    %199 = vector.load %arg2[%c5_213, %c0_214, %c0_215] : memref<9x8x24xf32, #tpu.memory_space<vmem>>, vector<1x8x24xf32>
    %200 = vector.shape_cast %199 : vector<1x8x24xf32> to vector<8x24xf32>
    %cst_216 = arith.constant dense<0.000000e+00> : vector<8x384xf32>
    %201 = tpu.matmul %200, %198, %cst_216 {dimension_numbers = #tpu.dot_dimension_numbers<[1], [0], [0], [1], [0, 0, 1, 1], [], []>} : vector<8x24xf32>, vector<24x384xf32>, vector<8x384xf32> -> vector<8x384xf32>
    %202 = arith.addf %197, %201 : vector<8x384xf32>
    %c24_217 = arith.constant 24 : index
    %c36_218 = arith.constant 36 : index
    %203 = vector.load %arg8[%c24_217, %c36_218] : memref<48x512xf32, #tpu.memory_space<vmem>>, vector<24x384xf32>
    %c6_219 = arith.constant 6 : index
    %c0_220 = arith.constant 0 : index
    %c0_221 = arith.constant 0 : index
    %204 = vector.load %arg2[%c6_219, %c0_220, %c0_221] : memref<9x8x24xf32, #tpu.memory_space<vmem>>, vector<1x8x24xf32>
    %205 = vector.shape_cast %204 : vector<1x8x24xf32> to vector<8x24xf32>
    %cst_222 = arith.constant dense<0.000000e+00> : vector<8x384xf32>
    %206 = tpu.matmul %205, %203, %cst_222 {dimension_numbers = #tpu.dot_dimension_numbers<[1], [0], [0], [1], [0, 0, 1, 1], [], []>} : vector<8x24xf32>, vector<24x384xf32>, vector<8x384xf32> -> vector<8x384xf32>
    %207 = arith.addf %202, %206 : vector<8x384xf32>
    %c24_223 = arith.constant 24 : index
    %c37_224 = arith.constant 37 : index
    %208 = vector.load %arg8[%c24_223, %c37_224] : memref<48x512xf32, #tpu.memory_space<vmem>>, vector<24x384xf32>
    %c7_225 = arith.constant 7 : index
    %c0_226 = arith.constant 0 : index
    %c0_227 = arith.constant 0 : index
    %209 = vector.load %arg2[%c7_225, %c0_226, %c0_227] : memref<9x8x24xf32, #tpu.memory_space<vmem>>, vector<1x8x24xf32>
    %210 = vector.shape_cast %209 : vector<1x8x24xf32> to vector<8x24xf32>
    %cst_228 = arith.constant dense<0.000000e+00> : vector<8x384xf32>
    %211 = tpu.matmul %210, %208, %cst_228 {dimension_numbers = #tpu.dot_dimension_numbers<[1], [0], [0], [1], [0, 0, 1, 1], [], []>} : vector<8x24xf32>, vector<24x384xf32>, vector<8x384xf32> -> vector<8x384xf32>
    %212 = arith.addf %207, %211 : vector<8x384xf32>
    %c24_229 = arith.constant 24 : index
    %c38_230 = arith.constant 38 : index
    %213 = vector.load %arg8[%c24_229, %c38_230] : memref<48x512xf32, #tpu.memory_space<vmem>>, vector<24x384xf32>
    %c8_231 = arith.constant 8 : index
    %c0_232 = arith.constant 0 : index
    %c0_233 = arith.constant 0 : index
    %214 = vector.load %arg2[%c8_231, %c0_232, %c0_233] : memref<9x8x24xf32, #tpu.memory_space<vmem>>, vector<1x8x24xf32>
    %215 = vector.shape_cast %214 : vector<1x8x24xf32> to vector<8x24xf32>
    %cst_234 = arith.constant dense<0.000000e+00> : vector<8x384xf32>
    %216 = tpu.matmul %215, %213, %cst_234 {dimension_numbers = #tpu.dot_dimension_numbers<[1], [0], [0], [1], [0, 0, 1, 1], [], []>} : vector<8x24xf32>, vector<24x384xf32>, vector<8x384xf32> -> vector<8x384xf32>
    %217 = arith.addf %212, %216 : vector<8x384xf32>
    %c0_235 = arith.constant 0 : index
    %c0_236 = arith.constant 0 : index
    %218 = vector.load %arg3[%c0_235, %c0_236] : memref<8x1xf32, #tpu.memory_space<vmem>>, vector<8x1xf32>
    %219 = vector.broadcast %218 : vector<8x1xf32> to vector<8x384xf32>
    %220 = arith.addf %217, %219 : vector<8x384xf32>
    %cst_237 = arith.constant 0.000000e+00 : f32
    %221 = vector.broadcast %cst_237 : f32 to vector<8x384xf32>
    %222 = arith.cmpf ogt, %220, %221 : vector<8x384xf32>
    %cst_238 = arith.constant 2.000000e-01 : f32
    %223 = vector.broadcast %cst_238 : f32 to vector<8x384xf32>
    %224 = arith.mulf %223, %220 : vector<8x384xf32>
    %225 = arith.select %222, %220, %224 : vector<8x384xi1>, vector<8x384xf32>
    %c0_239 = arith.constant 0 : index
    %c3_240 = arith.constant 3 : index
    %c0_241 = arith.constant 0 : index
    %c0_242 = arith.constant 0 : index
    %226 = vector.load %arg7[%c0_239, %c3_240, %c0_241, %c0_242] : memref<1x4x8x384xf32, #tpu.memory_space<vmem>>, vector<1x1x8x384xf32>
    %227 = vector.shape_cast %226 : vector<1x1x8x384xf32> to vector<8x384xf32>
    %228 = vector.shape_cast %225 : vector<8x384xf32> to vector<1x1x8x384xf32>
    tpu.vector_store %arg7[%c0_239, %c3_240, %c0_241, %c0_242], %228 {strides = array<i32>} : memref<1x4x8x384xf32, #tpu.memory_space<vmem>>, vector<1x1x8x384xf32>,
    return
  }
  func.func @transform_0(%arg0: i32, %arg1: i32) -> (i32, i32, i32) {
    %c0_i32 = arith.constant 0 : i32
    %c0_i32_0 = arith.constant 0 : i32
    %c0_i32_1 = arith.constant 0 : i32
    %c0_i32_2 = arith.constant 0 : i32
    return %c0_i32, %c0_i32_0, %c0_i32_1 : i32, i32, i32
  }
  func.func @transform_1(%arg0: i32, %arg1: i32) -> (i32, i32) {
    %c0_i32 = arith.constant 0 : i32
    %c0_i32_0 = arith.constant 0 : i32
    %c0_i32_1 = arith.constant 0 : i32
    return %c0_i32, %c0_i32_0 : i32, i32
  }
  func.func @transform_2(%arg0: i32, %arg1: i32) -> (i32, i32, i32) {
    %c0_i32 = arith.constant 0 : i32
    %c0_i32_0 = arith.constant 0 : i32
    return %arg0, %arg1, %c0_i32 : i32, i32, i32
  }
  func.func @transform_3(%arg0: i32, %arg1: i32) -> (i32, i32, i32) {
    %c4_i32 = arith.constant 4 : i32
    %0 = arith.muli %arg1, %c4_i32 : i32
    %c4_i32_0 = arith.constant 4 : i32
    %1 = arith.addi %0, %c4_i32_0 : i32
    %c0_i32 = arith.constant 0 : i32
    %c0_i32_1 = arith.constant 0 : i32
    return %arg0, %1, %c0_i32 : i32, i32, i32
  }
  func.func @transform_4(%arg0: i32, %arg1: i32) -> (i32, i32, i32) {
    %c4_i32 = arith.constant 4 : i32
    %0 = arith.muli %arg1, %c4_i32 : i32
    %c4_i32_0 = arith.constant 4 : i32
    %1 = arith.addi %0, %c4_i32_0 : i32
    %c1_i32 = arith.constant 1 : i32
    %2 = arith.addi %1, %c1_i32 : i32
    %c0_i32 = arith.constant 0 : i32
    %c0_i32_1 = arith.constant 0 : i32
    return %arg0, %2, %c0_i32 : i32, i32, i32
  }
  func.func @transform_5(%arg0: i32, %arg1: i32) -> (i32, i32, i32, i32) {
    %c0_i32 = arith.constant 0 : i32
    %c0_i32_0 = arith.constant 0 : i32
    %c0_i32_1 = arith.constant 0 : i32
    return %arg0, %arg1, %c0_i32, %c0_i32_0 : i32, i32, i32, i32
  }
}

</mosaic_0001>

<bundles_post_ra>
// kernel: tpu_custom_call.1
= control target key start
LH: loop header
LB: loop body
LE: loop exit
PB: predicated region body
PF: predicated region fallthrough
CT: control target
= control target key end

     0   :  { %s11621_s0 = inlined_call_operand.hbm [shape: f32[9,8,24], index: 0, kind: input, shape index: {}]   ;;  %s11622_s1 = inlined_call_operand.vmem [shape: f32[8,1], index: 1, kind: input, shape index: {}]   ;;  %s11623_s2 = inlined_call_operand.hbm [shape: f32[2,80,512], index: 2, kind: input, shape index: {}]   ;;  %s11624_s3 = inlined_call_operand.hbm [shape: f32[2,80,512], index: 3, kind: input, shape index: {}]   ;;  %s11625_s4 = inlined_call_operand.hbm [shape: f32[2,80,512], index: 4, kind: input, shape index: {}]   ;;  %s11626_s5 = inlined_call_operand.hbm [shape: f32[2,8,8,384], index: 5, kind: output, shape index: {}]  }
   0x1   :  { %11651 = sst [smem:[#allocation30_spill]] %s11621_s0 }
   0x2   :  { %11652 = sst [smem:[#allocation31_spill]] %s11622_s1 }
   0x3   :  { %11653 = sst [smem:[#allocation32_spill]] %s11623_s2 }
   0x4   :  { %11654 = sst [smem:[#allocation33_spill]] %s11624_s3 }
   0x5   :  { %11655 = sst [smem:[#allocation34_spill]] %s11625_s4 }
   0x6   :  { %11656 = sst [smem:[#allocation35_spill]] %s11626_s5 }
   0x7   :  { %10 = vsyncpa [#allocation4], 0 }
   0x8   :  { %11 = vsyncpa [#allocation7], 0 }
   0x9   :  { %13 = vsyncpa [#allocation7 + $0x1], 0 }
   0xa   :  { %14 = vsyncpa [#allocation10], 0 }
   0xb   :  { %16 = vsyncpa [#allocation10 + $0x1], 0 }
   0xc   :  { %17 = vsyncpa [#allocation5], 0 }
   0xd   :  { %19 = vsyncpa [#allocation5 + $0x1], 0  ;;  %s9529_s18 = smov 0   ;;  %s9531_s19 = smov 0  }
   0xe   :  { %s9533_s20 = smov 0   ;;  %s9535_s21 = smov 0  }
   0xf   :  { %s9537_s22 = smov 0   ;;  %s9539_s23 = smov 0  }
  0x10   :  { %s9541_s24 = smov 0   ;;  %s9543_s25 = smov 0  }
  0x11   :  { %s9545_s26 = smov 0   ;;  %s9547_s27 = smov 0  }
  0x12   :  { %s9549_s28 = smov 0   ;;  %s9551_s29 = smov 0  }
  0x13   :  { %s9553_s30 = smov 0   ;;  %s9555_s6 = smov 0  }
  0x14 LB: > { %11657 = sst [smem:[#allocation17_spill]] %s9426_s19  ;;  %s9600_s7 = sadd.s32 4294967295, %s9474_s6   ;;  %s9474_s6 = sphi %s9555_s6, %s25_s6   ;;  %s9470_s30 = sphi %s9553_s30, %s11728_s30   ;;  %s9466_s29 = sphi %s9551_s29, %s11727_s29   ;;  %s9462_s28 = sphi %s9549_s28, %s11726_s28   ;;  %s9458_s27 = sphi %s9547_s27, %s11725_s27   ;;  %s9454_s26 = sphi %s9545_s26, %s11714_s26   ;;  %s9450_s25 = sphi %s9543_s25, %s11724_s25   ;;  %s9446_s24 = sphi %s9541_s24, %s11723_s24   ;;  %s9442_s23 = sphi %s9539_s23, %s11722_s23   ;;  %s9438_s22 = sphi %s9537_s22, %s11721_s22   ;;  %s9434_s21 = sphi %s9535_s21, %s11720_s21   ;;  %s9430_s20 = sphi %s9533_s20, %s11719_s20   ;;  %s9426_s19 = sphi %s9531_s19, %s11718_s19   ;;  %s9422_s18 = sphi %s9529_s18, %s11710_s18  }
  0x15   : > { %11658 = sst [smem:[#allocation18_spill]] %s9446_s24  ;;  %s34_s9 = sadd.s32 1, %s9466_s29 }
  0x16   : > { %11659 = sst [smem:[#allocation19_spill]] %s9454_s26  ;;  %s37_s10 = sadd.s32 1, %s9470_s30 }
  0x17   : > { %11660 = sst [smem:[#allocation20_spill]] %s9458_s27  ;;  %p35_p0 = scmp.ge.s32.totalorder %s34_s9, 2 }
  0x18   : > { %11661 = sst [smem:[#allocation21_spill]] %s9462_s28  ;;  %s88_s11 = sadd.s32 1, %s9454_s26 }
  0x19   : > { %p95_p1 = scmp.ne.s32.totalorder %s9454_s26, %s9450_s25  ;;  %p96_p2 = scmp.eq.s32.totalorder %s9474_s6, 0 }
  0x1a   : > { %s11730_s9 = smov (%p35_p0, %s34_s9), 0  ;;  %s11732_s10 = smov (!%p35_p0, %s37_s10), %s9470_s30 }
  0x1b   : > { %11662 = sst [smem:[#allocation22_spill]] %s11730_s9  ;;  %s84_s12 = ssub.s32 %s9466_s29, %s11730_s9 }
  0x1c   : > { %p9619_p3 = por %p96_p2, %p95_p1  ;;  %p39_p4 = scmp.ge.s32.totalorder %s11732_s10, 2 }
  0x1d   : > { %p11632_p5 = scmp.ne.s32.totalorder %s9450_s25, %s9446_s24  ;;  %p11638_p6 = scmp.eq.s32.totalorder %s9600_s7, 0 }
  0x1e   : > { %s11663_s13 = scalar_select %p9619_p3, 1, 0 }
  0x1f   : > { %s7467_s14 = sshll.u32 %s9466_s29, 2  ;;  %s11734_s10 = smov (%p39_p4, %s11732_s10), 0 }
  0x20   : > { %11664 = sst [smem:[#allocation23_spill]] %s11734_s10  ;;  %p9634_p7 = por %p11638_p6, %p11632_p5 }
  0x21   : > { %s112_s16 = sadd.s32 4, %s7467_s14  ;;  %s83_s17 = ssub.s32 %s9470_s30, %s11734_s10 }
  0x22   : > { %s11665_s15 = scalar_select %p9634_p7, 1, 0 }
  0x23   : > { %s7468_s8 = sshll.u32 %s11730_s9, 2  ;;  %s85_s5 = sor.u32 %s84_s12, %s83_s17 }
  0x24   : > { %s114_s28 = sadd.s32 4, %s7468_s8  ;;  %p86_p8 = scmp.eq.s32.totalorder %s85_s5, 0 }
  0x25   : > { %s116_s27 = ssub.s32 %s112_s16, %s114_s28  ;;  %s120_s4 = sadd.s32 1, %s9442_s23 }
  0x26   : > { %s117_s1 = sor.u32 %s116_s27, %s83_s17  ;;  %p127_p10 = scmp.ne.s32.totalorder %s9442_s23, %s9438_s22 }
  0x27   : > { %s9643_s3 = scalar_select %p86_p8, %s9454_s26, %s88_s11  }
  0x28   : > { %p118_p9 = scmp.eq.s32.totalorder %s117_s1, 0  ;;  %p133_p11 = scmp.ne.s32.totalorder %s9438_s22, %s9434_s21 }
  0x29   : > { %11666 = sst [smem:[#allocation24_spill]] %s9643_s3  ;;  %s144_s12 = sadd.s32 5, %s7467_s14 }
  0x2a   : > { %s9650_s10 = scalar_select %p118_p9, %s9442_s23, %s120_s4  }
  0x2b   : > { %p9654_p12 = por %p127_p10, %p96_p2  ;;  %p9660_p13 = por %p133_p11, %p11638_p6 }
  0x2c   : > { %11667 = sst [smem:[#allocation25_spill]] %s9650_s10  ;;  %s146_s21 = sadd.s32 5, %s7468_s8 }
  0x2d   : > { %s11668_s5 = scalar_select %p9654_p12, 1, 0 }
  0x2e   : > { %s11669_s1 = scalar_select %p9660_p13, 1, 0 }
  0x2f   : > { %s152_s27 = sadd.s32 1, %s9430_s20  ;;  %s148_s28 = ssub.s32 %s144_s12, %s146_s21 }
  0x30   : > { %p159_p0 = scmp.ne.s32.totalorder %s9430_s20, %s9426_s19  ;;  %s149_s4 = sor.u32 %s148_s28, %s83_s17 }
  0x31   : > { %p165_p4 = scmp.ne.s32.totalorder %s9426_s19, %s9422_s18  ;;  %p150_p8 = scmp.eq.s32.totalorder %s149_s4, 0 }
  0x32   : > { %p9671_p9 = por %p159_p0, %p96_p2  ;;  %p191_p11 = scmp.eq.s32.totalorder %s9600_s7, 3 }
  0x33   : > { %p9677_p10 = por %p165_p4, %p11638_p6  ;;  %s11676_s18 = sadd.s32 4294967294, %s9474_s6  }
  0x34   : > { %s11670_s11 = scalar_select %p9671_p9, 1, 0 }
  0x35   : > { %s11671_s14 = scalar_select %p9677_p10, 1, 0 }
  0x36   : > { %s9683_s16 = scalar_select %p150_p8, %s9430_s20, %s152_s27  }
  0x37   : > { %11672 = sst [smem:[#allocation26_spill]] %s11671_s14  ;;  %p9688_p5 = por %p191_p11, %p95_p1 }
  0x38   : > { %11673 = sst [smem:[#allocation27_spill]] %s9683_s16  ;;  %p197_p13 = scmp.eq.s32.totalorder %s11676_s18, 3 }
  0x39   : > { %s11674_s8 = scalar_select %p9688_p5, 1, 0 }
  0x3a   : > { %p7471_p7 = scmp.ge.s32.totalorder %s9474_s6, 1  ;;  %p204_p2 = scmp.lt.s32.totalorder %s9474_s6, 5 }
  0x3b   : > { %11675 = sst [smem:[#allocation28_spill]] %s11674_s8  ;;  %p11677_p0 = scmp.ne.s32.totalorder %s9450_s25, %s9446_s24 }
  0x3c   : > { %p9703_p4 = pnand %p7471_p7, %p204_p2  ;;  %s9476_s21 = smov [#allocation3]  }
  0x3d   : > { %p9699_p12 = por %p197_p13, %p11677_p0  ;;  %s216_s27 = sshll.u32 %s9476_s21, 4  ;;  %s217_s27 = int_to_ptr.vmem [resolvable:$true] %s216_s27 }
  0x3e   : > { %s11680_s12 = scalar_select %p9703_p4, 1, 0 }
  0x3f   : > { %s11678_s17 = scalar_select %p9699_p12, 1, 0 }
  0x40   : > { %p8385_p1 = pneg %p9703_p4  ;;  %s11682_s0 = sld [smem:[#allocation30_spill]] }
  0x41   : > { %11679 = sst [smem:[#allocation29_spill]] %s11678_s17 }
  0x42   : > { %p9711_p8 = pnand %p8385_p1, %p11638_p6 }
  0x44   : > { %p9202_p13 = pneg %p9711_p8 }
  0x46   : > { %s9200_s9 = scalar_lea.hbm %s11682_s0, 1152 }
  0x47   : > { %p9201_p7 = scmp.ne.s32.totalorder %s11682_s0, %s9200_s9  ;;  %p9207_p0 = scmp.lt.u32.totalorder %s9200_s9, %s11682_s0 }
  0x49   : > { %p9203_p11 = pnand %p9202_p13, %p9201_p7 }
  0x4b   : > { %p9204_p2 = pneg %p9203_p11 }
  0x4d   : > { %p9209_p1 = pnand %p9207_p0, %p9204_p2 }
  0x4f   : > { %9212 = shalt.err (!%p9209_p1)
}
  0x50   : > { %s9213_s17 = scalar_lea.vmem %s217_s27, 1152  ;;  %p9221_p10 = scmp.lt.s32.totalorder %s217_s27, %s217_s27 }
  0x51   : > { %p9214_p6 = scmp.ne.s32.totalorder %s217_s27, %s9213_s17  ;;  %p9222_p4 = scmp.lt.s32.totalorder %s9213_s17, %s9213_s17 }
  0x53   : > { %p9216_p12 = pnand %p9214_p6, %p9202_p13  ;;  %p9223_p9 = por %p9222_p4, %p9221_p10 }
  0x55   : > { %p9217_p5 = pneg %p9216_p12 }
  0x57   : > { %p9224_p3 = pnand %p9223_p9, %p9217_p5 }
  0x59   : > { %9227 = shalt.err (!%p9224_p3)
}
  0x5a   : > { %s9477_s3 = smov 128   ;;  %s9478_s10 = smov 8  }
  0x5b   : > { %8388 = dma.hbm_to_vmem [thread:$0]  (!%p9711_p8), %s11682_s0, 1152, %s217_s27, [#allocation4], %s9477_s3, %s9477_s3, %s9478_s10  }
  0x5c   : > { %p7473_p7 = scmp.ge.s32.totalorder %s9474_s6, 4 }
  0x5d   : > { %p11683_p11 = scmp.ne.s32.totalorder (!%p7473_p7), %s11663_s13, 0 }
  0x5e   : > { %229 = sbr.rel (%p7473_p7) target bundleno = 193 (0xc1), region = 24 }
  0x65   : > { %232 = sbr.rel (!%p11683_p11) target bundleno = 134 (0x86), region = 28  ;;  %s233_s9 = sand.u32 (%p11683_p11), 1, %s9474_s6  }
  0x66   : > { %s235_s16 = sand.u32 (%p11683_p11), 1, %s9454_s26   ;;  %s9736_s21 = scalar_lea.sflag (%p11683_p11), [#allocation7], %s233_s9 }
  0x67   : > { %s7474_s17 = sshll.u32 (%p11683_p11), %s235_s16, 7  ;;  %s7583_s24 = sshll.u32 (%p11683_p11), %s9466_s29, 4 }
  0x68   : > { %s237_s28 = scalar_lea.vmem (%p11683_p11), [#allocation6], %s7474_s17  ;;  %s8370_s8 = smul.u32 (%p11683_p11), 40, %s9470_s30 }
  0x69   : > { %s254_s4 = sshll.u32 (%p11683_p11), %s237_s28, 4  ;;  %s11684_s2 = sld [smem:[#allocation32_spill]] (%p11683_p11)  ;;  %s9740_s4 = int_to_ptr.vmem [resolvable:$true] %s254_s4 }
  0x6a   : > { %s250_s27 = sadd.s32 (%p11683_p11), %s8370_s8, %s7583_s24 }
  0x6b   : > { %s7480_s3 = sshll.u32 (%p11683_p11), %s250_s27, 7 }
  0x6f   : > { %s252_s18 = scalar_lea.hbm %s11684_s2, %s7480_s3  ;;  %s9232_s16 = scalar_lea.hbm %s11684_s2, 10240 }
  0x70   : > { %s9228_s0 = scalar_lea.hbm %s252_s18, 2048  ;;  %p9233_p5 = scmp.lt.u32.totalorder %s252_s18, %s11684_s2 }
  0x71   : > { %p9229_p3 = scmp.ne.s32.totalorder %s252_s18, %s9228_s0  ;;  %p9234_p6 = scmp.lt.u32.totalorder %s9232_s16, %s9228_s0 }
  0x72   : > { %p9236_p9 = scmp.lt.u32.totalorder %s9228_s0, %s252_s18 }
  0x73   : > { %p9235_p12 = por %p9234_p6, %p9233_p5 }
  0x75   : > { %p9237_p10 = por %p9236_p9, %p9235_p12 }
  0x77   : > { %p9238_p4 = pnand %p9237_p10, %p9229_p3 }
  0x79   : > { %9241 = shalt.err (!%p9238_p4)
}
  0x7a   : > { %s9242_s24 = scalar_lea.vmem %s9740_s4, 2048  ;;  %s9479_s8 = smov [#allocation6]  }
  0x7b   : > { %p9243_p8 = scmp.ne.s32.totalorder %s9740_s4, %s9242_s24  ;;  %s9246_s17 = sshll.u32 %s9479_s8, 4  ;;  %s9247_s17 = int_to_ptr.vmem [resolvable:$false] %s9246_s17 }
  0x7c   : > { %s9248_s19 = scalar_lea.vmem %s9247_s17, 4096  ;;  %p9249_p13 = scmp.lt.s32.totalorder %s9740_s4, %s9247_s17 }
  0x7d   : > { %p9250_p2 = scmp.lt.s32.totalorder %s9248_s19, %s9242_s24 }
  0x7f   : > { %p9251_p0 = por %p9250_p2, %p9249_p13 }
  0x81   : > { %p9252_p1 = pnand %p9251_p0, %p9243_p8 }
  0x83   : > { %9255 = shalt.err (!%p9252_p1)
}
  0x84   : > { %s9480_s26 = smov 512   ;;  %s9481_s0 = smov 32  }
  0x85   : > { %260 = dma.hbm_to_vmem [thread:$0]  %s252_s18, 2048, %s9740_s4, %s9736_s21, %s9480_s26, %s9480_s26, %s9481_s0  }
  0x86 PF: > { %s264_s14 = sand.u32 1, %s9474_s6   ;;  %s266_s28 = sand.u32 1, %s9442_s23  }
  0x87   : > { %s7483_s27 = sshll.u32 %s266_s28, 5  ;;  %s7584_s3 = sshll.u32 %s9466_s29, 4 }
  0x88   : > { %s7356_s10 = smul.u32 40, %s9470_s30  ;;  %s268_s13 = scalar_lea.vmem [#allocation8], %s7483_s27 }
  0x89   : > { %s280_s16 = sshll.u32 %s268_s13, 4  ;;  %s11650_s9 = sand.u32 1, %s9430_s20   ;;  %s9760_s16 = int_to_ptr.vmem [resolvable:$true] %s280_s16 }
  0x8a   : > { %s7357_s24 = sadd.s32 %s7584_s3, %s7356_s10  ;;  %s9765_s4 = sshll.u32 %s11650_s9, 5 }
  0x8b   : > { %s7486_s21 = sshll.u32 %s7357_s24, 7  ;;  %s11685_s17 = sld [smem:[#allocation33_spill]] }
  0x8c   : > { %s11686_s2 = sld [smem:[#allocation34_spill]]  ;;  %s265_s13 = scalar_lea.sflag [#allocation7], %s264_s14 }
  0x8d   : > { %p11687_p11 = scmp.ne.s32.totalorder %s11668_s5, 0 }
  0x91   : > { %s7359_s19 = scalar_lea.hbm %s11685_s17, %s7486_s21  ;;  %s9260_s18 = scalar_lea.hbm %s11685_s17, 10240 }
  0x92   : > { %s9770_s26 = scalar_lea.hbm %s7359_s19, 2048  ;;  %s9775_s27 = scalar_lea.hbm %s11686_s2, %s7486_s21 }
  0x93   : > { %s9284_s3 = scalar_lea.hbm %s7359_s19, 2560  ;;  %p9261_p6 = scmp.lt.u32.totalorder %s9770_s26, %s11685_s17 }
  0x94   : > { %p9257_p7 = scmp.ne.s32.totalorder %s9770_s26, %s9284_s3  ;;  %p9262_p12 = scmp.lt.u32.totalorder %s9260_s18, %s9284_s3 }
  0x95   : > { %p9264_p10 = scmp.lt.u32.totalorder %s9284_s3, %s9770_s26 }
  0x96   : > { %p9258_p3 = pnand %p9257_p7, %p11687_p11  ;;  %p9263_p9 = por %p9262_p12, %p9261_p6 }
  0x98   : > { %p9259_p5 = pneg %p9258_p3  ;;  %p9265_p4 = por %p9264_p10, %p9263_p9 }
  0x9a   : > { %p9266_p8 = pnand %p9265_p4, %p9259_p5 }
  0x9c   : > { %9269 = shalt.err (!%p9266_p8)
}
  0x9d   : > { %s9270_s14 = scalar_lea.vmem %s9760_s16, 512  ;;  %s9482_s21 = smov [#allocation8]  }
  0x9e   : > { %p9271_p13 = scmp.ne.s32.totalorder %s9760_s16, %s9270_s14  ;;  %s9274_s19 = sshll.u32 %s9482_s21, 4  ;;  %s9275_s19 = int_to_ptr.vmem [resolvable:$false] %s9274_s19 }
  0x9f   : > { %s9276_s9 = scalar_lea.vmem %s9275_s19, 1024  ;;  %p9277_p1 = scmp.lt.s32.totalorder %s9760_s16, %s9275_s19 }
  0xa0   : > { %p9272_p2 = pnand %p9271_p13, %p11687_p11  ;;  %p9278_p7 = scmp.lt.s32.totalorder %s9276_s9, %s9270_s14 }
  0xa2   : > { %p9273_p0 = pneg %p9272_p2  ;;  %p9279_p3 = por %p9278_p7, %p9277_p1 }
  0xa4   : > { %p9280_p6 = pnand %p9279_p3, %p9273_p0 }
  0xa6   : > { %9283 = shalt.err (!%p9280_p6)
}
  0xa7   : > { %8376 = dma.hbm_to_vmem [thread:$0]  (%p11687_p11), %s9770_s26, 512, %s9760_s16, %s265_s13  }
  0xa8   : > { %s9798_s0 = scalar_lea.hbm %s9775_s27, 2560  ;;  %s291_s28 = scalar_lea.vmem [#allocation9], %s9765_s4 }
  0xa9   : > { %s303_s3 = sshll.u32 %s291_s28, 4  ;;  %s11688_s10 = sand.u32 1, %s9430_s20   ;;  %s304_s3 = int_to_ptr.vmem [resolvable:$true] %s303_s3 }
  0xaa   : > { %s288_s24 = scalar_lea.sflag [#allocation10], %s11688_s10  ;;  %s9313_s18 = scalar_lea.hbm %s9775_s27, 3072 }
  0xab   : > { %p9286_p5 = scmp.ne.s32.totalorder %s9798_s0, %s9313_s18  ;;  %p11689_p12 = scmp.ne.s32.totalorder %s11670_s11, 0 }
  0xac   : > { %s9289_s14 = scalar_lea.hbm %s11686_s2, 10240  ;;  %p9290_p11 = scmp.lt.u32.totalorder %s9798_s0, %s11686_s2 }
  0xad   : > { %p9287_p9 = pnand %p9286_p5, %p11689_p12  ;;  %p9291_p4 = scmp.lt.u32.totalorder %s9289_s14, %s9313_s18 }
  0xae   : > { %p9293_p13 = scmp.lt.u32.totalorder %s9313_s18, %s9798_s0 }
  0xaf   : > { %p9288_p10 = pneg %p9287_p9  ;;  %p9292_p8 = por %p9291_p4, %p9290_p11 }
  0xb1   : > { %p9294_p2 = por %p9293_p13, %p9292_p8 }
  0xb3   : > { %p9295_p0 = pnand %p9294_p2, %p9288_p10 }
  0xb5   : > { %9298 = shalt.err (!%p9295_p0)
}
  0xb6   : > { %s9299_s4 = scalar_lea.vmem %s304_s3, 512  ;;  %s9483_s27 = smov [#allocation9]  }
  0xb7   : > { %p9300_p1 = scmp.ne.s32.totalorder %s304_s3, %s9299_s4  ;;  %s9303_s13 = sshll.u32 %s9483_s27, 4  ;;  %s9304_s13 = int_to_ptr.vmem [resolvable:$false] %s9303_s13 }
  0xb8   : > { %s9305_s21 = scalar_lea.vmem %s9304_s13, 1024  ;;  %p9306_p6 = scmp.lt.s32.totalorder %s304_s3, %s9304_s13 }
  0xb9   : > { %p9301_p7 = pnand %p9300_p1, %p11689_p12  ;;  %p9307_p5 = scmp.lt.s32.totalorder %s9305_s21, %s9299_s4 }
  0xbb   : > { %p9302_p3 = pneg %p9301_p7  ;;  %p9308_p9 = por %p9307_p5, %p9306_p6 }
  0xbd   : > { %p9309_p4 = pnand %p9308_p9, %p9302_p3 }
  0xbf   : > { %9312 = shalt.err (!%p9309_p4)
}
  0xc0   : > { %8377 = dma.hbm_to_vmem [thread:$0]  (%p11689_p12), %s9798_s0, 512, %s304_s3, %s288_s24  }
  0xc1 PF: > { %p11690_p10 = scmp.ne.s32.totalorder %s11680_s12, 0 }
  0xc2   : > { %p11691_p11 = scmp.eq.s32.totalorder (!%p11690_p10), %s9600_s7, 0 }
  0xc3   : > { %312 = sbr.rel (%p11690_p10) target bundleno = 1098 (0x44a), region = 40 }
  0xca   : > { %9399 = dma.done.wait (%p11691_p11), [#allocation4], 1152   ;;  %p11692_p8 = pmov %p11691_p11 }
  0xcb   : > { %s318_s19 = sand.u32 1, %s9600_s7   ;;  %s9828_s9 = sand.u32 1, %s9450_s25  }
  0xcc   : > { %9401 = vsyncadd (%p11692_p8), [#allocation4], 4294966144  ;;  %s7493_s11 = sshll.u32 %s9828_s9, 7  ;;  %s319_s28 = scalar_lea.sflag [#allocation7], %s318_s19 }
  0xcd   : > { %s9831_s0 = scalar_lea.vmem [#allocation6], %s7493_s11  ;;  %p11693_p12 = scmp.ne.s32.totalorder %s11665_s15, 0 }
  0xcf   : > { %9403 = dma.done.wait (%p11693_p12), %s319_s28, 2048  }
  0xd0   : > { %9405 = vsyncadd (%p11693_p12), %s319_s28, 4294965248  ;;  %s329_s12 = sand.u32 1, %s9438_s22   ;;  %p11694_p13 = scmp.ne.s32.totalorder %s11669_s1, 0 }
  0xd1   : > { %s7494_s3 = sshll.u32 %s329_s12, 5 }
  0xd2   : > { %s9838_s10 = scalar_lea.vmem [#allocation8], %s7494_s3 }
  0xd3   : > { %9407 = dma.done.wait (%p11694_p13), %s319_s28, 512  }
  0xd4   : > { %9409 = vsyncadd (%p11694_p13), %s319_s28, 4294966784  ;;  %s11695_s7 = sld [smem:[#allocation17_spill]]  ;;  %s11696_s24 = sld [smem:[#allocation26_spill]] }
  0xda   : > { %s336_s18 = sand.u32 1, %s11695_s7   ;;  %p11697_p2 = scmp.ne.s32.totalorder %s11696_s24, 0 }
  0xdb   : > { %s7495_s5 = sshll.u32 %s336_s18, 5  ;;  %s337_s8 = scalar_lea.sflag [#allocation10], %s336_s18 }
  0xdc   : > { %s9845_s14 = scalar_lea.vmem [#allocation9], %s7495_s5 }
  0xdd   : > { %9411 = dma.done.wait (%p11697_p2), %s337_s8, 512  }
  0xde   : > { %9413 = vsyncadd (%p11697_p2), %s337_s8, 4294966784  ;;  %v9484_v0 = vmov 0.0|0.0   ;;  %v9853_v1 = vld [vmem:[%s9831_s0 + $0x20] sm:$0xff]  ;;  %v9856_v2 = vld [vmem:[%s9831_s0 + $0x28] sm:$0xff]  ;;  %s9485_s15 = smov 127   ;;  %v9486_v15 = vmov 0  }
  0xdf   : > { %8058 = vmatprep.subr.bf16.mxu1 %v9484_v0  ;;  %v9859_v3 = vld [vmem:[%s9831_s0] sm:$0xff]  ;;  %v9863_v4 = vpack.i.bf16 %v9856_v2, %v9853_v1  ;;  %v9866_v5 = vld [vmem:[%s9831_s0 + $0x8] sm:$0xff]  ;;  %v9869_v6 = vld [vmem:[%s9831_s0 + $0x30] sm:$0xff]  ;;  %8687 = vset.pattern.permute.xlu0 %v9486_v15  ;;  %v9487_v16 = vmov 0.0   ;;  %vm9488_vm0 = vmmov 0   ;;  %s9489_s1 = smov 126  }
  0xe0   : > { %v395_v7 = vld [vmem:[%s9831_s0 + $0x38] sm:$0xff]  ;;  %v9874_v8 = vpack.i.bf16 %v9866_v5, %v9859_v3  ;;  %v9877_v9 = vld [vmem:[%s9831_s0 + $0x10] sm:$0xff]  ;;  %v9895_v13 = vld [vmem:[%s9831_s0 + $0x48] sm:$0xff]  ;;  %574 = vmatprep.mubr.f32.mxu0 %v9487_v16  ;;  %7736 = vmatprep.mubr.msk.f32.mxu1 %vm9488_vm0, %v9487_v16  ;;  %s9490_s16 = smov 110   ;;  %s9491_s26 = smov 109   ;;  %vm487_vm1 = vcmask 1039360   ;;  %v8061_v50 = vpack.c.bf16 %v9856_v2, %v9866_v5  ;;  %v8063_v53 = vpack.c.bf16 %v9853_v1, %v9859_v3 }
  0xe1   : > { %v391_v10 = vld [vmem:[%s9831_s0 + $0x18] sm:$0xff]  ;;  %8538 = vrot.lane.b32.xlu1 %v9863_v4, %s9485_s15  ;;  %v9883_v11 = vpack.i.bf16 %v395_v7, %v9869_v6  ;;  %v9898_v14 = vld [vmem:[%s9831_s0 + $0x40] sm:$0xff]  ;;  %v9911_v18 = vld [vmem:[%s9831_s0 + $0x50] sm:$0xff]  ;;  %s9492_s4 = smov 108   ;;  %s9493_s27 = smov 92   ;;  %vm506_vm2 = vcmask 195584   ;;  %v8066_v52 = vpack.c.bf16 %v9869_v6, %v9877_v9 }
  0xe2   : > { %8528 = vrot.lane.b32.xlu0 %v9874_v8, %s9485_s15  ;;  %v9888_v12 = vpack.i.bf16 %v391_v10, %v9877_v9  ;;  %v9908_v17 = vld [vmem:[%s9831_s0 + $0x58] sm:$0xff]  ;;  %9168 = vset.pattern.permute.xlu1 %v9486_v15  ;;  %s9494_s13 = smov 91   ;;  %s9495_s21 = smov 90   ;;  %v10043_v47 = vld [vmem:[#allocation3 + $0x8] sm:$0xff]  ;;  %v10048_v49 = vpack.i.bf16 %v9895_v13, %v9898_v14  ;;  %vm821_vm3 = vcmask 1031168   ;;  %v10086_v9 = vld [vmem:[%s9831_s0 + $0x68] sm:$0xff] }
  0xe3   : > { %s11698_s28 = sld [smem:[#allocation31_spill]]  ;;  %v10065_v56 = vpack.i.bf16 %v9908_v17, %v9911_v18  ;;  %v10070_v61 = vld [vmem:[%s9831_s0 + $0x60] sm:$0xff]  ;;  %v10079_v6 = vld [vmem:[#allocation3] sm:$0xff]  ;;  %v10094_v15 = vld [vmem:[%s9831_s0 + $0x70] sm:$0xff]  ;;  %vm1013_vm4 = vcmask 900096   ;;  %vm1205_vm5 = vcmask 891904  }
  0xe4   : > { %vm1397_vm6 = vcmask 883712   ;;  %vm1589_vm7 = vcmask 752640   ;;  %vm1781_vm8 = vcmask 744448   ;;  %vm1973_vm9 = vcmask 736256   ;;  %s8371_s3 = smul.u32 96, %s9828_s9  ;;  %s11700_s24 = sld [smem:[#allocation20_spill]] }
  0xe5   : > { %8543 = vrot.lane.b32.xlu1 %v9883_v11, %s9485_s15  ;;  %s11701_s18 = sld [smem:[#allocation21_spill]]  ;;  %s7294_s19 = scalar_lea.sflag [#allocation5], %s9828_s9 }
  0xe6   : > { %8533 = vrot.lane.b32.xlu0 %v9888_v12, %s9485_s15 }
  0xe9   : > { %481 = vrot.lane.b32.xlu1 %v9895_v13, %s9485_s15  ;;  %s11699_s12 = smov %s11698_s28  ;;  %v2139_v43 = vld [vmem:[%s11698_s28] sm:$0xff]  ;;  %s9496_s28 = smov [#allocation11]  }
  0xea   : > { %479 = vrot.lane.b32.xlu0 %v9898_v14, %s9485_s15  ;;  %s8372_s5 = smul.u32 12, %s11700_s24 }
  0xeb   : > { %s8373_s8 = smul.u32 24, %s11701_s18 }
  0xed   : > { %485 = vrot.lane.b32.xlu1 %v9908_v17, %s9485_s15 }
  0xee   : > { %483 = vrot.lane.b32.xlu0 %v9911_v18, %s9485_s15 }
  0xf1   : > { %8553 = vrot.lane.b32.xlu1 %v9888_v12, %s9489_s1 }
  0xf2   : > { %8548 = vrot.lane.b32.xlu0 %v9874_v8, %s9489_s1 }
  0xf5   : > { %8563 = vrot.lane.b32.xlu1 %v9883_v11, %s9489_s1 }
  0xf6   : > { %8558 = vrot.lane.b32.xlu0 %v9863_v4, %s9489_s1 }
  0xf9   : > { %815 = vrot.lane.b32.xlu1 %v9895_v13, %s9489_s1 }
  0xfa   : > { %813 = vrot.lane.b32.xlu0 %v9898_v14, %s9489_s1 }
  0xfd   : > { %819 = vrot.lane.b32.xlu1 %v9908_v17, %s9489_s1 }
  0xfe   : > { %817 = vrot.lane.b32.xlu0 %v9911_v18, %s9489_s1 }
 0x101   : > { %8573 = vrot.lane.b32.xlu1 %v9888_v12, %s9490_s16 }
 0x102   : > { %8568 = vrot.lane.b32.xlu0 %v9874_v8, %s9490_s16 }
 0x105   : > { %8583 = vrot.lane.b32.xlu1 %v9883_v11, %s9490_s16 }
 0x106   : > { %8578 = vrot.lane.b32.xlu0 %v9863_v4, %s9490_s16 }
 0x109   : > { %1007 = vrot.lane.b32.xlu1 %v9895_v13, %s9490_s16 }
 0x10a   : > { %1005 = vrot.lane.b32.xlu0 %v9898_v14, %s9490_s16 }
 0x10d   : > { %1011 = vrot.lane.b32.xlu1 %v9908_v17, %s9490_s16 }
 0x10e   : > { %1009 = vrot.lane.b32.xlu0 %v9911_v18, %s9490_s16 }
 0x111   : > { %8593 = vrot.lane.b32.xlu1 %v9888_v12, %s9491_s26 }
 0x112   : > { %8588 = vrot.lane.b32.xlu0 %v9874_v8, %s9491_s26 }
 0x115   : > { %8603 = vrot.lane.b32.xlu1 %v9883_v11, %s9491_s26 }
 0x116   : > { %8598 = vrot.lane.b32.xlu0 %v9863_v4, %s9491_s26 }
 0x119   : > { %1199 = vrot.lane.b32.xlu1 %v9895_v13, %s9491_s26 }
 0x11a   : > { %1197 = vrot.lane.b32.xlu0 %v9898_v14, %s9491_s26 }
 0x11d   : > { %1203 = vrot.lane.b32.xlu1 %v9908_v17, %s9491_s26 }
 0x11e   : > { %1201 = vrot.lane.b32.xlu0 %v9911_v18, %s9491_s26 }
 0x121   : > { %8613 = vrot.lane.b32.xlu1 %v9888_v12, %s9492_s4 }
 0x122   : > { %8608 = vrot.lane.b32.xlu0 %v9874_v8, %s9492_s4 }
 0x125   : > { %8623 = vrot.lane.b32.xlu1 %v9883_v11, %s9492_s4 }
 0x126   : > { %8618 = vrot.lane.b32.xlu0 %v9863_v4, %s9492_s4 }
 0x129   : > { %1391 = vrot.lane.b32.xlu1 %v9895_v13, %s9492_s4 }
 0x12a   : > { %1389 = vrot.lane.b32.xlu0 %v9898_v14, %s9492_s4 }
 0x12d   : > { %1395 = vrot.lane.b32.xlu1 %v9908_v17, %s9492_s4 }
 0x12e   : > { %1393 = vrot.lane.b32.xlu0 %v9911_v18, %s9492_s4 }
 0x131   : > { %8633 = vrot.lane.b32.xlu1 %v9888_v12, %s9493_s27 }
 0x132   : > { %8628 = vrot.lane.b32.xlu0 %v9874_v8, %s9493_s27 }
 0x135   : > { %8643 = vrot.lane.b32.xlu1 %v9883_v11, %s9493_s27 }
 0x136   : > { %8638 = vrot.lane.b32.xlu0 %v9863_v4, %s9493_s27 }
 0x139   : > { %1583 = vrot.lane.b32.xlu1 %v9895_v13, %s9493_s27 }
 0x13a   : > { %1581 = vrot.lane.b32.xlu0 %v9898_v14, %s9493_s27 }
 0x13d   : > { %1587 = vrot.lane.b32.xlu1 %v9908_v17, %s9493_s27 }
 0x13e   : > { %1585 = vrot.lane.b32.xlu0 %v9911_v18, %s9493_s27 }
 0x141   : > { %8653 = vrot.lane.b32.xlu1 %v9888_v12, %s9494_s13 }
 0x142   : > { %8648 = vrot.lane.b32.xlu0 %v9874_v8, %s9494_s13 }
 0x145   : > { %8663 = vrot.lane.b32.xlu1 %v9883_v11, %s9494_s13 }
 0x146   : > { %8658 = vrot.lane.b32.xlu0 %v9863_v4, %s9494_s13 }
 0x149   : > { %1775 = vrot.lane.b32.xlu1 %v9895_v13, %s9494_s13 }
 0x14a   : > { %1773 = vrot.lane.b32.xlu0 %v9898_v14, %s9494_s13 }
 0x14d   : > { %1779 = vrot.lane.b32.xlu1 %v9908_v17, %s9494_s13 }
 0x14e   : > { %1777 = vrot.lane.b32.xlu0 %v9911_v18, %s9494_s13 }
 0x151   : > { %8673 = vrot.lane.b32.xlu1 %v9888_v12, %s9495_s21 }
 0x152   : > { %8668 = vrot.lane.b32.xlu0 %v9874_v8, %s9495_s21 }
 0x153   : > { %v8539_v19 = vpop.permute.xlu1 %8538 }
 0x154   : > { %v8529_v20 = vpop.permute.xlu0 %8528  ;;  %v8541_v21 = vunpack.i.h.bf16 %v8539_v19  ;;  %v8540_v22 = vunpack.i.l.bf16 %v8539_v19 }
 0x155   : > { %8683 = vrot.lane.b32.xlu1 %v9883_v11, %s9495_s21  ;;  %v8531_v23 = vunpack.i.h.bf16 %v8529_v20  ;;  %v8530_v24 = vunpack.i.l.bf16 %v8529_v20 }
 0x156   : > { %8678 = vrot.lane.b32.xlu0 %v9863_v4, %s9495_s21  ;;  %v491_v34 = vsel %vm487_vm1, %v8540_v22, %v8541_v21 }
 0x157   : > { %v8544_v25 = vpop.permute.xlu1 %8543  ;;  %v488_v33 = vsel %vm487_vm1, %v8530_v24, %v8531_v23 }
 0x158   : > { %v8546_v26 = vunpack.i.h.bf16 %v8544_v25  ;;  %v8545_v27 = vunpack.i.l.bf16 %v8544_v25  ;;  %v8534_v28 = vpop.permute.xlu0 %8533  ;;  %v8056_v41 = vpack.c.bf16 %v491_v34, %v488_v33 }
 0x159   : > { %v8536_v29 = vunpack.i.h.bf16 %v8534_v28  ;;  %v8535_v30 = vunpack.i.l.bf16 %v8534_v28  ;;  %1967 = vrot.lane.b32.xlu1 %v9895_v13, %s9495_s21 }
 0x15a   : > { %1965 = vrot.lane.b32.xlu0 %v9898_v14, %s9495_s21  ;;  %v492_v31 = vsel %vm487_vm1, %v8541_v21, %v8545_v27  ;;  %v493_v32 = vsel %vm487_vm1, %v8545_v27, %v8546_v26  ;;  %v10119_v26 = vld [vmem:[#allocation3 + $0x10] sm:$0xff] }
 0x15b   : > { %v482_v35 = vpop.permute.xlu1 %481  ;;  %v489_v36 = vsel %vm487_vm1, %v8531_v23, %v8535_v30  ;;  %v490_v37 = vsel %vm487_vm1, %v8535_v30, %v8536_v29 }
 0x15c   : > { %v480_v38 = vpop.permute.xlu0 %479  ;;  %v8054_v39 = vpack.c.bf16 %v492_v31, %v489_v36  ;;  %v8059_v40 = vpack.c.bf16 %v493_v32, %v490_v37 }
 0x15d   : > { %1971 = vrot.lane.b32.xlu1 %v9908_v17, %s9495_s21  ;;  %v494_v48 = vsel %vm487_vm1, %v480_v38, %v482_v35 }
 0x15e   : > { %1969 = vrot.lane.b32.xlu0 %v9911_v18, %s9495_s21  ;;  %8055 = vmatprep.subr.bf16.mxu0 %v8054_v39 }
 0x15f   : > { %8060 = vmatpush3.bf16.msra.mxu1 %v8059_v40  ;;  %8057 = vmatpush1.bf16.msra.mxu0 %v8056_v41  ;;  %v486_v42 = vpop.permute.xlu1 %485 }
 0x160   : > { %v484_v44 = vpop.permute.xlu0 %483  ;;  %7734 = vmatprep.subr.mxu1 %v9487_v16 }
 0x161   : > { %8689 = vrot.lane.b32.xlu1 %v9863_v4, %s9485_s15  ;;  %v495_v45 = vsel %vm487_vm1, %v482_v35, %v484_v44  ;;  %v496_v46 = vsel %vm487_vm1, %v484_v44, %v486_v42 }
 0x162   : > { %2142 = vperm.xlu0 %8687, %v2139_v43   ;;  %514 = vmatprep.subr.mxu0 %v495_v45 }
 0x163   : > { %7735 = vmatpush3.msra.mxu1 %v496_v46  ;;  %515 = vmatpush1.msra.mxu0 %v494_v48  ;;  %v8554_v51 = vpop.permute.xlu1 %8553 }
 0x164   : > { %v8556_v54 = vunpack.i.h.bf16 %v8554_v51  ;;  %v8549_v55 = vpop.permute.xlu0 %8548  ;;  %7496 = vmatmul.mubr.msk.f32.vlgmr.msra.gmra.mrb[0].mxu0 %vm506_vm2, %v10043_v47  ;;  %8065 = vmatprep.subr.bf16.mxu1 %v9484_v0  ;;  %v8555_v57 = vunpack.i.l.bf16 %v8554_v51 }
 0x165   : > { %8694 = vrot.lane.b32.xlu1 %v9883_v11, %s9485_s15  ;;  %7737 = vmatmul.mubr.msk.f32.vlgmr.msra.gmra.mrb[0].mxu1 %vm506_vm2, %v10043_v47  ;;  %v8551_v58 = vunpack.i.h.bf16 %v8549_v55  ;;  %v8550_v59 = vunpack.i.l.bf16 %v8549_v55 }
 0x166   : > { %8699 = vrot.lane.b32.xlu0 %v10048_v49, %s9485_s15  ;;  %8062 = vmatprep.subr.bf16.mxu0 %v8061_v50  ;;  %v824_v62 = vsel %vm821_vm3, %v8555_v57, %v8556_v54 }
 0x167   : > { %v8564_v60 = vpop.permute.xlu1 %8563  ;;  %8067 = vmatpush3.bf16.msra.mxu1 %v8066_v52  ;;  %8064 = vmatpush1.bf16.msra.mxu0 %v8063_v53  ;;  %v822_v7 = vsel %vm821_vm3, %v8550_v59, %v8551_v58  ;;  %v823_v10 = vsel %vm821_vm3, %v8551_v58, %v8555_v57  ;;  %v10153_v58 = vld [vmem:[#allocation3 + $0x18] sm:$0xff] }
 0x168   : > { %v8566_v63 = vunpack.i.h.bf16 %v8564_v60  ;;  %v8565_v1 = vunpack.i.l.bf16 %v8564_v60  ;;  %v8559_v2 = vpop.permute.xlu0 %8558  ;;  %7743 = vmatprep.subr.mxu1 %v9487_v16  ;;  %658 = vmatprep.subr.mxu0 %v9895_v13 }
 0x169   : > { %v8561_v3 = vunpack.i.h.bf16 %v8559_v2  ;;  %v8560_v5 = vunpack.i.l.bf16 %v8559_v2  ;;  %8704 = vrot.lane.b32.xlu1 %v10065_v56, %s9485_s15  ;;  %7745 = vmatprep.mubr.msk.f32.mxu1 %vm9488_vm0, %v9487_v16 }
 0x16a   : > { %v827_v8 = vsel %vm821_vm3, %v8565_v1, %v8566_v63  ;;  %2202 = vrot.lane.b32.xlu0 %v10070_v61, %s9485_s15  ;;  %718 = vmatprep.mubr.f32.mxu0 %v9487_v16 }
 0x16b   : > { %v825_v12 = vsel %vm821_vm3, %v8560_v5, %v8561_v3  ;;  %v816_v13 = vpop.permute.xlu1 %815  ;;  %7744 = vmatpush3.msra.mxu1 %v9911_v18  ;;  %659 = vmatpush1.msra.mxu0 %v9898_v14  ;;  %v826_v17 = vsel %vm821_vm3, %v8561_v3, %v8565_v1  ;;  %v8073_v19 = vpack.c.bf16 %v827_v8, %v824_v62  ;;  %v10105_v14 = vld [vmem:[%s9831_s0 + $0x78] sm:$0xff] }
 0x16c   : > { %v814_v20 = vpop.permute.xlu0 %813  ;;  %8072 = vmatprep.subr.bf16.mxu1 %v9484_v0  ;;  %7746 = vmatmul.mubr.msk.f32.vlgmr.msra.gmra.mrb[2].mxu1 %vm506_vm2, %v10079_v6  ;;  %v8068_v21 = vpack.c.bf16 %v826_v17, %v823_v10  ;;  %v8070_v22 = vpack.c.bf16 %v825_v12, %v822_v7 }
 0x16d   : > { %2204 = vrot.lane.b32.xlu1 %v10086_v9, %s9485_s15  ;;  %8074 = vmatpush3.bf16.msra.mxu1 %v8073_v19  ;;  %v828_v27 = vsel %vm821_vm3, %v814_v20, %v816_v13 }
 0x16e   : > { %2206 = vrot.lane.b32.xlu0 %v10094_v15, %s9485_s15  ;;  %8069 = vmatprep.subr.bf16.mxu0 %v8068_v21 }
 0x16f   : > { %7498 = vmatmul.mubr.msk.f32.vlgmr.msra.gmra.mrb[0].mxu0 %vm506_vm2, %v10079_v6  ;;  %v820_v18 = vpop.permute.xlu1 %819  ;;  %7752 = vmatprep.subr.mxu1 %v9487_v16 }
 0x170   : > { %8071 = vmatpush1.bf16.msra.mxu0 %v8070_v22  ;;  %v818_v23 = vpop.permute.xlu0 %817  ;;  %7754 = vmatprep.mubr.msk.f32.mxu1 %vm9488_vm0, %v9487_v16 }
 0x171   : > { %2208 = vrot.lane.b32.xlu1 %v10105_v14, %s9485_s15  ;;  %v829_v24 = vsel %vm821_vm3, %v816_v13, %v818_v23  ;;  %v830_v25 = vsel %vm821_vm3, %v818_v23, %v820_v18  ;;  %907 = vmatprep.mubr.f32.mxu0 %v9487_v16 }
 0x172   : > { %8709 = vrot.lane.b32.xlu0 %v9863_v4, %s9489_s1  ;;  %847 = vmatprep.subr.mxu0 %v829_v24 }
 0x173   : > { %7753 = vmatpush3.msra.mxu1 %v830_v25  ;;  %v8574_v28 = vpop.permute.xlu1 %8573 }
 0x174   : > { %848 = vmatpush1.msra.mxu0 %v828_v27  ;;  %v8576_v29 = vunpack.i.h.bf16 %v8574_v28  ;;  %v8569_v30 = vpop.permute.xlu0 %8568  ;;  %8079 = vmatprep.subr.bf16.mxu1 %v9484_v0  ;;  %v8575_v31 = vunpack.i.l.bf16 %v8574_v28 }
 0x175   : > { %8714 = vrot.lane.b32.xlu1 %v9883_v11, %s9489_s1  ;;  %7755 = vmatmul.mubr.msk.f32.vlgmr.msra.gmra.mrb[4].mxu1 %vm506_vm2, %v10119_v26  ;;  %v8571_v32 = vunpack.i.h.bf16 %v8569_v30  ;;  %v8570_v33 = vunpack.i.l.bf16 %v8569_v30 }
 0x176   : > { %8719 = vrot.lane.b32.xlu0 %v10048_v49, %s9489_s1  ;;  %7763 = vmatprep.mubr.msk.f32.mxu1 %vm9488_vm0, %v9487_v16  ;;  %v1016_v35 = vsel %vm1013_vm4, %v8575_v31, %v8576_v29 }
 0x177   : > { %v8584_v34 = vpop.permute.xlu1 %8583  ;;  %7500 = vmatmul.mubr.msk.f32.vlgmr.msra.gmra.mrb[0].mxu0 %vm506_vm2, %v10119_v26  ;;  %v1014_v41 = vsel %vm1013_vm4, %v8570_v33, %v8571_v32  ;;  %v1015_v45 = vsel %vm1013_vm4, %v8571_v32, %v8575_v31  ;;  %v10189_v33 = vld [vmem:[#allocation3 + $0x20] sm:$0xff] }
 0x178   : > { %v8586_v36 = vunpack.i.h.bf16 %v8584_v34  ;;  %v8585_v37 = vunpack.i.l.bf16 %v8584_v34  ;;  %v8579_v38 = vpop.permute.xlu0 %8578  ;;  %1099 = vmatprep.mubr.f32.mxu0 %v9487_v16 }
 0x179   : > { %v8581_v39 = vunpack.i.h.bf16 %v8579_v38  ;;  %v8580_v40 = vunpack.i.l.bf16 %v8579_v38  ;;  %8724 = vrot.lane.b32.xlu1 %v10065_v56, %s9489_s1 }
 0x17a   : > { %v1019_v42 = vsel %vm1013_vm4, %v8585_v37, %v8586_v36  ;;  %2533 = vrot.lane.b32.xlu0 %v10070_v61, %s9489_s1 }
 0x17b   : > { %v1017_v43 = vsel %vm1013_vm4, %v8580_v40, %v8581_v39  ;;  %v1008_v44 = vpop.permute.xlu1 %1007  ;;  %v1018_v46 = vsel %vm1013_vm4, %v8581_v39, %v8585_v37  ;;  %v8080_v48 = vpack.c.bf16 %v1019_v42, %v1016_v35 }
 0x17c   : > { %v1006_v50 = vpop.permute.xlu0 %1005  ;;  %v8075_v51 = vpack.c.bf16 %v1018_v46, %v1015_v45  ;;  %v8077_v52 = vpack.c.bf16 %v1017_v43, %v1014_v41 }
 0x17d   : > { %2535 = vrot.lane.b32.xlu1 %v10086_v9, %s9489_s1  ;;  %8081 = vmatpush3.bf16.msra.mxu1 %v8080_v48  ;;  %v1020_v59 = vsel %vm1013_vm4, %v1006_v50, %v1008_v44 }
 0x17e   : > { %2537 = vrot.lane.b32.xlu0 %v10094_v15, %s9489_s1  ;;  %8076 = vmatprep.subr.bf16.mxu0 %v8075_v51 }
 0x17f   : > { %8078 = vmatpush1.bf16.msra.mxu0 %v8077_v52  ;;  %v1012_v53 = vpop.permute.xlu1 %1011  ;;  %7761 = vmatprep.subr.mxu1 %v9487_v16 }
 0x180   : > { %v1010_v54 = vpop.permute.xlu0 %1009 }
 0x181   : > { %2539 = vrot.lane.b32.xlu1 %v10105_v14, %s9489_s1  ;;  %v1021_v55 = vsel %vm1013_vm4, %v1008_v44, %v1010_v54  ;;  %v1022_v57 = vsel %vm1013_vm4, %v1010_v54, %v1012_v53 }
 0x182   : > { %8729 = vrot.lane.b32.xlu0 %v9863_v4, %s9490_s16  ;;  %1039 = vmatprep.subr.mxu0 %v1021_v55 }
 0x183   : > { %7762 = vmatpush3.msra.mxu1 %v1022_v57  ;;  %1040 = vmatpush1.msra.mxu0 %v1020_v59  ;;  %v8594_v60 = vpop.permute.xlu1 %8593 }
 0x184   : > { %v8596_v62 = vunpack.i.h.bf16 %v8594_v60  ;;  %v8589_v63 = vpop.permute.xlu0 %8588  ;;  %8086 = vmatprep.subr.bf16.mxu1 %v9484_v0  ;;  %7764 = vmatmul.mubr.msk.f32.vlgmr.msra.gmra.mrb[6].mxu1 %vm506_vm2, %v10153_v58  ;;  %v8595_v1 = vunpack.i.l.bf16 %v8594_v60 }
 0x185   : > { %8734 = vrot.lane.b32.xlu1 %v9883_v11, %s9490_s16  ;;  %7502 = vmatmul.mubr.msk.f32.vlgmr.msra.gmra.mrb[0].mxu0 %vm506_vm2, %v10153_v58  ;;  %v8591_v2 = vunpack.i.h.bf16 %v8589_v63  ;;  %v8590_v3 = vunpack.i.l.bf16 %v8589_v63 }
 0x186   : > { %8739 = vrot.lane.b32.xlu0 %v10048_v49, %s9490_s16  ;;  %7772 = vmatprep.mubr.msk.f32.mxu1 %vm9488_vm0, %v9487_v16  ;;  %v1208_v7 = vsel %vm1205_vm5, %v8595_v1, %v8596_v62 }
 0x187   : > { %v8604_v5 = vpop.permute.xlu1 %8603  ;;  %1291 = vmatprep.mubr.f32.mxu0 %v9487_v16  ;;  %v1206_v19 = vsel %vm1205_vm5, %v8590_v3, %v8591_v2  ;;  %v1207_v18 = vsel %vm1205_vm5, %v8591_v2, %v8595_v1 }
 0x188   : > { %v8606_v8 = vunpack.i.h.bf16 %v8604_v5  ;;  %v8605_v10 = vunpack.i.l.bf16 %v8604_v5  ;;  %v8599_v12 = vpop.permute.xlu0 %8598  ;;  %v10225_v5 = vld [vmem:[#allocation3 + $0x28] sm:$0xff] }
 0x189   : > { %v8601_v13 = vunpack.i.h.bf16 %v8599_v12  ;;  %v8600_v17 = vunpack.i.l.bf16 %v8599_v12  ;;  %8744 = vrot.lane.b32.xlu1 %v10065_v56, %s9490_s16 }
 0x18a   : > { %v1211_v20 = vsel %vm1205_vm5, %v8605_v10, %v8606_v8  ;;  %2723 = vrot.lane.b32.xlu0 %v10070_v61, %s9490_s16 }
 0x18b   : > { %v1209_v21 = vsel %vm1205_vm5, %v8600_v17, %v8601_v13  ;;  %v1200_v22 = vpop.permute.xlu1 %1199  ;;  %v1210_v23 = vsel %vm1205_vm5, %v8601_v13, %v8605_v10  ;;  %v8087_v24 = vpack.c.bf16 %v1211_v20, %v1208_v7 }
 0x18c   : > { %v1198_v25 = vpop.permute.xlu0 %1197  ;;  %v8082_v27 = vpack.c.bf16 %v1210_v23, %v1207_v18  ;;  %v8084_v28 = vpack.c.bf16 %v1209_v21, %v1206_v19 }
 0x18d   : > { %2725 = vrot.lane.b32.xlu1 %v10086_v9, %s9490_s16  ;;  %8088 = vmatpush3.bf16.msra.mxu1 %v8087_v24  ;;  %v1212_v34 = vsel %vm1205_vm5, %v1198_v25, %v1200_v22 }
 0x18e   : > { %2727 = vrot.lane.b32.xlu0 %v10094_v15, %s9490_s16  ;;  %8083 = vmatprep.subr.bf16.mxu0 %v8082_v27 }
 0x18f   : > { %8085 = vmatpush1.bf16.msra.mxu0 %v8084_v28  ;;  %v1204_v29 = vpop.permute.xlu1 %1203  ;;  %7770 = vmatprep.subr.mxu1 %v9487_v16 }
 0x190   : > { %v1202_v30 = vpop.permute.xlu0 %1201 }
 0x191   : > { %2729 = vrot.lane.b32.xlu1 %v10105_v14, %s9490_s16  ;;  %v1213_v31 = vsel %vm1205_vm5, %v1200_v22, %v1202_v30  ;;  %v1214_v32 = vsel %vm1205_vm5, %v1202_v30, %v1204_v29 }
 0x192   : > { %8749 = vrot.lane.b32.xlu0 %v9863_v4, %s9491_s26  ;;  %1231 = vmatprep.subr.mxu0 %v1213_v31 }
 0x193   : > { %7771 = vmatpush3.msra.mxu1 %v1214_v32  ;;  %1232 = vmatpush1.msra.mxu0 %v1212_v34  ;;  %v8614_v35 = vpop.permute.xlu1 %8613 }
 0x194   : > { %v8616_v36 = vunpack.i.h.bf16 %v8614_v35  ;;  %v8609_v37 = vpop.permute.xlu0 %8608  ;;  %8093 = vmatprep.subr.bf16.mxu1 %v9484_v0  ;;  %7773 = vmatmul.mubr.msk.f32.vlgmr.msra.gmra.mrb[8].mxu1 %vm506_vm2, %v10189_v33  ;;  %v8615_v38 = vunpack.i.l.bf16 %v8614_v35 }
 0x195   : > { %8754 = vrot.lane.b32.xlu1 %v9883_v11, %s9491_s26  ;;  %7504 = vmatmul.mubr.msk.f32.vlgmr.msra.gmra.mrb[0].mxu0 %vm506_vm2, %v10189_v33  ;;  %v8611_v39 = vunpack.i.h.bf16 %v8609_v37  ;;  %v8610_v40 = vunpack.i.l.bf16 %v8609_v37 }
 0x196   : > { %8759 = vrot.lane.b32.xlu0 %v10048_v49, %s9491_s26  ;;  %7781 = vmatprep.mubr.msk.f32.mxu1 %vm9488_vm0, %v9487_v16  ;;  %v1400_v42 = vsel %vm1397_vm6, %v8615_v38, %v8616_v36 }
 0x197   : > { %v8624_v41 = vpop.permute.xlu1 %8623  ;;  %1483 = vmatprep.mubr.f32.mxu0 %v9487_v16  ;;  %v1398_v50 = vsel %vm1397_vm6, %v8610_v40, %v8611_v39  ;;  %v1399_v54 = vsel %vm1397_vm6, %v8611_v39, %v8615_v38 }
 0x198   : > { %v8626_v43 = vunpack.i.h.bf16 %v8624_v41  ;;  %v8625_v44 = vunpack.i.l.bf16 %v8624_v41  ;;  %v8619_v45 = vpop.permute.xlu0 %8618 }
 0x199   : > { %v8621_v46 = vunpack.i.h.bf16 %v8619_v45  ;;  %v8620_v48 = vunpack.i.l.bf16 %v8619_v45  ;;  %8764 = vrot.lane.b32.xlu1 %v10065_v56, %s9491_s26 }
 0x19a   : > { %v1403_v51 = vsel %vm1397_vm6, %v8625_v44, %v8626_v43  ;;  %2913 = vrot.lane.b32.xlu0 %v10070_v61, %s9491_s26 }
 0x19b   : > { %v1401_v52 = vsel %vm1397_vm6, %v8620_v48, %v8621_v46  ;;  %v1392_v53 = vpop.permute.xlu1 %1391  ;;  %v1402_v55 = vsel %vm1397_vm6, %v8621_v46, %v8625_v44  ;;  %v8094_v57 = vpack.c.bf16 %v1403_v51, %v1400_v42  ;;  %v10261_v42 = vld [vmem:[#allocation3 + $0x30] sm:$0xff] }
 0x19c   : > { %v1390_v59 = vpop.permute.xlu0 %1389  ;;  %v8089_v60 = vpack.c.bf16 %v1402_v55, %v1399_v54  ;;  %v8091_v62 = vpack.c.bf16 %v1401_v52, %v1398_v50 }
 0x19d   : > { %2915 = vrot.lane.b32.xlu1 %v10086_v9, %s9491_s26  ;;  %8095 = vmatpush3.bf16.msra.mxu1 %v8094_v57  ;;  %v1404_v7 = vsel %vm1397_vm6, %v1390_v59, %v1392_v53 }
 0x19e   : > { %2917 = vrot.lane.b32.xlu0 %v10094_v15, %s9491_s26  ;;  %8090 = vmatprep.subr.bf16.mxu0 %v8089_v60 }
 0x19f   : > { %8092 = vmatpush1.bf16.msra.mxu0 %v8091_v62  ;;  %v1396_v63 = vpop.permute.xlu1 %1395  ;;  %7779 = vmatprep.subr.mxu1 %v9487_v16 }
 0x1a0   : > { %v1394_v1 = vpop.permute.xlu0 %1393 }
 0x1a1   : > { %2919 = vrot.lane.b32.xlu1 %v10105_v14, %s9491_s26  ;;  %v1405_v2 = vsel %vm1397_vm6, %v1392_v53, %v1394_v1  ;;  %v1406_v3 = vsel %vm1397_vm6, %v1394_v1, %v1396_v63 }
 0x1a2   : > { %8769 = vrot.lane.b32.xlu0 %v9863_v4, %s9492_s4  ;;  %1423 = vmatprep.subr.mxu0 %v1405_v2 }
 0x1a3   : > { %7780 = vmatpush3.msra.mxu1 %v1406_v3  ;;  %1424 = vmatpush1.msra.mxu0 %v1404_v7  ;;  %v8634_v8 = vpop.permute.xlu1 %8633 }
 0x1a4   : > { %v8636_v10 = vunpack.i.h.bf16 %v8634_v8  ;;  %v8629_v12 = vpop.permute.xlu0 %8628  ;;  %8100 = vmatprep.subr.bf16.mxu1 %v9484_v0  ;;  %7782 = vmatmul.mubr.msk.f32.vlgmr.msra.gmra.mrb[10].mxu1 %vm506_vm2, %v10225_v5  ;;  %v8635_v13 = vunpack.i.l.bf16 %v8634_v8 }
 0x1a5   : > { %8774 = vrot.lane.b32.xlu1 %v9883_v11, %s9492_s4  ;;  %7506 = vmatmul.mubr.msk.f32.vlgmr.msra.gmra.mrb[0].mxu0 %vm506_vm2, %v10225_v5  ;;  %v8631_v17 = vunpack.i.h.bf16 %v8629_v12  ;;  %v8630_v19 = vunpack.i.l.bf16 %v8629_v12 }
 0x1a6   : > { %8779 = vrot.lane.b32.xlu0 %v10048_v49, %s9492_s4  ;;  %7790 = vmatprep.mubr.msk.f32.mxu1 %vm9488_vm0, %v9487_v16  ;;  %v1592_v21 = vsel %vm1589_vm7, %v8635_v13, %v8636_v10 }
 0x1a7   : > { %v8644_v20 = vpop.permute.xlu1 %8643  ;;  %1675 = vmatprep.mubr.f32.mxu0 %v9487_v16  ;;  %v1590_v27 = vsel %vm1589_vm7, %v8630_v19, %v8631_v17  ;;  %v1591_v31 = vsel %vm1589_vm7, %v8631_v17, %v8635_v13 }
 0x1a8   : > { %v8646_v22 = vunpack.i.h.bf16 %v8644_v20  ;;  %v8645_v18 = vunpack.i.l.bf16 %v8644_v20  ;;  %v8639_v23 = vpop.permute.xlu0 %8638 }
 0x1a9   : > { %v8641_v24 = vunpack.i.h.bf16 %v8639_v23  ;;  %v8640_v25 = vunpack.i.l.bf16 %v8639_v23  ;;  %8784 = vrot.lane.b32.xlu1 %v10065_v56, %s9492_s4 }
 0x1aa   : > { %v1595_v28 = vsel %vm1589_vm7, %v8645_v18, %v8646_v22  ;;  %3103 = vrot.lane.b32.xlu0 %v10070_v61, %s9492_s4  ;;  %v10297_v22 = vld [vmem:[#allocation3 + $0x38] sm:$0xff] }
 0x1ab   : > { %v1593_v29 = vsel %vm1589_vm7, %v8640_v25, %v8641_v24  ;;  %v1584_v30 = vpop.permute.xlu1 %1583  ;;  %v1594_v32 = vsel %vm1589_vm7, %v8641_v24, %v8645_v18  ;;  %v8101_v34 = vpack.c.bf16 %v1595_v28, %v1592_v21 }
 0x1ac   : > { %v1582_v35 = vpop.permute.xlu0 %1581  ;;  %v8096_v36 = vpack.c.bf16 %v1594_v32, %v1591_v31  ;;  %v8098_v37 = vpack.c.bf16 %v1593_v29, %v1590_v27 }
 0x1ad   : > { %3105 = vrot.lane.b32.xlu1 %v10086_v9, %s9492_s4  ;;  %8102 = vmatpush3.bf16.msra.mxu1 %v8101_v34  ;;  %v1596_v43 = vsel %vm1589_vm7, %v1582_v35, %v1584_v30 }
 0x1ae   : > { %3107 = vrot.lane.b32.xlu0 %v10094_v15, %s9492_s4  ;;  %8097 = vmatprep.subr.bf16.mxu0 %v8096_v36 }
 0x1af   : > { %8099 = vmatpush1.bf16.msra.mxu0 %v8098_v37  ;;  %v1588_v38 = vpop.permute.xlu1 %1587  ;;  %7788 = vmatprep.subr.mxu1 %v9487_v16 }
 0x1b0   : > { %v1586_v39 = vpop.permute.xlu0 %1585 }
 0x1b1   : > { %3109 = vrot.lane.b32.xlu1 %v10105_v14, %s9492_s4  ;;  %v1597_v40 = vsel %vm1589_vm7, %v1584_v30, %v1586_v39  ;;  %v1598_v41 = vsel %vm1589_vm7, %v1586_v39, %v1588_v38 }
 0x1b2   : > { %8789 = vrot.lane.b32.xlu0 %v9863_v4, %s9493_s27  ;;  %1615 = vmatprep.subr.mxu0 %v1597_v40 }
 0x1b3   : > { %7789 = vmatpush3.msra.mxu1 %v1598_v41  ;;  %1616 = vmatpush1.msra.mxu0 %v1596_v43  ;;  %v8654_v44 = vpop.permute.xlu1 %8653 }
 0x1b4   : > { %v8656_v45 = vunpack.i.h.bf16 %v8654_v44  ;;  %v8649_v46 = vpop.permute.xlu0 %8648  ;;  %8107 = vmatprep.subr.bf16.mxu1 %v9484_v0  ;;  %7791 = vmatmul.mubr.msk.f32.vlgmr.msra.gmra.mrb[12].mxu1 %vm506_vm2, %v10261_v42  ;;  %v8655_v48 = vunpack.i.l.bf16 %v8654_v44 }
 0x1b5   : > { %8794 = vrot.lane.b32.xlu1 %v9883_v11, %s9493_s27  ;;  %7508 = vmatmul.mubr.msk.f32.vlgmr.msra.gmra.mrb[0].mxu0 %vm506_vm2, %v10261_v42  ;;  %v8651_v50 = vunpack.i.h.bf16 %v8649_v46  ;;  %v8650_v51 = vunpack.i.l.bf16 %v8649_v46  ;;  %v10330_v46 = vld [vmem:[%s9831_s0 + $0x30] sm:$0xff] }
 0x1b6   : > { %8799 = vrot.lane.b32.xlu0 %v10048_v49, %s9493_s27  ;;  %1867 = vmatprep.mubr.f32.mxu0 %v9487_v16  ;;  %v1784_v53 = vsel %vm1781_vm8, %v8655_v48, %v8656_v45  ;;  %v10327_v45 = vld [vmem:[%s9831_s0 + $0x28] sm:$0xff] }
 0x1b7   : > { %v8664_v52 = vpop.permute.xlu1 %8663  ;;  %7799 = vmatprep.mubr.msk.f32.mxu1 %vm9488_vm0, %v9487_v16  ;;  %v1782_v62 = vsel %vm1781_vm8, %v8650_v51, %v8651_v50  ;;  %v1783_v3 = vsel %vm1781_vm8, %v8651_v50, %v8655_v48  ;;  %v8828_v48 = vpack.i.bf16 %v10330_v46, %v10327_v45  ;;  %v10337_v50 = vld [vmem:[%s9831_s0 + $0x48] sm:$0xff]  ;;  %v10340_v51 = vld [vmem:[%s9831_s0 + $0x50] sm:$0xff] }
 0x1b8   : > { %v8666_v54 = vunpack.i.h.bf16 %v8664_v52  ;;  %v8665_v55 = vunpack.i.l.bf16 %v8664_v52  ;;  %v8659_v57 = vpop.permute.xlu0 %8658  ;;  %v10344_v52 = vpack.i.bf16 %v10340_v51, %v10337_v50 }
 0x1b9   : > { %v8661_v59 = vunpack.i.h.bf16 %v8659_v57  ;;  %v8660_v60 = vunpack.i.l.bf16 %v8659_v57  ;;  %8804 = vrot.lane.b32.xlu1 %v10065_v56, %s9493_s27 }
 0x1ba   : > { %v1787_v63 = vsel %vm1781_vm8, %v8665_v55, %v8666_v54  ;;  %3293 = vrot.lane.b32.xlu0 %v10070_v61, %s9493_s27 }
 0x1bb   : > { %v1785_v1 = vsel %vm1781_vm8, %v8660_v60, %v8661_v59  ;;  %v1776_v2 = vpop.permute.xlu1 %1775  ;;  %v1786_v7 = vsel %vm1781_vm8, %v8661_v59, %v8665_v55  ;;  %v8108_v8 = vpack.c.bf16 %v1787_v63, %v1784_v53  ;;  %v10350_v59 = vld [vmem:[#allocation3 + $0x40] sm:$0xff]  ;;  %v10353_v60 = vld [vmem:[%s9831_s0 + $0x20] sm:$0xff] }
 0x1bc   : > { %v1774_v10 = vpop.permute.xlu0 %1773  ;;  %v8103_v12 = vpack.c.bf16 %v1786_v7, %v1783_v3  ;;  %v8105_v13 = vpack.c.bf16 %v1785_v1, %v1782_v62  ;;  %v10356_v62 = vld [vmem:[%s9831_s0 + $0x40] sm:$0xff] }
 0x1bd   : > { %3295 = vrot.lane.b32.xlu1 %v10086_v9, %s9493_s27  ;;  %8109 = vmatpush3.bf16.msra.mxu1 %v8108_v8  ;;  %v1788_v18 = vsel %vm1781_vm8, %v1774_v10, %v1776_v2  ;;  %v8838_v63 = vpack.i.bf16 %v10356_v62, %v10353_v60  ;;  %v10378_v8 = vpack.i.bf16 %v10094_v15, %v10086_v9 }
 0x1be   : > { %3297 = vrot.lane.b32.xlu0 %v10094_v15, %s9493_s27  ;;  %8104 = vmatprep.subr.bf16.mxu0 %v8103_v12 }
 0x1bf   : > { %8106 = vmatpush1.bf16.msra.mxu0 %v8105_v13  ;;  %v1780_v17 = vpop.permute.xlu1 %1779  ;;  %7797 = vmatprep.subr.mxu1 %v9487_v16 }
 0x1c0   : > { %v1778_v19 = vpop.permute.xlu0 %1777 }
 0x1c1   : > { %3299 = vrot.lane.b32.xlu1 %v10105_v14, %s9493_s27  ;;  %v1789_v20 = vsel %vm1781_vm8, %v1776_v2, %v1778_v19  ;;  %v1790_v21 = vsel %vm1781_vm8, %v1778_v19, %v1780_v17 }
 0x1c2   : > { %8809 = vrot.lane.b32.xlu0 %v9863_v4, %s9494_s13  ;;  %1807 = vmatprep.subr.mxu0 %v1789_v20  ;;  %v10387_v20 = vpack.i.bf16 %v10070_v61, %v10356_v62 }
 0x1c3   : > { %7798 = vmatpush3.msra.mxu1 %v1790_v21  ;;  %1808 = vmatpush1.msra.mxu0 %v1788_v18  ;;  %v8674_v23 = vpop.permute.xlu1 %8673 }
 0x1c4   : > { %v8676_v24 = vunpack.i.h.bf16 %v8674_v23  ;;  %v8669_v25 = vpop.permute.xlu0 %8668  ;;  %7510 = vmatmul.mubr.msk.f32.vlgmr.msra.gmra.mrb[0].mxu0 %vm506_vm2, %v10297_v22  ;;  %8114 = vmatprep.subr.bf16.mxu1 %v9484_v0  ;;  %v8675_v27 = vunpack.i.l.bf16 %v8674_v23  ;;  %v10393_v23 = vld [vmem:[%s9838_s10 + $0x8] sm:$0xff] }
 0x1c5   : > { %8814 = vrot.lane.b32.xlu1 %v9883_v11, %s9494_s13  ;;  %7800 = vmatmul.mubr.msk.f32.vlgmr.msra.gmra.mrb[14].mxu1 %vm506_vm2, %v10297_v22  ;;  %v8671_v28 = vunpack.i.h.bf16 %v8669_v25  ;;  %v8670_v4 = vunpack.i.l.bf16 %v8669_v25 }
 0x1c6   : > { %8819 = vrot.lane.b32.xlu0 %v10048_v49, %s9494_s13  ;;  %7808 = vmatprep.mubr.msk.f32.mxu1 %vm9488_vm0, %v9487_v16  ;;  %v1976_v30 = vsel %vm1973_vm9, %v8675_v27, %v8676_v24 }
 0x1c7   : > { %v8684_v29 = vpop.permute.xlu1 %8683  ;;  %2059 = vmatprep.mubr.f32.mxu0 %v9487_v16  ;;  %v1974_v49 = vsel %vm1973_vm9, %v8670_v4, %v8671_v28  ;;  %v1975_v39 = vsel %vm1973_vm9, %v8671_v28, %v8675_v27  ;;  %v10402_v27 = vld [vmem:[%s9838_s10 + $0x10] sm:$0xff]  ;;  %v10406_v4 = vld [vmem:[%s9838_s10] sm:$0xff] }
 0x1c8   : > { %v8686_v31 = vunpack.i.h.bf16 %v8684_v29  ;;  %v8685_v11 = vunpack.i.l.bf16 %v8684_v29  ;;  %v8679_v32 = vpop.permute.xlu0 %8678 }
 0x1c9   : > { %v8681_v34 = vunpack.i.h.bf16 %v8679_v32  ;;  %v8680_v35 = vunpack.i.l.bf16 %v8679_v32  ;;  %8824 = vrot.lane.b32.xlu1 %v10065_v56, %s9494_s13 }
 0x1ca   : > { %v1979_v36 = vsel %vm1973_vm9, %v8685_v11, %v8686_v31  ;;  %3483 = vrot.lane.b32.xlu0 %v10070_v61, %s9494_s13 }
 0x1cb   : > { %v1977_v37 = vsel %vm1973_vm9, %v8680_v35, %v8681_v34  ;;  %v1968_v38 = vpop.permute.xlu1 %1967  ;;  %v1978_v40 = vsel %vm1973_vm9, %v8681_v34, %v8685_v11  ;;  %v8115_v41 = vpack.c.bf16 %v1979_v36, %v1976_v30 }
 0x1cc   : > { %v1966_v43 = vpop.permute.xlu0 %1965  ;;  %v8110_v44 = vpack.c.bf16 %v1978_v40, %v1975_v39  ;;  %v8112_v56 = vpack.c.bf16 %v1977_v37, %v1974_v49 }
 0x1cd   : > { %3485 = vrot.lane.b32.xlu1 %v10086_v9, %s9494_s13  ;;  %8116 = vmatpush3.bf16.msra.mxu1 %v8115_v41  ;;  %v1980_v1 = vsel %vm1973_vm9, %v1966_v43, %v1968_v38 }
 0x1ce   : > { %3487 = vrot.lane.b32.xlu0 %v10094_v15, %s9494_s13  ;;  %8111 = vmatprep.subr.bf16.mxu0 %v8110_v44 }
 0x1cf   : > { %8113 = vmatpush1.bf16.msra.mxu0 %v8112_v56  ;;  %v1972_v53 = vpop.permute.xlu1 %1971  ;;  %7806 = vmatprep.subr.mxu1 %v9487_v16 }
 0x1d0   : > { %v1970_v54 = vpop.permute.xlu0 %1969 }
 0x1d1   : > { %8829 = vrot.lane.b32.xlu1 %v8828_v48, %s9495_s21  ;;  %v1981_v55 = vsel %vm1973_vm9, %v1968_v38, %v1970_v54  ;;  %v1982_v57 = vsel %vm1973_vm9, %v1970_v54, %v1972_v53 }
 0x1d2   : > { %8834 = vrot.lane.b32.xlu0 %v10344_v52, %s9495_s21  ;;  %1999 = vmatprep.subr.mxu0 %v1981_v55 }
 0x1d3   : > { %7807 = vmatpush3.msra.mxu1 %v1982_v57  ;;  %2000 = vmatpush1.msra.mxu0 %v1980_v1  ;;  %v8690_v2 = vpop.permute.xlu1 %8689  ;;  %v8129_v57 = vpack.c.bf16 %v10340_v51, %v10330_v46 }
 0x1d4   : > { %7809 = vmatmul.mubr.msk.f32.vlgmr.msra.gmra.mrb[16].mxu1 %vm506_vm2, %v10350_v59  ;;  %7512 = vmatmul.mubr.msk.f32.vlgmr.msra.gmra.mrb[0].mxu0 %vm506_vm2, %v10350_v59  ;;  %v8692_v29 = vunpack.i.h.bf16 %v8690_v2  ;;  %v8691_v30 = vunpack.i.l.bf16 %v8690_v2  ;;  %v8124_v2 = vpack.c.bf16 %v10337_v50, %v10327_v45 }
 0x1d5   : > { %8839 = vrot.lane.b32.xlu1 %v8838_v63, %s9495_s21  ;;  %8121 = vmatprep.subr.bf16.mxu1 %v9484_v0 }
 0x1d6   : > { %3675 = vrot.lane.b32.xlu0 %v10086_v9, %s9495_s21  ;;  %7817 = vmatprep.mubr.msk.f32.mxu1 %vm9488_vm0, %v9487_v16  ;;  %v2210_v35 = vsel %vm487_vm1, %v8691_v30, %v8692_v29 }
 0x1d7   : > { %v8695_v3 = vpop.permute.xlu1 %8694  ;;  %2295 = vmatprep.mubr.f32.mxu0 %v9487_v16 }
 0x1d8   : > { %v8697_v7 = vunpack.i.h.bf16 %v8695_v3  ;;  %v8696_v10 = vunpack.i.l.bf16 %v8695_v3  ;;  %v8126_v3 = vpack.c.bf16 %v10356_v62, %v10353_v60 }
 0x1d9   : > { %3677 = vrot.lane.b32.xlu1 %v10094_v15, %s9495_s21 }
 0x1da   : > { %8844 = vrot.lane.b32.xlu0 %v10344_v52, %s9485_s15  ;;  %v2212_v13 = vsel %vm487_vm1, %v8696_v10, %v8697_v7  ;;  %v2211_v36 = vsel %vm487_vm1, %v8692_v29, %v8696_v10 }
 0x1db   : > { %v8705_v12 = vpop.permute.xlu1 %8704 }
 0x1dc   : > { %v8707_v17 = vunpack.i.h.bf16 %v8705_v12  ;;  %v8706_v19 = vunpack.i.l.bf16 %v8705_v12 }
 0x1dd   : > { %8849 = vrot.lane.b32.xlu1 %v10378_v8, %s9485_s15 }
 0x1de   : > { %v2215_v21 = vsel %vm487_vm1, %v8706_v19, %v8707_v17  ;;  %3673 = vrot.lane.b32.xlu0 %v10070_v61, %s9495_s21 }
 0x1df   : > { %v2205_v18 = vpop.permute.xlu1 %2204  ;;  %v8122_v24 = vpack.c.bf16 %v2215_v21, %v2212_v13  ;;  %v10456_v21 = vld [vmem:[%s9831_s0 + $0x58] sm:$0xff] }
 0x1e1   : > { %v10395_v25 = vpop.permute.xlu0 %2142  ;;  %8854 = vrot.lane.b32.xlu1 %v10387_v20, %s9485_s15  ;;  %8123 = vmatpush3.bf16.msra.mxu1 %v8122_v24 }
 0x1e2   : > { %3912 = vrot.lane.b32.xlu0 %v10393_v23, %s9485_s15  ;;  %7815 = vmatprep.subr.mxu1 %v9487_v16 }
 0x1e3   : > { %v2209_v28 = vpop.permute.xlu1 %2208 }
 0x1e5   : > { %v8700_v31 = vpop.permute.xlu0 %8699  ;;  %3914 = vrot.lane.b32.xlu1 %v10402_v27, %s9485_s15 }
 0x1e6   : > { %v8702_v11 = vunpack.i.h.bf16 %v8700_v31  ;;  %v8701_v32 = vunpack.i.l.bf16 %v8700_v31  ;;  %3910 = vrot.lane.b32.xlu0 %v10406_v4, %s9485_s15 }
 0x1e7   : > { %v8715_v34 = vpop.permute.xlu1 %8714 }
 0x1e8   : > { %v2213_v49 = vsel %vm487_vm1, %v8701_v32, %v8702_v11  ;;  %v2214_v37 = vsel %vm487_vm1, %v8702_v11, %v8706_v19  ;;  %v8717_v43 = vunpack.i.h.bf16 %v8715_v34  ;;  %v8716_v44 = vunpack.i.l.bf16 %v8715_v34 }
 0x1e9   : > { %v2203_v38 = vpop.permute.xlu0 %2202  ;;  %8859 = vrot.lane.b32.xlu1 %v10344_v52, %s9489_s1  ;;  %v8117_v39 = vpack.c.bf16 %v2214_v37, %v2211_v36  ;;  %v8119_v40 = vpack.c.bf16 %v2213_v49, %v2210_v35 }
 0x1ea   : > { %8864 = vrot.lane.b32.xlu0 %v10378_v8, %s9489_s1  ;;  %v2216_v63 = vsel %vm487_vm1, %v2203_v38, %v2205_v18  ;;  %v2543_v7 = vsel %vm821_vm3, %v8716_v44, %v8717_v43  ;;  %v8893_v43 = vpack.i.bf16 %v10105_v14, %v10456_v21 }
 0x1eb   : > { %8118 = vmatprep.subr.bf16.mxu0 %v8117_v39  ;;  %v8725_v41 = vpop.permute.xlu1 %8724 }
 0x1ec   : > { %8120 = vmatpush1.bf16.msra.mxu0 %v8119_v40  ;;  %v8727_v56 = vunpack.i.h.bf16 %v8725_v41  ;;  %v8726_v48 = vunpack.i.l.bf16 %v8725_v41 }
 0x1ed   : > { %v2207_v53 = vpop.permute.xlu0 %2206  ;;  %8869 = vrot.lane.b32.xlu1 %v10387_v20, %s9489_s1 }
 0x1ee   : > { %4243 = vrot.lane.b32.xlu0 %v10393_v23, %s9489_s1  ;;  %v2217_v54 = vsel %vm487_vm1, %v2205_v18, %v2207_v53  ;;  %v2218_v55 = vsel %vm487_vm1, %v2207_v53, %v2209_v28  ;;  %v2546_v10 = vsel %vm821_vm3, %v8726_v48, %v8727_v56 }
 0x1ef   : > { %2235 = vmatprep.subr.mxu0 %v2217_v54  ;;  %7816 = vmatpush3.msra.mxu1 %v2218_v55  ;;  %v10429_v1 = vpop.permute.xlu1 %2535  ;;  %v8136_v12 = vpack.c.bf16 %v2546_v10, %v2543_v7 }
 0x1f0   : > { %2236 = vmatpush1.msra.mxu0 %v2216_v63  ;;  %8128 = vmatprep.subr.bf16.mxu1 %v9484_v0 }
 0x1f1   : > { %v8710_v46 = vpop.permute.xlu0 %8709  ;;  %4245 = vrot.lane.b32.xlu1 %v10402_v27, %s9489_s1  ;;  %7818 = vmatmul.mubr.msk.f32.vlgmr.msra.gmra.mrb[18].mxu1 %vm506_vm2, %v10043_v47 }
 0x1f2   : > { %4241 = vrot.lane.b32.xlu0 %v10406_v4, %s9489_s1  ;;  %8130 = vmatpush3.bf16.msra.mxu1 %v8129_v57  ;;  %v8712_v45 = vunpack.i.h.bf16 %v8710_v46  ;;  %v8711_v51 = vunpack.i.l.bf16 %v8710_v46  ;;  %v10515_v57 = vld [vmem:[%s9831_s0 + $0x70] sm:$0xff] }
 0x1f3   : > { %v2540_v60 = vpop.permute.xlu1 %2539  ;;  %7514 = vmatmul.mubr.msk.f32.vlgmr.msra.gmra.mrb[2].mxu0 %vm506_vm2, %v10043_v47  ;;  %8125 = vmatprep.subr.bf16.mxu0 %v8124_v2  ;;  %v9175_v47 = vld [vmem:[%s9831_s0 + $0x38] sm:$0xff] }
 0x1f4   : > { %7824 = vmatprep.subr.mxu1 %v9487_v16  ;;  %8127 = vmatpush1.bf16.msra.mxu0 %v8126_v3  ;;  %v8883_v18 = vpack.i.bf16 %v10456_v21, %v9175_v47  ;;  %v2541_v24 = vsel %vm821_vm3, %v8711_v51, %v8712_v45  ;;  %v2542_v29 = vsel %vm821_vm3, %v8712_v45, %v8716_v44 }
 0x1f5   : > { %v8720_v13 = vpop.permute.xlu0 %8719  ;;  %8874 = vrot.lane.b32.xlu1 %v10344_v52, %s9490_s16  ;;  %7826 = vmatprep.mubr.msk.f32.mxu1 %vm9488_vm0, %v9487_v16 }
 0x1f6   : > { %v8722_v17 = vunpack.i.h.bf16 %v8720_v13  ;;  %v8721_v19 = vunpack.i.l.bf16 %v8720_v13  ;;  %8879 = vrot.lane.b32.xlu0 %v10378_v8, %s9490_s16  ;;  %7825 = vmatpush3.msra.mxu1 %v10094_v15 }
 0x1f7   : > { %8135 = vmatprep.subr.bf16.mxu1 %v9484_v0  ;;  %v10461_v28 = vpop.permute.xlu1 %8734  ;;  %7827 = vmatmul.mubr.msk.f32.vlgmr.msra.gmra.mrb[20].mxu1 %vm506_vm2, %v10079_v6 }
 0x1f8   : > { %v2544_v8 = vsel %vm821_vm3, %v8721_v19, %v8722_v17  ;;  %v8737_v15 = vunpack.i.h.bf16 %v10461_v28  ;;  %v8736_v30 = vunpack.i.l.bf16 %v10461_v28  ;;  %8137 = vmatpush3.bf16.msra.mxu1 %v8136_v12  ;;  %2379 = vmatprep.subr.mxu0 %v10086_v9  ;;  %v2545_v31 = vsel %vm821_vm3, %v8722_v17, %v8726_v48  ;;  %v10528_v12 = vld [vmem:[%s9831_s0 + $0x60] sm:$0xff]  ;;  %v10537_v19 = vld [vmem:[%s9838_s10 + $0x18] sm:$0xff] }
 0x1f9   : > { %v2534_v11 = vpop.permute.xlu0 %2533  ;;  %3489 = vrot.lane.b32.xlu1 %v10105_v14, %s9494_s13  ;;  %2380 = vmatpush1.msra.mxu0 %v10070_v61  ;;  %v8131_v32 = vpack.c.bf16 %v2545_v31, %v2542_v29  ;;  %v8133_v34 = vpack.c.bf16 %v2544_v8, %v2541_v24  ;;  %v10532_v13 = vpack.i.bf16 %v10528_v12, %v10356_v62 }
 0x1fa   : > { %8884 = vrot.lane.b32.xlu0 %v8883_v18, %s9495_s21  ;;  %2439 = vmatprep.mubr.f32.mxu0 %v9487_v16  ;;  %v2733_v9 = vsel %vm1013_vm4, %v8736_v30, %v8737_v15  ;;  %v2547_v39 = vsel %vm821_vm3, %v2534_v11, %v10429_v1 }
 0x1fb   : > { %8132 = vmatprep.subr.bf16.mxu0 %v8131_v32  ;;  %v8745_v35 = vpop.permute.xlu1 %8744  ;;  %7516 = vmatmul.mubr.msk.f32.vlgmr.msra.gmra.mrb[2].mxu0 %vm506_vm2, %v10079_v6 }
 0x1fc   : > { %v8747_v49 = vunpack.i.h.bf16 %v8745_v35  ;;  %v8746_v36 = vunpack.i.l.bf16 %v8745_v35  ;;  %8134 = vmatpush1.bf16.msra.mxu0 %v8133_v34  ;;  %7833 = vmatprep.subr.mxu1 %v9487_v16 }
 0x1fd   : > { %v2538_v37 = vpop.permute.xlu0 %2537  ;;  %8889 = vrot.lane.b32.xlu1 %v10387_v20, %s9490_s16  ;;  %7835 = vmatprep.mubr.msk.f32.mxu1 %vm9488_vm0, %v9487_v16 }
 0x1fe   : > { %v2736_v61 = vsel %vm1013_vm4, %v8746_v36, %v8747_v49  ;;  %4433 = vrot.lane.b32.xlu0 %v10393_v23, %s9490_s16  ;;  %v2548_v6 = vsel %vm821_vm3, %v10429_v1, %v2538_v37  ;;  %v2549_v38 = vsel %vm821_vm3, %v2538_v37, %v2540_v60  ;;  %2626 = vmatprep.mubr.f32.mxu0 %v9487_v16 }
 0x1ff   : > { %2566 = vmatprep.subr.mxu0 %v2548_v6  ;;  %7834 = vmatpush3.msra.mxu1 %v2549_v38  ;;  %v2726_v20 = vpop.permute.xlu1 %2725  ;;  %v8143_v40 = vpack.c.bf16 %v2736_v61, %v2733_v9 }
 0x200   : > { %2567 = vmatpush1.msra.mxu0 %v2547_v39  ;;  %8142 = vmatprep.subr.bf16.mxu1 %v9484_v0 }
 0x201   : > { %v8730_v41 = vpop.permute.xlu0 %8729  ;;  %4435 = vrot.lane.b32.xlu1 %v10402_v27, %s9490_s16  ;;  %7836 = vmatmul.mubr.msk.f32.vlgmr.msra.gmra.mrb[22].mxu1 %vm506_vm2, %v10119_v26 }
 0x202   : > { %3679 = vrot.lane.b32.xlu0 %v10105_v14, %s9495_s21  ;;  %8144 = vmatpush3.bf16.msra.mxu1 %v8143_v40  ;;  %v8732_v44 = vunpack.i.h.bf16 %v8730_v41  ;;  %v8731_v56 = vunpack.i.l.bf16 %v8730_v41  ;;  %v10512_v14 = vld [vmem:[%s9831_s0 + $0x68] sm:$0xff] }
 0x203   : > { %v2730_v48 = vpop.permute.xlu1 %2729  ;;  %7518 = vmatmul.mubr.msk.f32.vlgmr.msra.gmra.mrb[2].mxu0 %vm506_vm2, %v10119_v26  ;;  %7842 = vmatprep.subr.mxu1 %v9487_v16  ;;  %v10519_v26 = vpack.i.bf16 %v10515_v57, %v10512_v14 }
 0x204   : > { %7844 = vmatprep.mubr.msk.f32.mxu1 %vm9488_vm0, %v9487_v16  ;;  %2816 = vmatprep.mubr.f32.mxu0 %v9487_v16  ;;  %v2731_v63 = vsel %vm1013_vm4, %v8731_v56, %v8732_v44  ;;  %v2732_v2 = vsel %vm1013_vm4, %v8732_v44, %v8736_v30  ;;  %v10572_v56 = vld [vmem:[%s9831_s0 + $0x78] sm:$0xff] }
 0x205   : > { %v8740_v53 = vpop.permute.xlu0 %8739  ;;  %8894 = vrot.lane.b32.xlu1 %v8893_v43, %s9485_s15 }
 0x206   : > { %v8742_v54 = vunpack.i.h.bf16 %v8740_v53  ;;  %v8741_v55 = vunpack.i.l.bf16 %v8740_v53  ;;  %4431 = vrot.lane.b32.xlu0 %v10406_v4, %s9490_s16 }
 0x207   : > { %v8755_v1 = vpop.permute.xlu1 %8754 }
 0x208   : > { %v2734_v3 = vsel %vm1013_vm4, %v8741_v55, %v8742_v54  ;;  %v8757_v7 = vunpack.i.h.bf16 %v8755_v1  ;;  %v8756_v10 = vunpack.i.l.bf16 %v8755_v1  ;;  %v2735_v46 = vsel %vm1013_vm4, %v8742_v54, %v8746_v36 }
 0x209   : > { %v2724_v45 = vpop.permute.xlu0 %2723  ;;  %8899 = vrot.lane.b32.xlu1 %v10344_v52, %s9491_s26  ;;  %v8138_v51 = vpack.c.bf16 %v2735_v46, %v2732_v2  ;;  %v8140_v60 = vpack.c.bf16 %v2734_v3, %v2731_v63 }
 0x20a   : > { %8904 = vrot.lane.b32.xlu0 %v10519_v26, %s9491_s26  ;;  %v2923_v47 = vsel %vm1205_vm5, %v8756_v10, %v8757_v7  ;;  %v2737_v30 = vsel %vm1013_vm4, %v2724_v45, %v2726_v20 }
 0x20b   : > { %8139 = vmatprep.subr.bf16.mxu0 %v8138_v51  ;;  %v8765_v17 = vpop.permute.xlu1 %8764 }
 0x20c   : > { %v8767_v18 = vunpack.i.h.bf16 %v8765_v17  ;;  %v8766_v24 = vunpack.i.l.bf16 %v8765_v17  ;;  %8141 = vmatpush1.bf16.msra.mxu0 %v8140_v60 }
 0x20d   : > { %v2728_v28 = vpop.permute.xlu0 %2727  ;;  %8909 = vrot.lane.b32.xlu1 %v10532_v13, %s9491_s26 }
 0x20e   : > { %v2926_v29 = vsel %vm1205_vm5, %v8766_v24, %v8767_v18  ;;  %3916 = vrot.lane.b32.xlu0 %v10537_v19, %s9485_s15  ;;  %v2738_v8 = vsel %vm1013_vm4, %v2726_v20, %v2728_v28  ;;  %v2739_v15 = vsel %vm1013_vm4, %v2728_v28, %v2730_v48  ;;  %v10576_v48 = vpack.i.bf16 %v10572_v56, %v10456_v21 }
 0x20f   : > { %2756 = vmatprep.subr.mxu0 %v2738_v8  ;;  %7843 = vmatpush3.msra.mxu1 %v2739_v15  ;;  %v2916_v31 = vpop.permute.xlu1 %2915  ;;  %v8150_v11 = vpack.c.bf16 %v2926_v29, %v2923_v47 }
 0x210   : > { %2757 = vmatpush1.msra.mxu0 %v2737_v30  ;;  %8149 = vmatprep.subr.bf16.mxu1 %v9484_v0 }
 0x211   : > { %v8750_v32 = vpop.permute.xlu0 %8749  ;;  %4623 = vrot.lane.b32.xlu1 %v10393_v23, %s9491_s26  ;;  %7845 = vmatmul.mubr.msk.f32.vlgmr.msra.gmra.mrb[24].mxu1 %vm506_vm2, %v10153_v58 }
 0x212   : > { %4625 = vrot.lane.b32.xlu0 %v10402_v27, %s9491_s26  ;;  %8151 = vmatpush3.bf16.msra.mxu1 %v8150_v11  ;;  %v8752_v34 = vunpack.i.h.bf16 %v8750_v32  ;;  %v8751_v35 = vunpack.i.l.bf16 %v8750_v32 }
 0x213   : > { %v2920_v9 = vpop.permute.xlu1 %2919  ;;  %7520 = vmatmul.mubr.msk.f32.vlgmr.msra.gmra.mrb[2].mxu0 %vm506_vm2, %v10153_v58  ;;  %7851 = vmatprep.subr.mxu1 %v9487_v16 }
 0x214   : > { %7853 = vmatprep.mubr.msk.f32.mxu1 %vm9488_vm0, %v9487_v16  ;;  %3006 = vmatprep.mubr.f32.mxu0 %v9487_v16  ;;  %v2921_v61 = vsel %vm1205_vm5, %v8751_v35, %v8752_v34  ;;  %v2922_v6 = vsel %vm1205_vm5, %v8752_v34, %v8756_v10 }
 0x215   : > { %v8760_v49 = vpop.permute.xlu0 %8759  ;;  %4621 = vrot.lane.b32.xlu1 %v10406_v4, %s9491_s26 }
 0x216   : > { %v8762_v36 = vunpack.i.h.bf16 %v8760_v49  ;;  %v8761_v37 = vunpack.i.l.bf16 %v8760_v49  ;;  %8914 = vrot.lane.b32.xlu0 %v10344_v52, %s9492_s4 }
 0x217   : > { %v8775_v58 = vpop.permute.xlu1 %8774 }
 0x218   : > { %v2924_v38 = vsel %vm1205_vm5, %v8761_v37, %v8762_v36  ;;  %v8777_v39 = vunpack.i.h.bf16 %v8775_v58  ;;  %v8776_v20 = vunpack.i.l.bf16 %v8775_v58  ;;  %v2925_v40 = vsel %vm1205_vm5, %v8762_v36, %v8766_v24 }
 0x219   : > { %v2914_v41 = vpop.permute.xlu0 %2913  ;;  %8919 = vrot.lane.b32.xlu1 %v10519_v26, %s9492_s4  ;;  %v8145_v43 = vpack.c.bf16 %v2925_v40, %v2922_v6  ;;  %v8147_v44 = vpack.c.bf16 %v2924_v38, %v2921_v61 }
 0x21a   : > { %8924 = vrot.lane.b32.xlu0 %v10532_v13, %s9492_s4  ;;  %v3113_v54 = vsel %vm1397_vm6, %v8776_v20, %v8777_v39  ;;  %v2927_v7 = vsel %vm1205_vm5, %v2914_v41, %v2916_v31 }
 0x21b   : > { %8146 = vmatprep.subr.bf16.mxu0 %v8145_v43  ;;  %v8785_v53 = vpop.permute.xlu1 %8784 }
 0x21c   : > { %v8787_v55 = vunpack.i.h.bf16 %v8785_v53  ;;  %v8786_v63 = vunpack.i.l.bf16 %v8785_v53  ;;  %8148 = vmatpush1.bf16.msra.mxu0 %v8147_v44 }
 0x21d   : > { %v2918_v1 = vpop.permute.xlu0 %2917  ;;  %8929 = vrot.lane.b32.xlu1 %v10576_v48, %s9489_s1 }
 0x21e   : > { %v3116_v2 = vsel %vm1397_vm6, %v8786_v63, %v8787_v55  ;;  %4813 = vrot.lane.b32.xlu0 %v10393_v23, %s9492_s4  ;;  %v2928_v21 = vsel %vm1205_vm5, %v2916_v31, %v2918_v1  ;;  %v2929_v3 = vsel %vm1205_vm5, %v2918_v1, %v2920_v9 }
 0x21f   : > { %2946 = vmatprep.subr.mxu0 %v2928_v21  ;;  %7852 = vmatpush3.msra.mxu1 %v2929_v3  ;;  %v3106_v10 = vpop.permute.xlu1 %3105  ;;  %v8157_v46 = vpack.c.bf16 %v3116_v2, %v3113_v54 }
 0x220   : > { %2947 = vmatpush1.msra.mxu0 %v2927_v7  ;;  %8156 = vmatprep.subr.bf16.mxu1 %v9484_v0 }
 0x221   : > { %v8770_v45 = vpop.permute.xlu0 %8769  ;;  %4815 = vrot.lane.b32.xlu1 %v10402_v27, %s9492_s4  ;;  %7854 = vmatmul.mubr.msk.f32.vlgmr.msra.gmra.mrb[26].mxu1 %vm506_vm2, %v10189_v33 }
 0x222   : > { %4811 = vrot.lane.b32.xlu0 %v10406_v4, %s9492_s4  ;;  %8158 = vmatpush3.bf16.msra.mxu1 %v8157_v46  ;;  %v8772_v51 = vunpack.i.h.bf16 %v8770_v45  ;;  %v8771_v60 = vunpack.i.l.bf16 %v8770_v45 }
 0x223   : > { %v3110_v17 = vpop.permute.xlu1 %3109  ;;  %7522 = vmatmul.mubr.msk.f32.vlgmr.msra.gmra.mrb[2].mxu0 %vm506_vm2, %v10189_v33  ;;  %7860 = vmatprep.subr.mxu1 %v9487_v16 }
 0x224   : > { %7862 = vmatprep.mubr.msk.f32.mxu1 %vm9488_vm0, %v9487_v16  ;;  %3196 = vmatprep.mubr.f32.mxu0 %v9487_v16  ;;  %v3111_v28 = vsel %vm1397_vm6, %v8771_v60, %v8772_v51  ;;  %v3112_v33 = vsel %vm1397_vm6, %v8772_v51, %v8776_v20 }
 0x225   : > { %v8780_v47 = vpop.permute.xlu0 %8779  ;;  %8934 = vrot.lane.b32.xlu1 %v10344_v52, %s9493_s27 }
 0x226   : > { %v8782_v18 = vunpack.i.h.bf16 %v8780_v47  ;;  %v8781_v24 = vunpack.i.l.bf16 %v8780_v47  ;;  %8939 = vrot.lane.b32.xlu0 %v10519_v26, %s9493_s27 }
 0x227   : > { %v8795_v29 = vpop.permute.xlu1 %8794 }
 0x228   : > { %v3114_v8 = vsel %vm1397_vm6, %v8781_v24, %v8782_v18  ;;  %v8797_v15 = vunpack.i.h.bf16 %v8795_v29  ;;  %v8796_v30 = vunpack.i.l.bf16 %v8795_v29  ;;  %v3115_v31 = vsel %vm1397_vm6, %v8782_v18, %v8786_v63 }
 0x229   : > { %v3104_v11 = vpop.permute.xlu0 %3103  ;;  %4247 = vrot.lane.b32.xlu1 %v10537_v19, %s9489_s1  ;;  %v8152_v32 = vpack.c.bf16 %v3115_v31, %v3112_v33  ;;  %v8154_v34 = vpack.c.bf16 %v3114_v8, %v3111_v28 }
 0x22a   : > { %8944 = vrot.lane.b32.xlu0 %v10576_v48, %s9490_s16  ;;  %v3303_v9 = vsel %vm1589_vm7, %v8796_v30, %v8797_v15  ;;  %v3117_v38 = vsel %vm1397_vm6, %v3104_v11, %v3106_v10 }
 0x22b   : > { %8153 = vmatprep.subr.bf16.mxu0 %v8152_v32  ;;  %v8805_v35 = vpop.permute.xlu1 %8804 }
 0x22c   : > { %v8807_v49 = vunpack.i.h.bf16 %v8805_v35  ;;  %v8806_v36 = vunpack.i.l.bf16 %v8805_v35  ;;  %8155 = vmatpush1.bf16.msra.mxu0 %v8154_v34 }
 0x22d   : > { %v3108_v37 = vpop.permute.xlu0 %3107  ;;  %8949 = vrot.lane.b32.xlu1 %v10532_v13, %s9493_s27 }
 0x22e   : > { %v3306_v61 = vsel %vm1589_vm7, %v8806_v36, %v8807_v49  ;;  %5003 = vrot.lane.b32.xlu0 %v10393_v23, %s9493_s27  ;;  %v3118_v58 = vsel %vm1397_vm6, %v3106_v10, %v3108_v37  ;;  %v3119_v6 = vsel %vm1397_vm6, %v3108_v37, %v3110_v17 }
 0x22f   : > { %3136 = vmatprep.subr.mxu0 %v3118_v58  ;;  %7861 = vmatpush3.msra.mxu1 %v3119_v6  ;;  %v3296_v39 = vpop.permute.xlu1 %3295  ;;  %v8164_v20 = vpack.c.bf16 %v3306_v61, %v3303_v9 }
 0x230   : > { %3137 = vmatpush1.msra.mxu0 %v3117_v38  ;;  %8163 = vmatprep.subr.bf16.mxu1 %v9484_v0 }
 0x231   : > { %v8790_v40 = vpop.permute.xlu0 %8789  ;;  %5005 = vrot.lane.b32.xlu1 %v10402_v27, %s9493_s27  ;;  %7863 = vmatmul.mubr.msk.f32.vlgmr.msra.gmra.mrb[28].mxu1 %vm506_vm2, %v10225_v5 }
 0x232   : > { %4437 = vrot.lane.b32.xlu0 %v10537_v19, %s9490_s16  ;;  %8165 = vmatpush3.bf16.msra.mxu1 %v8164_v20  ;;  %v8792_v41 = vunpack.i.h.bf16 %v8790_v40  ;;  %v8791_v43 = vunpack.i.l.bf16 %v8790_v40 }
 0x233   : > { %v3300_v44 = vpop.permute.xlu1 %3299  ;;  %7524 = vmatmul.mubr.msk.f32.vlgmr.msra.gmra.mrb[2].mxu0 %vm506_vm2, %v10225_v5  ;;  %7869 = vmatprep.subr.mxu1 %v9487_v16 }
 0x234   : > { %7871 = vmatprep.mubr.msk.f32.mxu1 %vm9488_vm0, %v9487_v16  ;;  %3386 = vmatprep.mubr.f32.mxu0 %v9487_v16  ;;  %v3301_v63 = vsel %vm1589_vm7, %v8791_v43, %v8792_v41  ;;  %v3302_v5 = vsel %vm1589_vm7, %v8792_v41, %v8796_v30 }
 0x235   : > { %v8800_v53 = vpop.permute.xlu0 %8799  ;;  %8954 = vrot.lane.b32.xlu1 %v10576_v48, %s9491_s26 }
 0x236   : > { %v8802_v54 = vunpack.i.h.bf16 %v8800_v53  ;;  %v8801_v55 = vunpack.i.l.bf16 %v8800_v53  ;;  %5001 = vrot.lane.b32.xlu0 %v10406_v4, %s9493_s27 }
 0x237   : > { %v8815_v1 = vpop.permute.xlu1 %8814 }
 0x238   : > { %v3304_v2 = vsel %vm1589_vm7, %v8801_v55, %v8802_v54  ;;  %v8817_v21 = vunpack.i.h.bf16 %v8815_v1  ;;  %v8816_v3 = vunpack.i.l.bf16 %v8815_v1  ;;  %v3305_v7 = vsel %vm1589_vm7, %v8802_v54, %v8806_v36  ;;  %v647_v10 = vpop.f32.mrb[0].mxu1 }
 0x239   : > { %v3294_v46 = vpop.permute.xlu0 %3293  ;;  %8959 = vrot.lane.b32.xlu1 %v10344_v52, %s9494_s13  ;;  %v8159_v45 = vpack.c.bf16 %v3305_v7, %v3302_v5  ;;  %v8161_v51 = vpack.c.bf16 %v3304_v2, %v3301_v63  ;;  %v7738_v60 = vpop.f32.mrb[1].mxu1 }
 0x23a   : > { %8964 = vrot.lane.b32.xlu0 %v10519_v26, %s9494_s13  ;;  %v3493_v47 = vsel %vm1781_vm8, %v8816_v3, %v8817_v21  ;;  %v3307_v15 = vsel %vm1589_vm7, %v3294_v46, %v3296_v39 }
 0x23b   : > { %8160 = vmatprep.subr.bf16.mxu0 %v8159_v45  ;;  %v8825_v17 = vpop.permute.xlu1 %8824 }
 0x23c   : > { %v8827_v18 = vunpack.i.h.bf16 %v8825_v17  ;;  %v8826_v24 = vunpack.i.l.bf16 %v8825_v17  ;;  %8162 = vmatpush1.bf16.msra.mxu0 %v8161_v51 }
 0x23d   : > { %v3298_v28 = vpop.permute.xlu0 %3297  ;;  %8969 = vrot.lane.b32.xlu1 %v10532_v13, %s9494_s13 }
 0x23e   : > { %v3496_v29 = vsel %vm1781_vm8, %v8826_v24, %v8827_v18  ;;  %4627 = vrot.lane.b32.xlu0 %v10537_v19, %s9491_s26  ;;  %v3308_v33 = vsel %vm1589_vm7, %v3296_v39, %v3298_v28  ;;  %v3309_v8 = vsel %vm1589_vm7, %v3298_v28, %v3300_v44  ;;  %v10722_v28 = vpack.i.bf16 %v10402_v27, %v10393_v23 }
 0x23f   : > { %3326 = vmatprep.subr.mxu0 %v3308_v33  ;;  %7870 = vmatpush3.msra.mxu1 %v3309_v8  ;;  %v3486_v30 = vpop.permute.xlu1 %3485  ;;  %v8171_v31 = vpack.c.bf16 %v3496_v29, %v3493_v47  ;;  %v791_v11 = vpop.f32.mrb[2].mxu1 }
 0x240   : > { %3327 = vmatpush1.msra.mxu0 %v3307_v15  ;;  %8170 = vmatprep.subr.bf16.mxu1 %v9484_v0  ;;  %v792_v32 = vadd.f32 %v791_v11, %v647_v10  ;;  %v7747_v34 = vpop.f32.mrb[3].mxu1 }
 0x241   : > { %v8810_v35 = vpop.permute.xlu0 %8809  ;;  %8974 = vrot.lane.b32.xlu1 %v10576_v48, %s9492_s4  ;;  %7872 = vmatmul.mubr.msk.f32.vlgmr.msra.gmra.mrb[30].mxu1 %vm506_vm2, %v10261_v42 }
 0x242   : > { %5193 = vrot.lane.b32.xlu0 %v10393_v23, %s9494_s13  ;;  %8172 = vmatpush3.bf16.msra.mxu1 %v8171_v31  ;;  %v8812_v49 = vunpack.i.h.bf16 %v8810_v35  ;;  %v8811_v36 = vunpack.i.l.bf16 %v8810_v35  ;;  %v10738_v35 = vpack.i.bf16 %v10406_v4, %v10528_v12 }
 0x243   : > { %v10664_v9 = vpop.permute.xlu1 %8829  ;;  %7526 = vmatmul.mubr.msk.f32.vlgmr.msra.gmra.mrb[2].mxu0 %vm506_vm2, %v10261_v42  ;;  %7878 = vmatprep.subr.mxu1 %v9487_v16 }
 0x244   : > { %3576 = vmatprep.mubr.f32.mxu0 %v9487_v16  ;;  %7880 = vmatprep.mubr.msk.f32.mxu1 %vm9488_vm0, %v9487_v16  ;;  %v3491_v42 = vsel %vm1781_vm8, %v8811_v36, %v8812_v49  ;;  %v3492_v39 = vsel %vm1781_vm8, %v8812_v49, %v8816_v3  ;;  %v8832_v2 = vunpack.i.h.bf16 %v10664_v9  ;;  %v8831_v21 = vunpack.i.l.bf16 %v10664_v9 }
 0x245   : > { %v8820_v37 = vpop.permute.xlu0 %8819  ;;  %5195 = vrot.lane.b32.xlu1 %v10402_v27, %s9494_s13 }
 0x246   : > { %v8822_v61 = vunpack.i.h.bf16 %v8820_v37  ;;  %v8821_v58 = vunpack.i.l.bf16 %v8820_v37  ;;  %5191 = vrot.lane.b32.xlu0 %v10406_v4, %s9494_s13  ;;  %v3682_v17 = vsel %vm1973_vm9, %v8831_v21, %v8832_v2 }
 0x247   : > { %v8840_v6 = vpop.permute.xlu1 %8839 }
 0x248   : > { %v3494_v38 = vsel %vm1781_vm8, %v8821_v58, %v8822_v61  ;;  %v3495_v20 = vsel %vm1781_vm8, %v8822_v61, %v8826_v24  ;;  %v980_v40 = vpop.f32.mrb[4].mxu1  ;;  %v8842_v3 = vunpack.i.h.bf16 %v8840_v6  ;;  %v8841_v7 = vunpack.i.l.bf16 %v8840_v6 }
 0x249   : > { %v3484_v41 = vpop.permute.xlu0 %3483  ;;  %8979 = vrot.lane.b32.xlu1 %v10344_v52, %s9495_s21  ;;  %v8166_v43 = vpack.c.bf16 %v3495_v20, %v3492_v39  ;;  %v8168_v44 = vpack.c.bf16 %v3494_v38, %v3491_v42  ;;  %v986_v53 = vadd.f32 %v980_v40, %v792_v32  ;;  %v7756_v54 = vpop.f32.mrb[5].mxu1 }
 0x24a   : > { %8984 = vrot.lane.b32.xlu0 %v10519_v26, %s9495_s21  ;;  %v3497_v1 = vsel %vm1781_vm8, %v3484_v41, %v3486_v30  ;;  %v3681_v51 = vsel %vm1973_vm9, %v8841_v7, %v8831_v21  ;;  %v10771_v54 = vld [vmem:[%s9845_s14 + $0x10] sm:$0xff]  ;;  %v8189_v7 = vpack.c.bf16 %v10528_v12, %v10356_v62 }
 0x24b   : > { %8167 = vmatprep.subr.bf16.mxu0 %v8166_v43  ;;  %v10684_v55 = vpop.permute.xlu1 %3677  ;;  %v10760_v43 = vld [vmem:[%s9845_s14 + $0x8] sm:$0xff] }
 0x24c   : > { %8169 = vmatpush1.bf16.msra.mxu0 %v8168_v44 }
 0x24d   : > { %v10686_v63 = vpop.permute.xlu0 %3487  ;;  %8989 = vrot.lane.b32.xlu1 %v10532_v13, %s9495_s21 }
 0x24e   : > { %4817 = vrot.lane.b32.xlu0 %v10537_v19, %s9492_s4  ;;  %v3498_v52 = vsel %vm1781_vm8, %v3486_v30, %v10686_v63 }
 0x24f   : > { %3516 = vmatprep.subr.mxu0 %v3498_v52  ;;  %v10695_v5 = vpop.permute.xlu1 %8849 }
 0x250   : > { %3517 = vmatpush1.msra.mxu0 %v3497_v1  ;;  %v8852_v29 = vunpack.i.h.bf16 %v10695_v5  ;;  %v8851_v33 = vunpack.i.l.bf16 %v10695_v5  ;;  %v10777_v1 = vld [vmem:[%s9845_s14] sm:$0xff]  ;;  %v9185_v5 = vld [vmem:[#allocation3 + $0x40] sm:$0xff] }
 0x251   : > { %v10699_v10 = vpop.permute.xlu0 %8834  ;;  %8994 = vrot.lane.b32.xlu1 %v10576_v48, %s9493_s27  ;;  %7528 = vmatmul.mubr.msk.f32.vlgmr.msra.gmra.mrb[2].mxu0 %vm506_vm2, %v10297_v22 }
 0x252   : > { %v8837_v13 = vunpack.i.h.bf16 %v10699_v10  ;;  %v8836_v46 = vunpack.i.l.bf16 %v10699_v10  ;;  %5383 = vrot.lane.b32.xlu0 %v10393_v23, %s9495_s21  ;;  %3766 = vmatprep.mubr.f32.mxu0 %v9487_v16  ;;  %v3922_v37 = vsel %vm487_vm1, %v8851_v33, %v8852_v29 }
 0x253   : > { %v8855_v45 = vpop.permute.xlu1 %8854 }
 0x254   : > { %v3684_v60 = vsel %vm1973_vm9, %v8842_v3, %v8836_v46  ;;  %v3685_v22 = vsel %vm1973_vm9, %v8836_v46, %v8837_v13  ;;  %v8857_v30 = vunpack.i.h.bf16 %v8855_v45  ;;  %v8856_v31 = vunpack.i.l.bf16 %v8855_v45  ;;  %v10783_v3 = vld [vmem:[#allocation3 + $0x8] sm:$0xff] }
 0x255   : > { %v3676_v47 = vpop.permute.xlu0 %3675  ;;  %5385 = vrot.lane.b32.xlu1 %v10402_v27, %s9495_s21  ;;  %v8173_v18 = vpack.c.bf16 %v3685_v22, %v3682_v17  ;;  %v8175_v24 = vpack.c.bf16 %v3684_v60, %v3681_v51 }
 0x256   : > { %8999 = vrot.lane.b32.xlu0 %v10519_v26, %s9485_s15  ;;  %v3688_v11 = vsel %vm1973_vm9, %v3676_v47, %v10684_v55  ;;  %v3921_v58 = vsel %vm487_vm1, %v8857_v30, %v8851_v33  ;;  %v10809_v33 = vpack.i.bf16 %v10537_v19, %v10572_v56 }
 0x257   : > { %8174 = vmatprep.subr.bf16.mxu0 %v8173_v18  ;;  %v10728_v8 = vpop.permute.xlu1 %3914  ;;  %v1172_v15 = vpop.f32.mrb[6].mxu1 }
 0x258   : > { %8176 = vmatpush1.bf16.msra.mxu0 %v8175_v24  ;;  %v1178_v32 = vadd.f32 %v1172_v15, %v986_v53  ;;  %v7765_v27 = vpop.f32.mrb[7].mxu1 }
 0x259   : > { %v10732_v34 = vpop.permute.xlu0 %8844  ;;  %3706 = vmatprep.subr.mxu0 %v3688_v11  ;;  %9004 = vrot.lane.b32.xlu1 %v10722_v28, %s9485_s15 }
 0x25a   : > { %v8847_v49 = vunpack.i.h.bf16 %v10732_v34  ;;  %v8846_v36 = vunpack.i.l.bf16 %v10732_v34  ;;  %5381 = vrot.lane.b32.xlu0 %v10406_v4, %s9495_s21 }
 0x25b   : > { %v10747_v61 = vpop.permute.xlu1 %8859 }
 0x25c   : > { %v3918_v6 = vsel %vm487_vm1, %v8856_v31, %v8846_v36  ;;  %v3919_v42 = vsel %vm487_vm1, %v8846_v36, %v8847_v49  ;;  %v8862_v45 = vunpack.i.h.bf16 %v10747_v61  ;;  %v8861_v51 = vunpack.i.l.bf16 %v10747_v61  ;;  %v10824_v36 = vld [vmem:[#allocation3] sm:$0xff] }
 0x25d   : > { %v3674_v38 = vpop.permute.xlu0 %3673  ;;  %9009 = vrot.lane.b32.xlu1 %v10738_v35, %s9485_s15  ;;  %v8180_v39 = vpack.c.bf16 %v3922_v37, %v3919_v42  ;;  %v8182_v41 = vpack.c.bf16 %v3921_v58, %v3918_v6  ;;  %v9181_v58 = vld [vmem:[#allocation3 + $0x38] sm:$0xff] }
 0x25e   : > { %v3687_v20 = vsel %vm1973_vm9, %v3674_v38, %v3676_v47  ;;  %5007 = vrot.lane.b32.xlu0 %v10537_v19, %s9493_s27  ;;  %v4250_v30 = vsel %vm821_vm3, %v8861_v51, %v8862_v45  ;;  %v10843_v38 = vld [vmem:[%s9845_s14 + $0x18] sm:$0xff] }
 0x25f   : > { %3707 = vmatpush1.msra.mxu0 %v3687_v20  ;;  %v8870_v40 = vpop.permute.xlu1 %8869 }
 0x260   : > { %8181 = vmatprep.subr.bf16.mxu0 %v8180_v39  ;;  %7530 = vmatmul.mubr.msk.f32.vlgmr.msra.gmra.mrb[2].mxu0 %vm506_vm2, %v10350_v59  ;;  %v8187_v59 = vpack.c.bf16 %v10512_v14, %v10337_v50  ;;  %v8872_v60 = vunpack.i.h.bf16 %v8870_v40  ;;  %v8871_v17 = vunpack.i.l.bf16 %v8870_v40 }
 0x261   : > { %v3913_v44 = vpop.permute.xlu0 %3912  ;;  %8183 = vmatpush1.bf16.msra.mxu0 %v8182_v41  ;;  %9014 = vrot.lane.b32.xlu1 %v10576_v48, %s9494_s13 }
 0x262   : > { %5629 = vrot.lane.b32.xlu0 %v10760_v43, %s9485_s15  ;;  %v3925_v53 = vsel %vm487_vm1, %v3913_v44, %v10728_v8  ;;  %4003 = vmatprep.mubr.f32.mxu0 %v9487_v16  ;;  %v4249_v31 = vsel %vm821_vm3, %v8871_v17, %v8861_v51 }
 0x263   : > { %3943 = vmatprep.subr.mxu0 %v3925_v53  ;;  %v10774_v52 = vpop.permute.xlu1 %4245 }
 0x265   : > { %v3911_v21 = vpop.permute.xlu0 %3910  ;;  %5631 = vrot.lane.b32.xlu1 %v10771_v54, %s9485_s15 }
 0x266   : > { %v3924_v46 = vsel %vm487_vm1, %v3911_v21, %v3913_v44  ;;  %5627 = vrot.lane.b32.xlu0 %v10777_v1, %s9485_s15 }
 0x267   : > { %3944 = vmatpush1.msra.mxu0 %v3924_v46  ;;  %v10792_v50 = vpop.permute.xlu1 %8874  ;;  %v1364_v14 = vpop.f32.mrb[8].mxu1 }
 0x268   : > { %7535 = vmatmul.mubr.msk.f32.vlgmr.msra.gmra.mrb[4].mxu0 %vm506_vm2, %v10783_v3  ;;  %8188 = vmatprep.subr.bf16.mxu0 %v8187_v59  ;;  %v10796_v62 = vadd.f32 %v1364_v14, %v1178_v32  ;;  %v7774_v22 = vpop.f32.mrb[9].mxu1  ;;  %v8877_v39 = vunpack.i.h.bf16 %v10792_v50  ;;  %v8876_v20 = vunpack.i.l.bf16 %v10792_v50 }
 0x269   : > { %v10798_v47 = vpop.permute.xlu0 %8864  ;;  %5197 = vrot.lane.b32.xlu1 %v10537_v19, %s9494_s13  ;;  %8190 = vmatpush1.bf16.msra.mxu0 %v8189_v7 }
 0x26a   : > { %v8867_v18 = vunpack.i.h.bf16 %v10798_v47  ;;  %v8866_v24 = vunpack.i.l.bf16 %v10798_v47  ;;  %9019 = vrot.lane.b32.xlu0 %v10576_v48, %s9495_s21  ;;  %4087 = vmatprep.subr.mxu0 %v10393_v23  ;;  %v4440_v14 = vsel %vm1013_vm4, %v8876_v20, %v8877_v39 }
 0x26b   : > { %v3490_v15 = vpop.permute.xlu1 %3489  ;;  %4147 = vmatprep.mubr.f32.mxu0 %v9487_v16 }
 0x26c   : > { %v4252_v11 = vsel %vm821_vm3, %v8872_v60, %v8866_v24  ;;  %v3499_v48 = vsel %vm1781_vm8, %v10686_v63, %v3490_v15  ;;  %v4253_v23 = vsel %vm821_vm3, %v8866_v24, %v8867_v18 }
 0x26d   : > { %v4244_v32 = vpop.permute.xlu0 %4243  ;;  %5387 = vrot.lane.b32.xlu1 %v10537_v19, %s9495_s21  ;;  %7879 = vmatpush3.msra.mxu1 %v3499_v48  ;;  %v8194_v27 = vpack.c.bf16 %v4253_v23, %v4250_v30  ;;  %v8196_v37 = vpack.c.bf16 %v4252_v11, %v4249_v31 }
 0x26e   : > { %9024 = vrot.lane.b32.xlu0 %v10809_v33, %s9485_s15  ;;  %4088 = vmatpush1.msra.mxu0 %v10406_v4  ;;  %v4256_v6 = vsel %vm821_vm3, %v4244_v32, %v10774_v52 }
 0x26f   : > { %8195 = vmatprep.subr.bf16.mxu0 %v8194_v27  ;;  %v8890_v63 = vpop.permute.xlu1 %8889  ;;  %8177 = vmatprep.subr.bf16.mxu1 %v9484_v0 }
 0x270   : > { %7537 = vmatmul.mubr.msk.f32.vlgmr.msra.gmra.mrb[4].mxu0 %vm506_vm2, %v10824_v36  ;;  %7881 = vmatmul.mubr.msk.f32.vlgmr.msra.gmra.mrb[32].mxu1 %vm506_vm2, %v9181_v58  ;;  %v8892_v40 = vunpack.i.h.bf16 %v8890_v63  ;;  %v8891_v41 = vunpack.i.l.bf16 %v8890_v63  ;;  %v10887_v63 = vld [vmem:[%s9838_s10 + $0x8] sm:$0xff]  ;;  %v10890_v58 = vld [vmem:[%s9838_s10 + $0x10] sm:$0xff] }
 0x271   : > { %8197 = vmatpush1.bf16.msra.mxu0 %v8196_v37  ;;  %v4242_v19 = vpop.permute.xlu0 %4241  ;;  %9029 = vrot.lane.b32.xlu1 %v10519_v26, %s9489_s1 }
 0x272   : > { %v4255_v4 = vsel %vm821_vm3, %v4242_v19, %v4244_v32  ;;  %4274 = vmatprep.subr.mxu0 %v4256_v6  ;;  %9034 = vrot.lane.b32.xlu0 %v10722_v28, %s9489_s1  ;;  %v10854_v28 = vld [vmem:[#allocation3 + $0x10] sm:$0xff]  ;;  %v4439_v46 = vsel %vm1013_vm4, %v8891_v41, %v8876_v20  ;;  %v10894_v19 = vpack.i.bf16 %v10890_v58, %v10887_v63 }
 0x273   : > { %v10840_v42 = vpop.permute.xlu1 %4435  ;;  %4334 = vmatprep.mubr.f32.mxu0 %v9487_v16  ;;  %7889 = vmatprep.mubr.msk.f32.mxu1 %vm9488_vm0, %v9487_v16 }
 0x275   : > { %4275 = vmatpush1.msra.mxu0 %v4255_v4  ;;  %v10850_v44 = vpop.permute.xlu0 %8879  ;;  %9039 = vrot.lane.b32.xlu1 %v10738_v35, %s9489_s1 }
 0x276   : > { %v8882_v53 = vunpack.i.h.bf16 %v10850_v44  ;;  %v8881_v59 = vunpack.i.l.bf16 %v10850_v44  ;;  %5633 = vrot.lane.b32.xlu0 %v10843_v38, %s9485_s15 }
 0x277   : > { %v8895_v21 = vpop.permute.xlu1 %8894  ;;  %v1556_v7 = vpop.f32.mrb[10].mxu1 }
 0x278   : > { %v4442_v51 = vsel %vm1013_vm4, %v8892_v40, %v8881_v59  ;;  %v4443_v35 = vsel %vm1013_vm4, %v8881_v59, %v8882_v53  ;;  %7539 = vmatmul.mubr.msk.f32.vlgmr.msra.gmra.mrb[4].mxu0 %vm506_vm2, %v10854_v28  ;;  %v7783_v60 = vpop.f32.mrb[11].mxu1  ;;  %v1562_v15 = vadd.f32 %v1556_v7, %v10796_v62  ;;  %v8897_v48 = vunpack.i.h.bf16 %v8895_v21 }
 0x279   : > { %v8885_v17 = vpop.permute.xlu0 %8884  ;;  %5960 = vrot.lane.b32.xlu1 %v10760_v43, %s9489_s1  ;;  %v8201_v22 = vpack.c.bf16 %v4443_v35, %v4440_v14  ;;  %v8203_v24 = vpack.c.bf16 %v4442_v51, %v4439_v46  ;;  %4524 = vmatprep.mubr.f32.mxu0 %v9487_v16  ;;  %v8896_v23 = vunpack.i.l.bf16 %v8895_v21 }
 0x27a   : > { %v8887_v30 = vunpack.i.h.bf16 %v8885_v17  ;;  %v8886_v31 = vunpack.i.l.bf16 %v8885_v17  ;;  %5962 = vrot.lane.b32.xlu0 %v10771_v54, %s9489_s1  ;;  %v3923_v4 = vsel %vm487_vm1, %v8852_v29, %v8897_v48 }
 0x27b   : > { %8202 = vmatprep.subr.bf16.mxu0 %v8201_v22  ;;  %v10876_v11 = vpop.permute.xlu1 %8899  ;;  %v3920_v6 = vsel %vm487_vm1, %v8847_v49, %v8896_v23  ;;  %v10924_v49 = vld [vmem:[#allocation3 + $0x18] sm:$0xff] }
 0x27c   : > { %v3683_v32 = vsel %vm1973_vm9, %v8832_v2, %v8886_v31  ;;  %v3686_v27 = vsel %vm1973_vm9, %v8837_v13, %v8887_v30  ;;  %8204 = vmatpush1.bf16.msra.mxu0 %v8203_v24  ;;  %v10901_v2 = vld [vmem:[%s9838_s10] sm:$0xff]  ;;  %v8185_v40 = vpack.c.bf16 %v3923_v4, %v3920_v6  ;;  %v8902_v41 = vunpack.i.h.bf16 %v10876_v11 }
 0x27d   : > { %v4434_v62 = vpop.permute.xlu0 %4433  ;;  %5958 = vrot.lane.b32.xlu1 %v10777_v1, %s9489_s1  ;;  %v8178_v37 = vpack.c.bf16 %v3686_v27, %v3683_v32  ;;  %v10905_v10 = vpack.i.bf16 %v10901_v2, %v10528_v12  ;;  %v8901_v7 = vunpack.i.l.bf16 %v10876_v11 }
 0x27e   : > { %9044 = vrot.lane.b32.xlu0 %v10519_v26, %s9490_s16  ;;  %v4446_v9 = vsel %vm1013_vm4, %v4434_v62, %v10840_v42 }
 0x27f   : > { %8179 = vmatpush3.bf16.msra.mxu1 %v8178_v37  ;;  %4464 = vmatprep.subr.mxu0 %v4446_v9  ;;  %v8910_v13 = vpop.permute.xlu1 %8909  ;;  %v4630_v31 = vsel %vm1205_vm5, %v8901_v7, %v8902_v41  ;;  %v9186_v37 = vld [vmem:[%s9831_s0 + $0x50] sm:$0xff] }
 0x280   : > { %7887 = vmatprep.subr.mxu1 %v9487_v16  ;;  %v8912_v46 = vunpack.i.h.bf16 %v8910_v13  ;;  %v8911_v51 = vunpack.i.l.bf16 %v8910_v13  ;;  %v8192_v9 = vpack.c.bf16 %v10515_v57, %v9186_v37 }
 0x281   : > { %v3680_v20 = vpop.permute.xlu0 %3679  ;;  %9049 = vrot.lane.b32.xlu1 %v10894_v19, %s9490_s16 }
 0x282   : > { %v3689_v12 = vsel %vm1973_vm9, %v10684_v55, %v3680_v20  ;;  %9054 = vrot.lane.b32.xlu0 %v10905_v10, %s9490_s16 }
 0x283   : > { %7888 = vmatpush3.msra.mxu1 %v3689_v12  ;;  %v4624_v34 = vpop.permute.xlu1 %4623 }
 0x284   : > { %8184 = vmatprep.subr.bf16.mxu1 %v9484_v0  ;;  %7890 = vmatmul.mubr.msk.f32.vlgmr.msra.gmra.mrb[34].mxu1 %vm506_vm2, %v9185_v5  ;;  %v10984_v5 = vld [vmem:[#allocation3 + $0x20] sm:$0xff] }
 0x285   : > { %v4432_v29 = vpop.permute.xlu0 %4431  ;;  %8186 = vmatpush3.bf16.msra.mxu1 %v8185_v40  ;;  %9059 = vrot.lane.b32.xlu1 %v10809_v33, %s9489_s1 }
 0x286   : > { %v4445_v55 = vsel %vm1013_vm4, %v4432_v29, %v4434_v62  ;;  %6150 = vrot.lane.b32.xlu0 %v10760_v43, %s9490_s16  ;;  %7896 = vmatprep.subr.mxu1 %v9487_v16 }
 0x287   : > { %4465 = vmatpush1.msra.mxu0 %v4445_v55  ;;  %v4622_v59 = vpop.permute.xlu1 %4621  ;;  %7898 = vmatprep.mubr.msk.f32.mxu1 %vm9488_vm0, %v9487_v16  ;;  %v1748_v21 = vpop.f32.mrb[12].mxu1 }
 0x288   : > { %7541 = vmatmul.mubr.msk.f32.vlgmr.msra.gmra.mrb[4].mxu0 %vm506_vm2, %v10924_v49  ;;  %v10936_v14 = vadd.f32 %v1748_v21, %v1562_v15  ;;  %v7792_v35 = vpop.f32.mrb[13].mxu1  ;;  %v4629_v15 = vsel %vm1205_vm5, %v8911_v51, %v8901_v7 }
 0x289   : > { %v10938_v60 = vpop.permute.xlu0 %8904  ;;  %6152 = vrot.lane.b32.xlu1 %v10771_v54, %s9490_s16  ;;  %4714 = vmatprep.mubr.f32.mxu0 %v9487_v16 }
 0x28a   : > { %v8907_v17 = vunpack.i.h.bf16 %v10938_v60  ;;  %v8906_v22 = vunpack.i.l.bf16 %v10938_v60  ;;  %6148 = vrot.lane.b32.xlu0 %v10777_v1, %s9490_s16 }
 0x28b   : > { %v10947_v24 = vpop.permute.xlu1 %8919 }
 0x28c   : > { %v4632_v30 = vsel %vm1205_vm5, %v8912_v46, %v8906_v22  ;;  %v4633_v48 = vsel %vm1205_vm5, %v8906_v22, %v8907_v17  ;;  %v8921_v57 = vunpack.i.l.bf16 %v10947_v24 }
 0x28d   : > { %v3917_v23 = vpop.permute.xlu0 %3916  ;;  %9064 = vrot.lane.b32.xlu1 %v10519_v26, %s9491_s26  ;;  %v8208_v32 = vpack.c.bf16 %v4633_v48, %v4630_v31  ;;  %v8210_v27 = vpack.c.bf16 %v4632_v30, %v4629_v15  ;;  %v8922_v26 = vunpack.i.h.bf16 %v10947_v24 }
 0x28e   : > { %v3926_v62 = vsel %vm487_vm1, %v10728_v8, %v3917_v23  ;;  %9069 = vrot.lane.b32.xlu0 %v10894_v19, %s9491_s26 }
 0x28f   : > { %7897 = vmatpush3.msra.mxu1 %v3926_v62  ;;  %8209 = vmatprep.subr.bf16.mxu0 %v8208_v32  ;;  %v8930_v13 = vpop.permute.xlu1 %8929  ;;  %v11033_v62 = vld [vmem:[%s9831_s0 + $0x70] sm:$0xff] }
 0x290   : > { %v8932_v6 = vunpack.i.h.bf16 %v8930_v13  ;;  %v8931_v4 = vunpack.i.l.bf16 %v8930_v13  ;;  %8191 = vmatprep.subr.bf16.mxu1 %v9484_v0  ;;  %8211 = vmatpush1.bf16.msra.mxu0 %v8210_v27  ;;  %v11030_v27 = vld [vmem:[%s9831_s0 + $0x68] sm:$0xff] }
 0x291   : > { %v10967_v20 = vpop.permute.xlu0 %4625  ;;  %7899 = vmatmul.mubr.msk.f32.vlgmr.msra.gmra.mrb[36].mxu1 %vm506_vm2, %v10783_v3  ;;  %9074 = vrot.lane.b32.xlu1 %v10905_v10, %s9491_s26  ;;  %v4635_v10 = vsel %vm1205_vm5, %v4622_v59, %v4624_v34  ;;  %v11037_v37 = vpack.i.bf16 %v11033_v62, %v11030_v27 }
 0x292   : > { %v4251_v8 = vsel %vm821_vm3, %v8862_v45, %v8931_v4  ;;  %v4254_v12 = vsel %vm821_vm3, %v8867_v18, %v8932_v6  ;;  %8193 = vmatpush3.bf16.msra.mxu1 %v8192_v9  ;;  %5964 = vrot.lane.b32.xlu0 %v10843_v38, %s9489_s1  ;;  %v4636_v40 = vsel %vm1205_vm5, %v4624_v34, %v10967_v20  ;;  %v11057_v4 = vld [vmem:[#allocation3 + $0x28] sm:$0xff] }
 0x293   : > { %4654 = vmatprep.subr.mxu0 %v4636_v40  ;;  %v10987_v29 = vpop.permute.xlu1 %4815  ;;  %7905 = vmatprep.subr.mxu1 %v9487_v16  ;;  %v8199_v61 = vpack.c.bf16 %v4254_v12, %v4251_v8  ;;  %v4823_v34 = vsel %vm1397_vm6, %v8921_v57, %v8922_v26 }
 0x294   : > { %4655 = vmatpush1.msra.mxu0 %v4635_v10  ;;  %7907 = vmatprep.mubr.msk.f32.mxu1 %vm9488_vm0, %v9487_v16  ;;  %v11071_v10 = vld [vmem:[%s9838_s10 + $0x18] sm:$0xff]  ;;  %s11099_s10 = scalar_lea.vmem [#allocation11], %s8371_s3  ;;  %s9318_s3 = sshll.u32 %s9496_s28, 4  ;;  %s9319_s3 = int_to_ptr.vmem [resolvable:$false] %s9318_s3 }
 0x295   : > { %v10992_v45 = vpop.permute.xlu0 %8914  ;;  %9079 = vrot.lane.b32.xlu1 %v10809_v33, %s9490_s16  ;;  %7543 = vmatmul.mubr.msk.f32.vlgmr.msra.gmra.mrb[4].mxu0 %vm506_vm2, %v10984_v5  ;;  %s7310_s15 = sshll.u32 %s11099_s10, 4  ;;  %s11535_s15 = int_to_ptr.vmem [resolvable:$true] %s7310_s15 }
 0x296   : > { %v8917_v47 = vunpack.i.h.bf16 %v10992_v45  ;;  %v8916_v18 = vunpack.i.l.bf16 %v10992_v45  ;;  %7906 = vmatpush3.msra.mxu1 %v10890_v58  ;;  %6340 = vrot.lane.b32.xlu0 %v10760_v43, %s9491_s26  ;;  %s9314_s11 = scalar_lea.vmem %s11535_s15, 1536  ;;  %p9321_p6 = scmp.lt.s32.totalorder %s11535_s15, %s9319_s3 }
 0x297   : > { %8198 = vmatprep.subr.bf16.mxu1 %v9484_v0  ;;  %7908 = vmatmul.mubr.msk.f32.vlgmr.msra.gmra.mrb[38].mxu1 %vm506_vm2, %v10824_v36  ;;  %v11009_v55 = vpop.permute.xlu1 %8934  ;;  %p9315_p0 = scmp.ne.s32.totalorder %s11535_s15, %s9314_s11 }
 0x298   : > { %8200 = vmatpush3.bf16.msra.mxu1 %v8199_v61  ;;  %v4820_v59 = vsel %vm1397_vm6, %v8916_v18, %v8917_v47  ;;  %v1940_v21 = vpop.f32.mrb[14].mxu1  ;;  %4904 = vmatprep.mubr.f32.mxu0 %v9487_v16  ;;  %v9103_v61 = vpack.i.bf16 %v11071_v10, %v10572_v56 }
 0x299   : > { %v8925_v7 = vpop.permute.xlu0 %8924  ;;  %6342 = vrot.lane.b32.xlu1 %v10771_v54, %s9491_s26  ;;  %v8215_v46 = vpack.c.bf16 %v4823_v34, %v4820_v59  ;;  %7914 = vmatprep.subr.mxu1 %v9487_v16  ;;  %v1946_v51 = vadd.f32 %v1940_v21, %v10936_v14  ;;  %v7801_v35 = vpop.f32.mrb[15].mxu1  ;;  %v8937_v59 = vunpack.i.h.bf16 %v11009_v55  ;;  %v8936_v21 = vunpack.i.l.bf16 %v11009_v55 }
 0x29a   : > { %v8927_v22 = vunpack.i.h.bf16 %v8925_v7  ;;  %v8926_v15 = vunpack.i.l.bf16 %v8925_v7  ;;  %6338 = vrot.lane.b32.xlu0 %v10777_v1, %s9491_s26  ;;  %7916 = vmatprep.mubr.msk.f32.mxu1 %vm9488_vm0, %v9487_v16 }
 0x29b   : > { %8216 = vmatprep.subr.bf16.mxu0 %v8215_v46  ;;  %v4248_v30 = vpop.permute.xlu1 %4247 }
 0x29c   : > { %v4822_v31 = vsel %vm1397_vm6, %v8927_v22, %v8921_v57  ;;  %v4819_v48 = vsel %vm1397_vm6, %v8926_v15, %v8916_v18  ;;  %v4257_v23 = vsel %vm821_vm3, %v10774_v52, %v4248_v30 }
 0x29d   : > { %v4814_v14 = vpop.permute.xlu0 %4813  ;;  %6154 = vrot.lane.b32.xlu1 %v10843_v38, %s9490_s16  ;;  %7915 = vmatpush3.msra.mxu1 %v4257_v23  ;;  %v8217_v32 = vpack.c.bf16 %v4822_v31, %v4819_v48  ;;  %s11702_s16 = sld [smem:[#allocation28_spill]] }
 0x29e   : > { %9084 = vrot.lane.b32.xlu0 %v10809_v33, %s9491_s26  ;;  %v4826_v52 = vsel %vm1397_vm6, %v4814_v14, %v10987_v29  ;;  %8205 = vmatprep.subr.bf16.mxu1 %v9484_v0  ;;  %v11051_v33 = vld [vmem:[%s9831_s0 + $0x60] sm:$0xff] }
 0x29f   : > { %8218 = vmatpush1.bf16.msra.mxu0 %v8217_v32  ;;  %v8950_v9 = vpop.permute.xlu1 %8949  ;;  %7917 = vmatmul.mubr.msk.f32.vlgmr.msra.gmra.mrb[40].mxu1 %vm506_vm2, %v10854_v28  ;;  %v11055_v6 = vpack.i.bf16 %v10901_v2, %v11051_v33 }
 0x2a0   : > { %4844 = vmatprep.subr.mxu0 %v4826_v52  ;;  %7925 = vmatprep.mubr.msk.f32.mxu1 %vm9488_vm0, %v9487_v16  ;;  %v8952_v12 = vunpack.i.h.bf16 %v8950_v9  ;;  %v8951_v7 = vunpack.i.l.bf16 %v8950_v9 }
 0x2a1   : > { %v4812_v13 = vpop.permute.xlu0 %4811  ;;  %9089 = vrot.lane.b32.xlu1 %v11037_v37, %s9492_s4 }
 0x2a2   : > { %v4825_v57 = vsel %vm1397_vm6, %v4812_v13, %v4814_v14  ;;  %9094 = vrot.lane.b32.xlu0 %v10894_v19, %s9492_s4  ;;  %v5009_v13 = vsel %vm1589_vm7, %v8951_v7, %v8936_v21 }
 0x2a3   : > { %4845 = vmatpush1.msra.mxu0 %v4825_v57  ;;  %v11062_v8 = vpop.permute.xlu1 %5005  ;;  %p11705_p1 = scmp.ne.s32.totalorder %s11702_s16, 0 }
 0x2a4   : > { %7545 = vmatmul.mubr.msk.f32.vlgmr.msra.gmra.mrb[4].mxu0 %vm506_vm2, %v11057_v4 }
 0x2a5   : > { %v11066_v40 = vpop.permute.xlu0 %8939  ;;  %9099 = vrot.lane.b32.xlu1 %v11055_v6, %s9492_s4  ;;  %5094 = vmatprep.mubr.f32.mxu0 %v9487_v16  ;;  %p9316_p7 = pnand %p9315_p0, %p11705_p1 }
 0x2a6   : > { %v8942_v18 = vunpack.i.h.bf16 %v11066_v40  ;;  %v8941_v34 = vunpack.i.l.bf16 %v11066_v40  ;;  %6344 = vrot.lane.b32.xlu0 %v10843_v38, %s9491_s26 }
 0x2a7   : > { %v2132_v46 = vpop.f32.mrb[16].mxu1  ;;  %v2061_v35 = vpop.f32.mrb[0].mxu0  ;;  %p9317_p3 = pneg %p9316_p7 }
 0x2a8   : > { %v2138_v22 = vadd.f32 %v2132_v46, %v1946_v51  ;;  %v2145_v56 = vadd.f32 %v10395_v25, %v2061_v35  ;;  %v8955_v15 = vpop.permute.xlu1 %8954  ;;  %v2063_v30 = vpop.f32.mrb[1].mxu0  ;;  %v5012_v31 = vsel %vm1589_vm7, %v8952_v12, %v8941_v34  ;;  %v5013_v14 = vsel %vm1589_vm7, %v8941_v34, %v8942_v18 }
 0x2a9   : > { %v2146_v48 = vadd.f32 %v10395_v25, %v2063_v30  ;;  %v8945_v23 = vpop.permute.xlu0 %8944  ;;  %9104 = vrot.lane.b32.xlu1 %v9103_v61, %s9492_s4  ;;  %v7810_v32 = vpop.f32.mrb[17].mxu1  ;;  %v5010_v12 = vsel %vm1589_vm7, %v8936_v21, %v8937_v59  ;;  %v8224_v34 = vpack.c.bf16 %v5012_v31, %v5009_v13 }
 0x2aa   : > { %v2147_v52 = vadd.f32 %v10395_v25, %v2138_v22  ;;  %vm2148_vm10 = vcmp.gt.f32.partialorder %v2145_v56, 0.0  ;;  %v2151_v51 = vmul.f32 0.2, %v2145_v56  ;;  %v8947_v9 = vunpack.i.h.bf16 %v8945_v23  ;;  %6530 = vrot.lane.b32.xlu0 %v10760_v43, %s9492_s4 }
 0x2ab   : > { %vm2149_vm11 = vcmp.gt.f32.partialorder %v2146_v48, 0.0  ;;  %v2152_v57 = vmul.f32 0.2, %v2146_v48  ;;  %v8946_v7 = vunpack.i.l.bf16 %v8945_v23  ;;  %v8222_v30 = vpack.c.bf16 %v5013_v14, %v5010_v12 }
 0x2ac   : > { %vm2150_vm12 = vcmp.gt.f32.partialorder %v2147_v52, 0.0  ;;  %v2153_v61 = vmul.f32 0.2, %v2147_v52  ;;  %v2154_v46 = vsel %vm2148_vm10, %v2145_v56, %v2151_v51  ;;  %v11097_v35 = vpop.permute.xlu1 %8959  ;;  %v4444_v22 = vsel %vm1013_vm4, %v8882_v53, %v8947_v9  ;;  %v11132_v9 = vld [vmem:[%s9831_s0 + $0x78] sm:$0xff]  ;;  %s9320_s0 = scalar_lea.vmem %s9319_s3, 3072 }
 0x2ad   : > { %2157 = vst [vmem:[%s11099_s10] sm:$0xff] %v2154_v46  ;;  %v2155_v25 = vsel %vm2149_vm11, %v2146_v48, %v2152_v57  ;;  %v5004_v21 = vpop.permute.xlu0 %5003  ;;  %6532 = vrot.lane.b32.xlu1 %v10771_v54, %s9492_s4  ;;  %v8957_v48 = vunpack.i.h.bf16 %v8955_v15  ;;  %v8956_v23 = vunpack.i.l.bf16 %v8955_v15  ;;  %v4441_v44 = vsel %vm1013_vm4, %v8877_v39, %v8946_v7  ;;  %8223 = vmatprep.subr.bf16.mxu0 %v8222_v30  ;;  %p9322_p5 = scmp.lt.s32.totalorder %s9320_s0, %s9314_s11 }
 0x2ae   : > { %v2156_v56 = vsel %vm2150_vm12, %v2147_v52, %v2153_v61  ;;  %2158 = vst [vmem:[%s11099_s10 + $0x8] sm:$0xff] %v2155_v25  ;;  %6528 = vrot.lane.b32.xlu0 %v10777_v1, %s9492_s4  ;;  %v5016_v31 = vsel %vm1589_vm7, %v5004_v21, %v11062_v8  ;;  %v8206_v53 = vpack.c.bf16 %v4444_v22, %v4441_v44 }
 0x2af   : > { %2159 = vst [vmem:[%s11099_s10 + $0x10] sm:$0xff] %v2156_v56  ;;  %8225 = vmatpush1.bf16.msra.mxu0 %v8224_v34  ;;  %v4631_v50 = vsel %vm1205_vm5, %v8902_v41, %v8956_v23  ;;  %v4634_v39 = vsel %vm1205_vm5, %v8907_v17, %v8957_v48  ;;  %v11136_v11 = vpack.i.bf16 %v11071_v10, %v11132_v9  ;;  %v8961_v17 = vunpack.i.l.bf16 %v11097_v35  ;;  %v11148_v34 = vld [vmem:[#allocation3 + $0x30] sm:$0xff]  ;;  %p9323_p9 = por %p9322_p5, %p9321_p6 }
 0x2b0   : > { %v8970_v14 = vpop.permute.xlu1 %8969  ;;  %5034 = vmatprep.subr.mxu0 %v5016_v31  ;;  %8207 = vmatpush3.bf16.msra.mxu1 %v8206_v53  ;;  %v8213_v41 = vpack.c.bf16 %v4634_v39, %v4631_v50 }
 0x2b1   : > { %v4438_v32 = vpop.permute.xlu0 %4437  ;;  %9109 = vrot.lane.b32.xlu1 %v11037_v37, %s9493_s27  ;;  %7923 = vmatprep.subr.mxu1 %v9487_v16  ;;  %v8972_v13 = vunpack.i.h.bf16 %v8970_v14  ;;  %v8971_v57 = vunpack.i.l.bf16 %v8970_v14  ;;  %p9324_p4 = pnand %p9323_p9, %p9317_p3 }
 0x2b2   : > { %9114 = vrot.lane.b32.xlu0 %v10894_v19, %s9493_s27  ;;  %v4447_v15 = vsel %vm1013_vm4, %v10840_v42, %v4438_v32  ;;  %v8962_v42 = vunpack.i.h.bf16 %v11097_v35 }
 0x2b3   : > { %v5199_v30 = vsel %vm1781_vm8, %v8971_v57, %v8961_v17 }
 0x2b4   : > { %v8975_v52 = vpop.permute.xlu1 %8974  ;;  %7924 = vmatpush3.msra.mxu1 %v4447_v15  ;;  %v5200_v31 = vsel %vm1781_vm8, %v8961_v17, %v8962_v42  ;;  %v11200_v15 = vld [vmem:[#allocation3 + $0x38] sm:$0xff] }
 0x2b5   : > { %v5002_v51 = vpop.permute.xlu0 %5001  ;;  %9119 = vrot.lane.b32.xlu1 %v11055_v6, %s9493_s27  ;;  %8212 = vmatprep.subr.bf16.mxu1 %v9484_v0  ;;  %v8977_v61 = vunpack.i.h.bf16 %v8975_v52  ;;  %v8976_v46 = vunpack.i.l.bf16 %v8975_v52 }
 0x2b6   : > { %v5015_v60 = vsel %vm1589_vm7, %v5002_v51, %v5004_v21  ;;  %6534 = vrot.lane.b32.xlu0 %v10843_v38, %s9492_s4  ;;  %7926 = vmatmul.mubr.msk.f32.vlgmr.msra.gmra.mrb[42].mxu1 %vm506_vm2, %v10924_v49 }
 0x2b7   : > { %8214 = vmatpush3.bf16.msra.mxu1 %v8213_v41  ;;  %5035 = vmatpush1.msra.mxu0 %v5015_v60  ;;  %v4821_v23 = vsel %vm1397_vm6, %v8917_v47, %v8976_v46  ;;  %v4824_v44 = vsel %vm1397_vm6, %v8922_v26, %v8977_v61 }
 0x2b8   : > { %v11146_v12 = vpop.permute.xlu1 %5195  ;;  %7932 = vmatprep.subr.mxu1 %v9487_v16  ;;  %7934 = vmatprep.mubr.msk.f32.mxu1 %vm9488_vm0, %v9487_v16  ;;  %v8220_v45 = vpack.c.bf16 %v4824_v44, %v4821_v23 }
 0x2b9   : > { %v11150_v25 = vpop.permute.xlu0 %8964  ;;  %9124 = vrot.lane.b32.xlu1 %v11136_v11, %s9493_s27  ;;  %7547 = vmatmul.mubr.msk.f32.vlgmr.msra.gmra.mrb[4].mxu0 %vm506_vm2, %v11148_v34 }
 0x2ba   : > { %v8967_v7 = vunpack.i.h.bf16 %v11150_v25  ;;  %v8966_v22 = vunpack.i.l.bf16 %v11150_v25  ;;  %6720 = vrot.lane.b32.xlu0 %v10760_v43, %s9493_s27  ;;  %5284 = vmatprep.mubr.f32.mxu0 %v9487_v16 }
 0x2bc   : > { %v5202_v21 = vsel %vm1781_vm8, %v8972_v13, %v8966_v22  ;;  %v11165_v56 = vpop.permute.xlu1 %8979  ;;  %v5203_v48 = vsel %vm1781_vm8, %v8966_v22, %v8967_v7 }
 0x2bd   : > { %v8231_v53 = vpack.c.bf16 %v5202_v21, %v5199_v30  ;;  %v4628_v14 = vpop.permute.xlu0 %4627  ;;  %v8229_v32 = vpack.c.bf16 %v5203_v48, %v5200_v31  ;;  %6722 = vrot.lane.b32.xlu1 %v10771_v54, %s9493_s27  ;;  %v8981_v51 = vunpack.i.l.bf16 %v11165_v56 }
 0x2be   : > { %v4637_v50 = vsel %vm1205_vm5, %v10967_v20, %v4628_v14  ;;  %6718 = vrot.lane.b32.xlu0 %v10777_v1, %s9493_s27 }
 0x2bf   : > { %7933 = vmatpush3.msra.mxu1 %v4637_v50  ;;  %8230 = vmatprep.subr.bf16.mxu0 %v8229_v32 }
 0x2c0   : > { %v8990_v47 = vpop.permute.xlu1 %8989  ;;  %8219 = vmatprep.subr.bf16.mxu1 %v9484_v0  ;;  %8232 = vmatpush1.bf16.msra.mxu0 %v8231_v53 }
 0x2c1   : > { %v5194_v24 = vpop.permute.xlu0 %5193  ;;  %7935 = vmatmul.mubr.msk.f32.vlgmr.msra.gmra.mrb[44].mxu1 %vm506_vm2, %v10984_v5  ;;  %9129 = vrot.lane.b32.xlu1 %v11037_v37, %s9494_s13  ;;  %v8992_v41 = vunpack.i.h.bf16 %v8990_v47  ;;  %v8991_v60 = vunpack.i.l.bf16 %v8990_v47 }
 0x2c2   : > { %8221 = vmatpush3.bf16.msra.mxu1 %v8220_v45  ;;  %9134 = vrot.lane.b32.xlu0 %v10894_v19, %s9494_s13  ;;  %v5206_v26 = vsel %vm1781_vm8, %v5194_v24, %v11146_v12  ;;  %v8982_v19 = vunpack.i.h.bf16 %v11165_v56 }
 0x2c3   : > { %5224 = vmatprep.subr.mxu0 %v5206_v26  ;;  %7941 = vmatprep.subr.mxu1 %v9487_v16  ;;  %v5389_v30 = vsel %vm1973_vm9, %v8991_v60, %v8981_v51 }
 0x2c4   : > { %v8995_v20 = vpop.permute.xlu1 %8994  ;;  %7943 = vmatprep.mubr.msk.f32.mxu1 %vm9488_vm0, %v9487_v16  ;;  %v5390_v48 = vsel %vm1973_vm9, %v8981_v51, %v8982_v19  ;;  %v2368_v55 = vpop.f32.mrb[18].mxu1 }
 0x2c5   : > { %v5192_v39 = vpop.permute.xlu0 %5191  ;;  %9139 = vrot.lane.b32.xlu1 %v11055_v6, %s9494_s13  ;;  %v8997_v13 = vunpack.i.h.bf16 %v8995_v20  ;;  %v8996_v57 = vunpack.i.l.bf16 %v8995_v20  ;;  %v7819_v40 = vpop.f32.mrb[19].mxu1  ;;  %v9158_v20 = vpack.i.bf16 %v11071_v10, %v10890_v58 }
 0x2c6   : > { %v5205_v52 = vsel %vm1781_vm8, %v5192_v39, %v5194_v24  ;;  %6724 = vrot.lane.b32.xlu0 %v10843_v38, %s9493_s27  ;;  %s11703_s27 = sld [smem:[#allocation35_spill]] }
 0x2c7   : > { %5225 = vmatpush1.msra.mxu0 %v5205_v52  ;;  %v5011_v23 = vsel %vm1589_vm7, %v8937_v59, %v8996_v57  ;;  %v5014_v44 = vsel %vm1589_vm7, %v8942_v18, %v8997_v13 }
 0x2c8   : > { %v11207_v17 = vpop.permute.xlu1 %5385  ;;  %7549 = vmatmul.mubr.msk.f32.vlgmr.msra.gmra.mrb[4].mxu0 %vm506_vm2, %v11200_v15  ;;  %v8227_v59 = vpack.c.bf16 %v5014_v44, %v5011_v23 }
 0x2c9   : > { %v11211_v61 = vpop.permute.xlu0 %8984  ;;  %9144 = vrot.lane.b32.xlu1 %v11136_v11, %s9494_s13  ;;  %5474 = vmatprep.mubr.f32.mxu0 %v9487_v16 }
 0x2ca   : > { %v8987_v46 = vunpack.i.h.bf16 %v11211_v61  ;;  %v8986_v22 = vunpack.i.l.bf16 %v11211_v61  ;;  %6910 = vrot.lane.b32.xlu0 %v10760_v43, %s9494_s13 }
 0x2cc   : > { %v5392_v21 = vsel %vm1973_vm9, %v8992_v41, %v8986_v22  ;;  %v11222_v31 = vpop.permute.xlu1 %9004  ;;  %v5393_v11 = vsel %vm1973_vm9, %v8986_v22, %v8987_v46 }
 0x2cd   : > { %v8238_v53 = vpack.c.bf16 %v5392_v21, %v5389_v30  ;;  %v4818_v14 = vpop.permute.xlu0 %4817  ;;  %v8236_v32 = vpack.c.bf16 %v5393_v11, %v5390_v48  ;;  %6912 = vrot.lane.b32.xlu1 %v10771_v54, %s9494_s13  ;;  %v9007_v47 = vunpack.i.h.bf16 %v11222_v31  ;;  %v9006_v24 = vunpack.i.l.bf16 %v11222_v31 }
 0x2ce   : > { %v4827_v50 = vsel %vm1397_vm6, %v10987_v29, %v4818_v14  ;;  %6908 = vrot.lane.b32.xlu0 %v10777_v1, %s9494_s13  ;;  %v9153_v29 = vpack.i.bf16 %v10887_v63, %v11132_v9 }
 0x2cf   : > { %7942 = vmatpush3.msra.mxu1 %v4827_v50  ;;  %8237 = vmatprep.subr.bf16.mxu0 %v8236_v32  ;;  %v5639_v10 = vsel %vm487_vm1, %v9006_v24, %v9007_v47  ;;  %v11276_v50 = vld [vmem:[#allocation3 + $0x40] sm:$0xff] }
 0x2d0   : > { %v9010_v45 = vpop.permute.xlu1 %9009  ;;  %8226 = vmatprep.subr.bf16.mxu1 %v9484_v0  ;;  %8239 = vmatpush1.bf16.msra.mxu0 %v8238_v53 }
 0x2d1   : > { %v5384_v18 = vpop.permute.xlu0 %5383  ;;  %7944 = vmatmul.mubr.msk.f32.vlgmr.msra.gmra.mrb[46].mxu1 %vm506_vm2, %v11057_v4  ;;  %6914 = vrot.lane.b32.xlu1 %v10843_v38, %s9494_s13  ;;  %v9012_v39 = vunpack.i.h.bf16 %v9010_v45  ;;  %v9011_v52 = vunpack.i.l.bf16 %v9010_v45  ;;  %s11704_s13 = smov %s11703_s27 }
 0x2d2   : > { %8228 = vmatpush3.bf16.msra.mxu1 %v8227_v59  ;;  %9149 = vrot.lane.b32.xlu0 %v11037_v37, %s9495_s21  ;;  %v5396_v26 = vsel %vm1973_vm9, %v5384_v18, %v11207_v17  ;;  %v2512_v37 = vpop.f32.mrb[20].mxu1 }
 0x2d3   : > { %5414 = vmatprep.subr.mxu0 %v5396_v26  ;;  %7950 = vmatprep.subr.mxu1 %v9487_v16  ;;  %v2513_v13 = vadd.f32 %v2512_v37, %v2368_v55  ;;  %v7828_v57 = vpop.f32.mrb[21].mxu1  ;;  %v5638_v22 = vsel %vm487_vm1, %v9012_v39, %v9006_v24 }
 0x2d4   : > { %v9015_v9 = vpop.permute.xlu1 %9014  ;;  %7952 = vmatprep.mubr.msk.f32.mxu1 %vm9488_vm0, %v9487_v16  ;;  %v2699_v21 = vpop.f32.mrb[22].mxu1  ;;  %v9193_v57 = vld [vmem:[%s9845_s14] sm:$0xff] }
 0x2d5   : > { %v11260_v51 = vpop.permute.xlu0 %8999  ;;  %9154 = vrot.lane.b32.xlu1 %v9153_v29, %s9495_s21  ;;  %v9017_v30 = vunpack.i.h.bf16 %v9015_v9  ;;  %v9016_v48 = vunpack.i.l.bf16 %v9015_v9  ;;  %v2705_v53 = vadd.f32 %v2699_v21, %v2513_v13  ;;  %v7837_v14 = vpop.f32.mrb[23].mxu1 }
 0x2d6   : > { %v9002_v41 = vunpack.i.h.bf16 %v11260_v51  ;;  %v9001_v60 = vunpack.i.l.bf16 %v11260_v51  ;;  %9159 = vrot.lane.b32.xlu0 %v9158_v20, %s9495_s21  ;;  %v8252_v20 = vpack.c.bf16 %v10901_v2, %v11051_v33 }
 0x2d7   : > { %v5201_v40 = vsel %vm1781_vm8, %v8962_v42, %v9016_v48  ;;  %v5204_v29 = vsel %vm1781_vm8, %v8967_v7, %v9017_v30  ;;  %v3846_v42 = vld [vmem:[%s11699_s12] sm:$0xff] }
 0x2d8   : > { %v5635_v11 = vsel %vm487_vm1, %v9011_v52, %v9001_v60  ;;  %v11271_v23 = vpop.permute.xlu1 %5631  ;;  %v5636_v44 = vsel %vm487_vm1, %v9001_v60, %v9002_v41  ;;  %v8234_v35 = vpack.c.bf16 %v5204_v29, %v5201_v40 }
 0x2d9   : > { %v5382_v32 = vpop.permute.xlu0 %5381  ;;  %v8243_v55 = vpack.c.bf16 %v5639_v10, %v5636_v44  ;;  %9164 = vrot.lane.b32.xlu1 %v11055_v6, %s9495_s21  ;;  %v8245_v45 = vpack.c.bf16 %v5638_v22, %v5635_v11 }
 0x2da   : > { %v5395_v59 = vsel %vm1973_vm9, %v5382_v32, %v5384_v18  ;;  %7100 = vrot.lane.b32.xlu0 %v10760_v43, %s9495_s21  ;;  %v8250_v18 = vpack.c.bf16 %v10887_v63, %v11030_v27 }
 0x2db   : > { %5415 = vmatpush1.msra.mxu0 %v5395_v59 }
 0x2dc   : > { %v5198_v24 = vpop.permute.xlu1 %5197  ;;  %7551 = vmatmul.mubr.msk.f32.vlgmr.msra.gmra.mrb[4].mxu0 %vm506_vm2, %v11276_v50  ;;  %8244 = vmatprep.subr.bf16.mxu0 %v8243_v55 }
 0x2dd   : > { %v5008_v6 = vpop.permute.xlu0 %5007  ;;  %8246 = vmatpush1.bf16.msra.mxu0 %v8245_v45  ;;  %7102 = vrot.lane.b32.xlu1 %v10771_v54, %s9495_s21 }
 0x2de   : > { %v5017_v43 = vsel %vm1589_vm7, %v11062_v8, %v5008_v6  ;;  %7104 = vrot.lane.b32.xlu0 %v10843_v38, %s9495_s21  ;;  %5720 = vmatprep.mubr.f32.mxu0 %v9487_v16  ;;  %v5207_v8 = vsel %vm1781_vm8, %v11146_v12, %v5198_v24  ;;  %v9192_v12 = vld [vmem:[%s9845_s14 + $0x8] sm:$0xff]  ;;  %v8255_v6 = vpack.c.bf16 %v10890_v58, %v11033_v62 }
 0x2df   : > { %7951 = vmatpush3.msra.mxu1 %v5017_v43 }
 0x2e0   : > { %v5388_v25 = vpop.permute.xlu1 %5387  ;;  %8233 = vmatprep.subr.bf16.mxu1 %v9484_v0  ;;  %7953 = vmatmul.mubr.msk.f32.vlgmr.msra.gmra.mrb[48].mxu1 %vm506_vm2, %v11148_v34 }
 0x2e1   : > { %v5630_v54 = vpop.permute.xlu0 %5629  ;;  %8235 = vmatpush3.bf16.msra.mxu1 %v8234_v35  ;;  %7098 = vrot.lane.b32.xlu1 %v10777_v1, %s9495_s21 }
 0x2e2   : > { %3849 = vperm.xlu0 %8687, %v3846_v42   ;;  %v5642_v38 = vsel %vm487_vm1, %v5630_v54, %v11271_v23  ;;  %7959 = vmatprep.subr.mxu1 %v9487_v16 }
 0x2e3   : > { %5660 = vmatprep.subr.mxu0 %v5642_v38  ;;  %7961 = vmatprep.mubr.msk.f32.mxu1 %vm9488_vm0, %v9487_v16 }
 0x2e4   : > { %v11313_v7 = vpop.permute.xlu1 %9029  ;;  %v2889_v26 = vpop.f32.mrb[24].mxu1 }
 0x2e5   : > { %v5628_v1 = vpop.permute.xlu0 %5627  ;;  %7960 = vmatpush3.msra.mxu1 %v5207_v8  ;;  %5557 = vperm.xlu1 %9168, %v3846_v42   ;;  %v2895_v39 = vadd.f32 %v2889_v26, %v2705_v53  ;;  %v7846_v52 = vpop.f32.mrb[25].mxu1  ;;  %v9032_v21 = vunpack.i.h.bf16 %v11313_v7  ;;  %v9031_v48 = vunpack.i.l.bf16 %v11313_v7  ;;  %v5397_v53 = vsel %vm1973_vm9, %v11207_v17, %v5388_v25  ;;  %v9194_v7 = vld [vmem:[#allocation3 + $0x8] sm:$0xff] }
 0x2e6   : > { %v5641_v9 = vsel %vm487_vm1, %v5628_v1, %v5630_v54  ;;  %7274 = vperm.xlu0 %8687, %v3846_v42   ;;  %8240 = vmatprep.subr.bf16.mxu1 %v9484_v0 }
 0x2e7   : > { %5661 = vmatpush1.msra.mxu0 %v5641_v9  ;;  %7962 = vmatmul.mubr.msk.f32.vlgmr.msra.gmra.mrb[50].mxu1 %vm506_vm2, %v11200_v15 }
 0x2e8   : > { %v9040_v63 = vpop.permute.xlu1 %9039  ;;  %7556 = vmatmul.mubr.msk.f32.vlgmr.msra.gmra.mrb[6].mxu0 %vm506_vm2, %v10783_v3  ;;  %8251 = vmatprep.subr.bf16.mxu0 %v8250_v18 }
 0x2e9   : > { %v9020_v2 = vpop.permute.xlu0 %9019  ;;  %8253 = vmatpush1.bf16.msra.mxu0 %v8252_v20  ;;  %7970 = vmatprep.mubr.msk.f32.mxu1 %vm9488_vm0, %v9487_v16  ;;  %v9042_v11 = vunpack.i.h.bf16 %v9040_v63  ;;  %v9041_v56 = vunpack.i.l.bf16 %v9040_v63  ;;  %v9195_v63 = vld [vmem:[%s9845_s14 + $0x10] sm:$0xff]  ;;  %s7307_s14 = sadd.s32 %s8373_s8, %s8372_s5 }
 0x2ea   : > { %v9022_v27 = vunpack.i.h.bf16 %v9020_v2  ;;  %v9021_v33 = vunpack.i.l.bf16 %v9020_v2  ;;  %5804 = vmatprep.subr.mxu0 %v9192_v12  ;;  %5864 = vmatprep.mubr.f32.mxu0 %v9487_v16  ;;  %s7579_s1 = sshll.u32 %s7307_s14, 7 }
 0x2eb   : > { %v5966_v51 = vsel %vm821_vm3, %v9041_v56, %v9031_v48  ;;  %s11540_s21 = scalar_lea.hbm %s11703_s27, %s7579_s1 }
 0x2ec   : > { %v5391_v37 = vsel %vm1973_vm9, %v8982_v19, %v9021_v33  ;;  %v5394_v3 = vsel %vm1973_vm9, %v8987_v46, %v9022_v27  ;;  %v5961_v60 = vpop.permute.xlu1 %5960  ;;  %v9196_v27 = vld [vmem:[#allocation3] sm:$0xff] }
 0x2ed   : > { %v8241_v10 = vpack.c.bf16 %v5394_v3, %v5391_v37  ;;  %v9025_v13 = vpop.permute.xlu0 %9024  ;;  %5805 = vmatpush1.msra.mxu0 %v9193_v57 }
 0x2ee   : > { %v9027_v22 = vunpack.i.h.bf16 %v9025_v13  ;;  %v9026_v30 = vunpack.i.l.bf16 %v9025_v13 }
 0x2ef   : > { %8242 = vmatpush3.bf16.msra.mxu1 %v8241_v10 }
 0x2f0   : > { %v5640_v19 = vsel %vm487_vm1, %v9007_v47, %v9027_v22  ;;  %v5637_v61 = vsel %vm487_vm1, %v9002_v41, %v9026_v30  ;;  %v5959_v46 = vpop.permute.xlu1 %5958  ;;  %7968 = vmatprep.subr.mxu1 %v9487_v16  ;;  %7558 = vmatmul.mubr.msk.f32.vlgmr.msra.gmra.mrb[6].mxu0 %vm506_vm2, %v10824_v36  ;;  %v5967_v47 = vsel %vm821_vm3, %v9031_v48, %v9032_v21 }
 0x2f1   : > { %v9035_v44 = vpop.permute.xlu0 %9034  ;;  %6051 = vmatprep.mubr.f32.mxu0 %v9487_v16  ;;  %v8248_v32 = vpack.c.bf16 %v5640_v19, %v5637_v61  ;;  %v5972_v62 = vsel %vm821_vm3, %v5959_v46, %v5961_v60 }
 0x2f2   : > { %v9037_v14 = vunpack.i.h.bf16 %v9035_v44  ;;  %v9036_v31 = vunpack.i.l.bf16 %v9035_v44 }
 0x2f3   : > { %7969 = vmatpush3.msra.mxu1 %v5397_v53 }
 0x2f4   : > { %v5969_v41 = vsel %vm821_vm3, %v9042_v11, %v9036_v31  ;;  %v11353_v55 = vpop.permute.xlu1 %9049  ;;  %8247 = vmatprep.subr.bf16.mxu1 %v9484_v0  ;;  %7971 = vmatmul.mubr.msk.f32.vlgmr.msra.gmra.mrb[52].mxu1 %vm506_vm2, %v11276_v50  ;;  %v5970_v36 = vsel %vm821_vm3, %v9036_v31, %v9037_v14  ;;  %v3079_v17 = vpop.f32.mrb[26].mxu1 }
 0x2f5   : > { %v8259_v59 = vpack.c.bf16 %v5969_v41, %v5966_v51  ;;  %v5634_v45 = vpop.permute.xlu0 %5633  ;;  %8249 = vmatpush3.bf16.msra.mxu1 %v8248_v32  ;;  %v8257_v40 = vpack.c.bf16 %v5970_v36, %v5967_v47  ;;  %7979 = vmatprep.mubr.msk.f32.mxu1 %vm9488_vm0, %v9487_v16  ;;  %v7855_v29 = vpop.f32.mrb[27].mxu1  ;;  %v3085_v24 = vadd.f32 %v3079_v17, %v2895_v39  ;;  %v9052_v38 = vunpack.i.h.bf16 %v11353_v55 }
 0x2f6   : > { %7977 = vmatprep.subr.mxu1 %v9487_v16  ;;  %v5643_v43 = vsel %vm487_vm1, %v11271_v23, %v5634_v45  ;;  %v9051_v8 = vunpack.i.l.bf16 %v11353_v55 }
 0x2f7   : > { %8258 = vmatprep.subr.bf16.mxu0 %v8257_v40 }
 0x2f8   : > { %v9060_v35 = vpop.permute.xlu1 %9059  ;;  %8260 = vmatpush1.bf16.msra.mxu0 %v8259_v59  ;;  %v6160_v52 = vsel %vm1013_vm4, %v9051_v8, %v9052_v38 }
 0x2f9   : > { %v9062_v42 = vunpack.i.h.bf16 %v9060_v35  ;;  %v9061_v25 = vunpack.i.l.bf16 %v9060_v35  ;;  %v11366_v54 = vpop.permute.xlu0 %5962  ;;  %7978 = vmatpush3.msra.mxu1 %v5643_v43 }
 0x2fa   : > { %8254 = vmatprep.subr.bf16.mxu1 %v9484_v0  ;;  %7980 = vmatmul.mubr.msk.f32.vlgmr.msra.gmra.mrb[54].mxu1 %vm506_vm2, %v9194_v7  ;;  %v5973_v58 = vsel %vm821_vm3, %v5961_v60, %v11366_v54 }
 0x2fb   : > { %8256 = vmatpush3.bf16.msra.mxu1 %v8255_v6  ;;  %5991 = vmatprep.subr.mxu0 %v5973_v58  ;;  %v5968_v23 = vsel %vm821_vm3, %v9032_v21, %v9061_v25  ;;  %v5971_v18 = vsel %vm821_vm3, %v9037_v14, %v9062_v42 }
 0x2fc   : > { %v11377_v26 = vpop.permute.xlu1 %6152  ;;  %5992 = vmatpush1.msra.mxu0 %v5972_v62  ;;  %7986 = vmatprep.subr.mxu1 %v9487_v16  ;;  %v8262_v9 = vpack.c.bf16 %v5971_v18, %v5968_v23  ;;  %v9197_v62 = vld [vmem:[#allocation3 + $0x10] sm:$0xff] }
 0x2fd   : > { %v9045_v1 = vpop.permute.xlu0 %9044  ;;  %7988 = vmatprep.mubr.msk.f32.mxu1 %vm9488_vm0, %v9487_v16  ;;  %7560 = vmatmul.mubr.msk.f32.vlgmr.msra.gmra.mrb[6].mxu0 %vm506_vm2, %v10854_v28 }
 0x2fe   : > { %v9047_v20 = vunpack.i.h.bf16 %v9045_v1  ;;  %v9046_v39 = vunpack.i.l.bf16 %v9045_v1  ;;  %6241 = vmatprep.mubr.f32.mxu0 %v9487_v16 }
 0x2ff   : > { %7987 = vmatpush3.msra.mxu1 %v9195_v63 }
 0x300   : > { %v11389_v2 = vpop.permute.xlu1 %9064  ;;  %8261 = vmatprep.subr.bf16.mxu1 %v9484_v0  ;;  %7989 = vmatmul.mubr.msk.f32.vlgmr.msra.gmra.mrb[56].mxu1 %vm506_vm2, %v9196_v27  ;;  %v6157_v28 = vsel %vm1013_vm4, %v9046_v39, %v9047_v20 }
 0x301   : > { %v9055_v33 = vpop.permute.xlu0 %9054  ;;  %8263 = vmatpush3.bf16.msra.mxu1 %v8262_v9  ;;  %v8264_v12 = vpack.c.bf16 %v6160_v52, %v6157_v28  ;;  %7997 = vmatprep.mubr.msk.f32.mxu1 %vm9488_vm0, %v9487_v16  ;;  %v9067_v46 = vunpack.i.h.bf16 %v11389_v2  ;;  %v9066_v44 = vunpack.i.l.bf16 %v11389_v2  ;;  %v9198_v52 = vld [vmem:[#allocation3 + $0x18] sm:$0xff] }
 0x302   : > { %v9057_v37 = vunpack.i.h.bf16 %v9055_v33  ;;  %v9056_v3 = vunpack.i.l.bf16 %v9055_v33  ;;  %7995 = vmatprep.subr.mxu1 %v9487_v16 }
 0x303   : > { %8265 = vmatprep.subr.bf16.mxu0 %v8264_v12  ;;  %v6347_v40 = vsel %vm1205_vm5, %v9066_v44, %v9067_v46 }
 0x304   : > { %v6159_v60 = vsel %vm1013_vm4, %v9057_v37, %v9051_v8  ;;  %v6156_v10 = vsel %vm1013_vm4, %v9056_v3, %v9046_v39  ;;  %v9075_v13 = vpop.permute.xlu1 %9074  ;;  %v3269_v57 = vpop.f32.mrb[28].mxu1 }
 0x305   : > { %v8266_v22 = vpack.c.bf16 %v6159_v60, %v6156_v10  ;;  %v6151_v30 = vpop.permute.xlu0 %6150  ;;  %v3275_v21 = vadd.f32 %v3269_v57, %v3085_v24  ;;  %v7864_v48 = vpop.f32.mrb[29].mxu1  ;;  %v9077_v53 = vunpack.i.h.bf16 %v9075_v13  ;;  %v9076_v14 = vunpack.i.l.bf16 %v9075_v13 }
 0x306   : > { %v6163_v11 = vsel %vm1013_vm4, %v6151_v30, %v11377_v26 }
 0x307   : > { %8267 = vmatpush1.bf16.msra.mxu0 %v8266_v22  ;;  %v6346_v17 = vsel %vm1205_vm5, %v9076_v14, %v9066_v44 }
 0x308   : > { %v9080_v56 = vpop.permute.xlu1 %9079  ;;  %6181 = vmatprep.subr.mxu0 %v6163_v11 }
 0x309   : > { %v6149_v19 = vpop.permute.xlu0 %6148  ;;  %v9082_v32 = vunpack.i.h.bf16 %v9080_v56  ;;  %v9081_v47 = vunpack.i.l.bf16 %v9080_v56 }
 0x30a   : > { %v6162_v61 = vsel %vm1013_vm4, %v6149_v19, %v6151_v30 }
 0x30b   : > { %6182 = vmatpush1.msra.mxu0 %v6162_v61  ;;  %v6158_v24 = vsel %vm1013_vm4, %v9047_v20, %v9081_v47 }
 0x30c   : > { %v11404_v31 = vpop.permute.xlu1 %6342  ;;  %7562 = vmatmul.mubr.msk.f32.vlgmr.msra.gmra.mrb[6].mxu0 %vm506_vm2, %v10924_v49  ;;  %v6161_v49 = vsel %vm1013_vm4, %v9052_v38, %v9082_v32 }
 0x30d   : > { %v9070_v51 = vpop.permute.xlu0 %9069  ;;  %6431 = vmatprep.mubr.f32.mxu0 %v9487_v16  ;;  %v8269_v25 = vpack.c.bf16 %v6161_v49, %v6158_v24 }
 0x30e   : > { %v9072_v41 = vunpack.i.h.bf16 %v9070_v51  ;;  %v9071_v36 = vunpack.i.l.bf16 %v9070_v51 }
 0x310   : > { %v6349_v59 = vsel %vm1205_vm5, %v9077_v53, %v9071_v36  ;;  %v6155_v45 = vpop.permute.xlu1 %6154  ;;  %v6350_v29 = vsel %vm1205_vm5, %v9071_v36, %v9072_v41 }
 0x311   : > { %v8273_v6 = vpack.c.bf16 %v6349_v59, %v6346_v17  ;;  %v5965_v43 = vpop.permute.xlu0 %5964  ;;  %v8271_v35 = vpack.c.bf16 %v6350_v29, %v6347_v40  ;;  %v6164_v18 = vsel %vm1013_vm4, %v11377_v26, %v6155_v45 }
 0x312   : > { %v5974_v42 = vsel %vm821_vm3, %v11366_v54, %v5965_v43 }
 0x313   : > { %7996 = vmatpush3.msra.mxu1 %v5974_v42  ;;  %8272 = vmatprep.subr.bf16.mxu0 %v8271_v35 }
 0x314   : > { %8268 = vmatprep.subr.bf16.mxu1 %v9484_v0  ;;  %8274 = vmatpush1.bf16.msra.mxu0 %v8273_v6  ;;  %v9090_v8 = vpop.permute.xlu1 %9089  ;;  %v3459_v7 = vpop.f32.mrb[30].mxu1 }
 0x315   : > { %v6341_v58 = vpop.permute.xlu0 %6340  ;;  %7998 = vmatmul.mubr.msk.f32.vlgmr.msra.gmra.mrb[58].mxu1 %vm506_vm2, %v9197_v62  ;;  %v11421_v55 = vadd.f32 %v3459_v7, %v3275_v21  ;;  %v7873_v38 = vpop.f32.mrb[31].mxu1  ;;  %v9091_v2 = vunpack.i.l.bf16 %v9090_v8  ;;  %v9092_v3 = vunpack.i.h.bf16 %v9090_v8 }
 0x316   : > { %8270 = vmatpush3.bf16.msra.mxu1 %v8269_v25  ;;  %v6353_v23 = vsel %vm1205_vm5, %v6341_v58, %v11404_v31  ;;  %8006 = vmatprep.mubr.msk.f32.mxu1 %vm9488_vm0, %v9487_v16 }
 0x317   : > { %6371 = vmatprep.subr.mxu0 %v6353_v23  ;;  %8004 = vmatprep.subr.mxu1 %v9487_v16 }
 0x318   : > { %v9100_v54 = vpop.permute.xlu1 %9099 }
 0x319   : > { %v6339_v1 = vpop.permute.xlu0 %6338  ;;  %v9102_v27 = vunpack.i.h.bf16 %v9100_v54  ;;  %v9101_v28 = vunpack.i.l.bf16 %v9100_v54 }
 0x31a   : > { %v6352_v20 = vsel %vm1205_vm5, %v6339_v1, %v6341_v58  ;;  %8005 = vmatpush3.msra.mxu1 %v6164_v18 }
 0x31b   : > { %6372 = vmatpush1.msra.mxu0 %v6352_v20  ;;  %8275 = vmatprep.subr.bf16.mxu1 %v9484_v0  ;;  %v6536_v30 = vsel %vm1397_vm6, %v9101_v28, %v9091_v2 }
 0x31c   : > { %v9105_v39 = vpop.permute.xlu1 %9104  ;;  %8007 = vmatmul.mubr.msk.f32.vlgmr.msra.gmra.mrb[60].mxu1 %vm506_vm2, %v9198_v52  ;;  %7564 = vmatmul.mubr.msk.f32.vlgmr.msra.gmra.mrb[6].mxu0 %vm506_vm2, %v10984_v5 }
 0x31d   : > { %v9085_v9 = vpop.permute.xlu0 %9084  ;;  %8015 = vmatprep.mubr.msk.f32.mxu1 %vm9488_vm0, %v9487_v16  ;;  %6621 = vmatprep.mubr.f32.mxu0 %v9487_v16  ;;  %v9107_v10 = vunpack.i.h.bf16 %v9105_v39  ;;  %v9106_v22 = vunpack.i.l.bf16 %v9105_v39 }
 0x31e   : > { %v9087_v26 = vunpack.i.h.bf16 %v9085_v9  ;;  %v9086_v63 = vunpack.i.l.bf16 %v9085_v9 }
 0x31f   : > { %v6538_v14 = vsel %vm1397_vm6, %v9092_v3, %v9106_v22 }
 0x320   : > { %v6348_v33 = vsel %vm1205_vm5, %v9067_v46, %v9086_v63  ;;  %v6351_v12 = vsel %vm1205_vm5, %v9072_v41, %v9087_v26  ;;  %v6533_v37 = vpop.permute.xlu1 %6532  ;;  %v6537_v46 = vsel %vm1397_vm6, %v9091_v2, %v9092_v3  ;;  %v9199_v41 = vld [vmem:[#allocation3 + $0x20] sm:$0xff] }
 0x321   : > { %v8276_v60 = vpack.c.bf16 %v6351_v12, %v6348_v33  ;;  %v9095_v5 = vpop.permute.xlu0 %9094 }
 0x322   : > { %v9097_v13 = vunpack.i.h.bf16 %v9095_v5  ;;  %v9096_v57 = vunpack.i.l.bf16 %v9095_v5 }
 0x323   : > { %8277 = vmatpush3.bf16.msra.mxu1 %v8276_v60 }
 0x324   : > { %v6539_v21 = vsel %vm1397_vm6, %v9102_v27, %v9096_v57  ;;  %v9110_v48 = vpop.permute.xlu1 %9109  ;;  %8013 = vmatprep.subr.mxu1 %v9487_v16  ;;  %v6540_v11 = vsel %vm1397_vm6, %v9096_v57, %v9097_v13  ;;  %v6541_v56 = vsel %vm1397_vm6, %v9097_v13, %v9107_v10 }
 0x325   : > { %v8280_v19 = vpack.c.bf16 %v6539_v21, %v6536_v30  ;;  %v6345_v61 = vpop.permute.xlu0 %6344  ;;  %v8278_v53 = vpack.c.bf16 %v6540_v11, %v6537_v46  ;;  %v8283_v32 = vpack.c.bf16 %v6541_v56, %v6538_v14  ;;  %v9111_v45 = vunpack.i.l.bf16 %v9110_v48 }
 0x326   : > { %v6354_v44 = vsel %vm1205_vm5, %v11404_v31, %v6345_v61  ;;  %v9112_v49 = vunpack.i.h.bf16 %v9110_v48 }
 0x327   : > { %8014 = vmatpush3.msra.mxu1 %v6354_v44  ;;  %8279 = vmatprep.subr.bf16.mxu0 %v8278_v53 }
 0x328   : > { %8282 = vmatprep.subr.bf16.mxu1 %v9484_v0  ;;  %v9120_v47 = vpop.permute.xlu1 %9119  ;;  %8281 = vmatpush1.bf16.msra.mxu0 %v8280_v19  ;;  %v6727_v20 = vsel %vm1589_vm7, %v9111_v45, %v9112_v49 }
 0x329   : > { %v6531_v51 = vpop.permute.xlu0 %6530  ;;  %8016 = vmatmul.mubr.msk.f32.vlgmr.msra.gmra.mrb[62].mxu1 %vm506_vm2, %v9199_v41  ;;  %v9122_v40 = vunpack.i.h.bf16 %v9120_v47  ;;  %v9121_v29 = vunpack.i.l.bf16 %v9120_v47 }
 0x32a   : > { %8284 = vmatpush3.bf16.msra.mxu1 %v8283_v32  ;;  %v6543_v36 = vsel %vm1397_vm6, %v6531_v51, %v6533_v37  ;;  %8024 = vmatprep.mubr.msk.f32.mxu1 %vm9488_vm0, %v9487_v16 }
 0x32b   : > { %6561 = vmatprep.subr.mxu0 %v6543_v36  ;;  %8022 = vmatprep.subr.mxu1 %v9487_v16  ;;  %v6726_v7 = vsel %vm1589_vm7, %v9121_v29, %v9111_v45 }
 0x32c   : > { %v9125_v31 = vpop.permute.xlu1 %9124 }
 0x32d   : > { %v6529_v17 = vpop.permute.xlu0 %6528  ;;  %v9127_v6 = vunpack.i.h.bf16 %v9125_v31  ;;  %v9126_v25 = vunpack.i.l.bf16 %v9125_v31 }
 0x32e   : > { %v6542_v59 = vsel %vm1397_vm6, %v6529_v17, %v6531_v51 }
 0x32f   : > { %6562 = vmatpush1.msra.mxu0 %v6542_v59  ;;  %v6728_v9 = vsel %vm1589_vm7, %v9112_v49, %v9126_v25 }
 0x330   : > { %v11456_v24 = vpop.permute.xlu1 %6722  ;;  %7566 = vmatmul.mubr.msk.f32.vlgmr.msra.gmra.mrb[6].mxu0 %vm506_vm2, %v11057_v4 }
 0x331   : > { %v9115_v43 = vpop.permute.xlu0 %9114  ;;  %6811 = vmatprep.mubr.f32.mxu0 %v9487_v16 }
 0x332   : > { %v9117_v35 = vunpack.i.h.bf16 %v9115_v43  ;;  %v9116_v42 = vunpack.i.l.bf16 %v9115_v43 }
 0x333   : > { %v11461_v8 = vpop.f32.mrb[2].mxu0 }
 0x334   : > { %v6729_v58 = vsel %vm1589_vm7, %v9122_v40, %v9116_v42  ;;  %v9130_v62 = vpop.permute.xlu1 %9129  ;;  %v6730_v38 = vsel %vm1589_vm7, %v9116_v42, %v9117_v35  ;;  %v11466_v23 = vpop.f32.mrb[3].mxu0  ;;  %v6731_v54 = vsel %vm1589_vm7, %v9117_v35, %v9127_v6 }
 0x335   : > { %v8287_v18 = vpack.c.bf16 %v6729_v58, %v6726_v7  ;;  %v6535_v1 = vpop.permute.xlu0 %6534  ;;  %v8285_v52 = vpack.c.bf16 %v6730_v38, %v6727_v20  ;;  %v8290_v26 = vpack.c.bf16 %v6731_v54, %v6728_v9  ;;  %v9131_v3 = vunpack.i.l.bf16 %v9130_v62 }
 0x336   : > { %v6544_v39 = vsel %vm1397_vm6, %v6533_v37, %v6535_v1  ;;  %v9132_v37 = vunpack.i.h.bf16 %v9130_v62 }
 0x337   : > { %8023 = vmatpush3.msra.mxu1 %v6544_v39  ;;  %8286 = vmatprep.subr.bf16.mxu0 %v8285_v52 }
 0x338   : > { %8289 = vmatprep.subr.bf16.mxu1 %v9484_v0  ;;  %v9140_v63 = vpop.permute.xlu1 %9139  ;;  %8288 = vmatpush1.bf16.msra.mxu0 %v8287_v18  ;;  %v6917_v21 = vsel %vm1781_vm8, %v9131_v3, %v9132_v37 }
 0x339   : > { %v6721_v2 = vpop.permute.xlu0 %6720  ;;  %8025 = vmatmul.mubr.msk.f32.vlgmr.msra.gmra.mrb[64].mxu1 %vm506_vm2, %v11057_v4  ;;  %v9142_v60 = vunpack.i.h.bf16 %v9140_v63  ;;  %v9141_v10 = vunpack.i.l.bf16 %v9140_v63 }
 0x33a   : > { %8291 = vmatpush3.bf16.msra.mxu1 %v8290_v26  ;;  %v6733_v27 = vsel %vm1589_vm7, %v6721_v2, %v11456_v24  ;;  %8033 = vmatprep.mubr.msk.f32.mxu1 %vm9488_vm0, %v9487_v16 }
 0x33b   : > { %6751 = vmatprep.subr.mxu0 %v6733_v27  ;;  %8031 = vmatprep.subr.mxu1 %v9487_v16  ;;  %v6916_v11 = vsel %vm1781_vm8, %v9141_v10, %v9131_v3 }
 0x33c   : > { %v9145_v28 = vpop.permute.xlu1 %9144 }
 0x33d   : > { %v6719_v33 = vpop.permute.xlu0 %6718  ;;  %v9147_v5 = vunpack.i.h.bf16 %v9145_v28  ;;  %v9146_v30 = vunpack.i.l.bf16 %v9145_v28 }
 0x33e   : > { %v6732_v12 = vsel %vm1589_vm7, %v6719_v33, %v6721_v2 }
 0x33f   : > { %6752 = vmatpush1.msra.mxu0 %v6732_v12  ;;  %v6918_v41 = vsel %vm1781_vm8, %v9132_v37, %v9146_v30 }
 0x340   : > { %v6913_v4 = vpop.permute.xlu1 %6912  ;;  %7568 = vmatmul.mubr.msk.f32.vlgmr.msra.gmra.mrb[6].mxu0 %vm506_vm2, %v11148_v34 }
 0x341   : > { %v9135_v13 = vpop.permute.xlu0 %9134  ;;  %7001 = vmatprep.mubr.f32.mxu0 %v9487_v16 }
 0x342   : > { %v9137_v57 = vunpack.i.h.bf16 %v9135_v13  ;;  %v9136_v22 = vunpack.i.l.bf16 %v9135_v13 }
 0x343   : > { %v3649_v48 = vpop.f32.mrb[32].mxu1 }
 0x344   : > { %v6919_v56 = vsel %vm1781_vm8, %v9142_v60, %v9136_v22  ;;  %v6920_v19 = vsel %vm1781_vm8, %v9136_v22, %v9137_v57  ;;  %v6915_v61 = vpop.permute.xlu1 %6914  ;;  %v3655_v46 = vadd.f32 %v3649_v48, %v11421_v55  ;;  %v7882_v44 = vpop.f32.mrb[33].mxu1  ;;  %v6921_v53 = vsel %vm1781_vm8, %v9137_v57, %v9147_v5 }
 0x345   : > { %v8294_v14 = vpack.c.bf16 %v6919_v56, %v6916_v11  ;;  %v6725_v32 = vpop.permute.xlu0 %6724  ;;  %v8292_v47 = vpack.c.bf16 %v6920_v19, %v6917_v21  ;;  %v8297_v36 = vpack.c.bf16 %v6921_v53, %v6918_v41  ;;  %v6924_v59 = vsel %vm1781_vm8, %v6913_v4, %v6915_v61 }
 0x346   : > { %v6734_v51 = vsel %vm1589_vm7, %v11456_v24, %v6725_v32 }
 0x347   : > { %8032 = vmatpush3.msra.mxu1 %v6734_v51  ;;  %8293 = vmatprep.subr.bf16.mxu0 %v8292_v47 }
 0x348   : > { %8034 = vmatmul.mubr.msk.f32.vlgmr.msra.gmra.mrb[66].mxu1 %vm506_vm2, %v11148_v34  ;;  %8295 = vmatpush1.bf16.msra.mxu0 %v8294_v14  ;;  %v9155_v17 = vpop.permute.xlu1 %9154 }
 0x349   : > { %8296 = vmatprep.subr.bf16.mxu1 %v9484_v0  ;;  %v6911_v55 = vpop.permute.xlu0 %6910  ;;  %8042 = vmatprep.mubr.msk.f32.mxu1 %vm9488_vm0, %v9487_v16  ;;  %v9157_v24 = vunpack.i.h.bf16 %v9155_v17  ;;  %v9156_v49 = vunpack.i.l.bf16 %v9155_v17 }
 0x34a   : > { %8298 = vmatpush3.bf16.msra.mxu1 %v8297_v36  ;;  %v6923_v31 = vsel %vm1781_vm8, %v6911_v55, %v6913_v4 }
 0x34b   : > { %6941 = vmatprep.subr.mxu0 %v6923_v31  ;;  %8040 = vmatprep.subr.mxu1 %v9487_v16 }
 0x34c   : > { %v9165_v34 = vpop.permute.xlu1 %9164 }
 0x34d   : > { %v6909_v45 = vpop.permute.xlu0 %6908  ;;  %v9167_v6 = vunpack.i.h.bf16 %v9165_v34  ;;  %v9166_v43 = vunpack.i.l.bf16 %v9165_v34 }
 0x34e   : > { %v6922_v40 = vsel %vm1781_vm8, %v6909_v45, %v6911_v55  ;;  %8041 = vmatpush3.msra.mxu1 %v6924_v59 }
 0x34f   : > { %8043 = vmatmul.mubr.msk.f32.vlgmr.msra.gmra.mrb[68].mxu1 %vm506_vm2, %v11200_v15  ;;  %6942 = vmatpush1.msra.mxu0 %v6922_v40 }
 0x350   : > { %7570 = vmatmul.mubr.msk.f32.vlgmr.msra.gmra.mrb[6].mxu0 %vm506_vm2, %v11200_v15  ;;  %8303 = vmatprep.subr.bf16.mxu1 %v9484_v0  ;;  %v7103_v62 = vpop.permute.xlu1 %7102  ;;  %v7109_v15 = vsel %vm1973_vm9, %v9167_v6, %v9157_v24 }
 0x351   : > { %v9150_v29 = vpop.permute.xlu0 %9149  ;;  %8051 = vmatprep.mubr.msk.f32.mxu1 %vm9488_vm0, %v9487_v16  ;;  %7191 = vmatprep.mubr.f32.mxu0 %v9487_v16 }
 0x352   : > { %v9152_v35 = vunpack.i.h.bf16 %v9150_v29  ;;  %v9151_v42 = vunpack.i.l.bf16 %v9150_v29 }
 0x354   : > { %v7108_v0 = vsel %vm1973_vm9, %v9152_v35, %v9156_v49  ;;  %v7106_v38 = vsel %vm1973_vm9, %v9166_v43, %v9151_v42  ;;  %v7107_v1 = vsel %vm1973_vm9, %v9151_v42, %v9152_v35  ;;  %v7099_v27 = vpop.permute.xlu1 %7098 }
 0x355   : > { %v9160_v25 = vpop.permute.xlu0 %9159  ;;  %v8301_v2 = vpack.c.bf16 %v7109_v15, %v7106_v38 }
 0x356   : > { %v9162_v7 = vunpack.i.h.bf16 %v9160_v25  ;;  %v9161_v58 = vunpack.i.l.bf16 %v9160_v25 }
 0x357   : > { %v3839_v54 = vpop.f32.mrb[34].mxu1 }
 0x358   : > { %v7111_v18 = vsel %vm1973_vm9, %v9161_v58, %v9162_v7  ;;  %v7110_v20 = vsel %vm1973_vm9, %v9157_v24, %v9161_v58  ;;  %v3845_v39 = vadd.f32 %v3839_v54, %v3655_v46  ;;  %v7891_v52 = vpop.f32.mrb[35].mxu1 }
 0x359   : > { %v8304_v9 = vpack.c.bf16 %v7111_v18, %v7108_v0  ;;  %v7101_v26 = vpop.permute.xlu0 %7100  ;;  %v8299_v63 = vpack.c.bf16 %v7110_v20, %v7107_v1 }
 0x35a   : > { %v7113_v28 = vsel %vm1973_vm9, %v7101_v26, %v7103_v62  ;;  %v7112_v37 = vsel %vm1973_vm9, %v7099_v27, %v7101_v26 }
 0x35b   : > { %8300 = vmatprep.subr.bf16.mxu0 %v8299_v63  ;;  %8305 = vmatpush3.bf16.msra.mxu1 %v8304_v9 }
 0x35c   : > { %8302 = vmatpush1.bf16.msra.mxu0 %v8301_v2  ;;  %8049 = vmatprep.subr.mxu1 %v9487_v16 }
 0x35d   : > { %v7105_v33 = vpop.permute.xlu0 %7104  ;;  %7131 = vmatprep.subr.mxu0 %v7113_v28 }
 0x35e   : > { %v7114_v12 = vsel %vm1973_vm9, %v7103_v62, %v7105_v33 }
 0x35f   : > { %8050 = vmatpush3.msra.mxu1 %v7114_v12 }
 0x360   : > { %7132 = vmatpush1.msra.mxu0 %v7112_v37  ;;  %8052 = vmatmul.mubr.msk.f32.vlgmr.msra.gmra.mrb[70].mxu1 %vm506_vm2, %v11276_v50 }
 0x361   : > { %v3850_v3 = vpop.permute.xlu0 %3849  ;;  %7572 = vmatmul.mubr.msk.f32.vlgmr.msra.gmra.mrb[6].mxu0 %vm506_vm2, %v11276_v50 }
 0x362   : > { %v3852_v60 = vadd.f32 %v3850_v3, %v11461_v8  ;;  %v3854_v16 = vadd.f32 %v3850_v3, %v3845_v39  ;;  %v3853_v10 = vadd.f32 %v3850_v3, %v11466_v23 }
 0x364   : > { %vm3855_vm13 = vcmp.gt.f32.partialorder %v3852_v60, 0.0  ;;  %vm3857_vm14 = vcmp.gt.f32.partialorder %v3854_v16, 0.0  ;;  %v3858_v4 = vmul.f32 0.2, %v3852_v60  ;;  %v3860_v5 = vmul.f32 0.2, %v3854_v16  ;;  %v5558_v36 = vpop.permute.xlu1 %5557 }
 0x365   : > { %vm3856_vm15 = vcmp.gt.f32.partialorder %v3853_v10, 0.0  ;;  %v3859_v13 = vmul.f32 0.2, %v3853_v10  ;;  %v4076_v57 = vpop.f32.mrb[36].mxu1 }
 0x366   : > { %v3861_v22 = vsel %vm3855_vm13, %v3852_v60, %v3858_v4  ;;  %v3863_v30 = vsel %vm3857_vm14, %v3854_v16, %v3860_v5  ;;  %v7900_v21 = vpop.f32.mrb[37].mxu1 }
 0x367   : > { %7532 = vst [vmem:[%s11099_s10 + $0x18] sm:$0xff] %v3861_v22  ;;  %7534 = vst [vmem:[%s11099_s10 + $0x28] sm:$0xff] %v3863_v30  ;;  %v3862_v48 = vsel %vm3856_vm15, %v3853_v10, %v3859_v13 }
 0x368   : > { %7533 = vst [vmem:[%s11099_s10 + $0x20] sm:$0xff] %v3862_v48 }
 0x36a   : > { %v4220_v50 = vpop.f32.mrb[38].mxu1 }
 0x36b   : > { %v4221_v8 = vadd.f32 %v4220_v50, %v4076_v57  ;;  %v7909_v11 = vpop.f32.mrb[39].mxu1  ;;  %v7275_v57 = vpop.permute.xlu0 %7274 }
 0x372   : > { %v4407_v56 = vpop.f32.mrb[40].mxu1 }
 0x373   : > { %v4413_v19 = vadd.f32 %v4407_v56, %v4221_v8  ;;  %v7918_v23 = vpop.f32.mrb[41].mxu1 }
 0x389   : > { %v4597_v61 = vpop.f32.mrb[42].mxu1 }
 0x38a   : > { %v4603_v46 = vadd.f32 %v4597_v61, %v4413_v19  ;;  %v7927_v44 = vpop.f32.mrb[43].mxu1 }
 0x394   : > { %v4787_v53 = vpop.f32.mrb[44].mxu1 }
 0x395   : > { %v4793_v14 = vadd.f32 %v4787_v53, %v4603_v46  ;;  %v7936_v32 = vpop.f32.mrb[45].mxu1 }
 0x3a4   : > { %v4977_v47 = vpop.f32.mrb[46].mxu1 }
 0x3a5   : > { %v4983_v51 = vadd.f32 %v4977_v47, %v4793_v14  ;;  %v7945_v41 = vpop.f32.mrb[47].mxu1 }
 0x3af   : > { %v5476_v55 = vpop.f32.mrb[4].mxu0 }
 0x3b0   : > { %v5560_v31 = vadd.f32 %v5558_v36, %v5476_v55  ;;  %v5478_v17 = vpop.f32.mrb[5].mxu0 }
 0x3b1   : > { %v5561_v59 = vadd.f32 %v5558_v36, %v5478_v17 }
 0x3b2   : > { %vm5563_vm0 = vcmp.gt.f32.partialorder %v5560_v31, 0.0  ;;  %v5566_v45 = vmul.f32 0.2, %v5560_v31 }
 0x3b3   : > { %vm5564_vm1 = vcmp.gt.f32.partialorder %v5561_v59, 0.0  ;;  %v5567_v40 = vmul.f32 0.2, %v5561_v59  ;;  %v5167_v34 = vpop.f32.mrb[48].mxu1 }
 0x3b4   : > { %v5569_v29 = vsel %vm5563_vm0, %v5560_v31, %v5566_v45  ;;  %v5173_v24 = vadd.f32 %v5167_v34, %v4983_v51  ;;  %v7954_v49 = vpop.f32.mrb[49].mxu1 }
 0x3b5   : > { %7553 = vst [vmem:[%s11099_s10 + $0x30] sm:$0xff] %v5569_v29  ;;  %v5570_v6 = vsel %vm5564_vm1, %v5561_v59, %v5567_v40 }
 0x3b6   : > { %7554 = vst [vmem:[%s11099_s10 + $0x38] sm:$0xff] %v5570_v6 }
 0x3ba   : > { %v5357_v43 = vpop.f32.mrb[50].mxu1 }
 0x3bb   : > { %v5363_v35 = vadd.f32 %v5357_v43, %v5173_v24  ;;  %v7963_v42 = vpop.f32.mrb[51].mxu1 }
 0x3c7   : > { %v5547_v25 = vpop.f32.mrb[52].mxu1 }
 0x3c8   : > { %v5553_v7 = vadd.f32 %v5547_v25, %v5363_v35  ;;  %v7972_v58 = vpop.f32.mrb[53].mxu1 }
 0x3ca   : > { %v5562_v62 = vadd.f32 %v5558_v36, %v5553_v7 }
 0x3cc   : > { %vm5565_vm2 = vcmp.gt.f32.partialorder %v5562_v62, 0.0  ;;  %v5568_v15 = vmul.f32 0.2, %v5562_v62 }
 0x3cd   : > { %v5793_v0 = vpop.f32.mrb[54].mxu1 }
 0x3ce   : > { %v5571_v38 = vsel %vm5565_vm2, %v5562_v62, %v5568_v15  ;;  %v7981_v54 = vpop.f32.mrb[55].mxu1 }
 0x3cf   : > { %7555 = vst [vmem:[%s11099_s10 + $0x40] sm:$0xff] %v5571_v38 }
 0x3d3   : > { %v5937_v18 = vpop.f32.mrb[56].mxu1 }
 0x3d4   : > { %v5938_v1 = vadd.f32 %v5937_v18, %v5793_v0  ;;  %v7990_v20 = vpop.f32.mrb[57].mxu1 }
 0x3e8   : > { %v6124_v39 = vpop.f32.mrb[58].mxu1 }
 0x3e9   : > { %v6130_v52 = vadd.f32 %v6124_v39, %v5938_v1  ;;  %v7999_v9 = vpop.f32.mrb[59].mxu1 }
 0x3ef   : > { %v6314_v26 = vpop.f32.mrb[60].mxu1 }
 0x3f0   : > { %v6320_v63 = vadd.f32 %v6314_v26, %v6130_v52  ;;  %v8008_v2 = vpop.f32.mrb[61].mxu1 }
 0x3fc   : > { %v6504_v27 = vpop.f32.mrb[62].mxu1 }
 0x3fd   : > { %v6510_v28 = vadd.f32 %v6504_v27, %v6320_v63  ;;  %v8017_v33 = vpop.f32.mrb[63].mxu1 }
 0x40c   : > { %v6694_v12 = vpop.f32.mrb[64].mxu1 }
 0x40d   : > { %v6700_v37 = vadd.f32 %v6694_v12, %v6510_v28  ;;  %v8026_v3 = vpop.f32.mrb[65].mxu1 }
 0x41b   : > { %v6884_v60 = vpop.f32.mrb[66].mxu1 }
 0x41c   : > { %v6890_v16 = vadd.f32 %v6884_v60, %v6700_v37  ;;  %v8035_v10 = vpop.f32.mrb[67].mxu1 }
 0x422   : > { %v7074_v4 = vpop.f32.mrb[68].mxu1 }
 0x423   : > { %v7080_v5 = vadd.f32 %v7074_v4, %v6890_v16  ;;  %v8044_v13 = vpop.f32.mrb[69].mxu1 }
 0x433   : > { %v7264_v22 = vpop.f32.mrb[70].mxu1 }
 0x434   : > { %v7270_v30 = vadd.f32 %v7264_v22, %v7080_v5  ;;  %v7193_v21 = vpop.f32.mrb[6].mxu0  ;;  %v8053_v48 = vpop.f32.mrb[71].mxu1 }
 0x435   : > { %v7277_v50 = vadd.f32 %v7275_v57, %v7193_v21  ;;  %v7195_v8 = vpop.f32.mrb[7].mxu0 }
 0x436   : > { %v7279_v11 = vadd.f32 %v7275_v57, %v7270_v30  ;;  %v7278_v56 = vadd.f32 %v7275_v57, %v7195_v8 }
 0x437   : > { %vm7280_vm3 = vcmp.gt.f32.partialorder %v7277_v50, 0.0  ;;  %v7283_v19 = vmul.f32 0.2, %v7277_v50 }
 0x438   : > { %vm7282_vm4 = vcmp.gt.f32.partialorder %v7279_v11, 0.0  ;;  %v7285_v23 = vmul.f32 0.2, %v7279_v11  ;;  %vm7281_vm5 = vcmp.gt.f32.partialorder %v7278_v56, 0.0  ;;  %v7284_v61 = vmul.f32 0.2, %v7278_v56 }
 0x439   : > { %v7286_v46 = vsel %vm7280_vm3, %v7277_v50, %v7283_v19 }
 0x43a   : > { %v7288_v44 = vsel %vm7282_vm4, %v7279_v11, %v7285_v23  ;;  %7574 = vst [vmem:[%s11099_s10 + $0x48] sm:$0xff] %v7286_v46  ;;  %v7287_v53 = vsel %vm7281_vm5, %v7278_v56, %v7284_v61 }
 0x43b   : > { %7576 = vst [vmem:[%s11099_s10 + $0x58] sm:$0xff] %v7288_v44  ;;  %7575 = vst [vmem:[%s11099_s10 + $0x50] sm:$0xff] %v7287_v53 }
 0x43c   : > { %9327 = shalt.err (!%p9324_p4)
}
 0x43d   : > { %s9328_s10 = scalar_lea.hbm %s11540_s21, 1536  ;;  %s9332_s18 = scalar_lea.hbm %s11704_s13, 6144 }
 0x43e   : > { %p9329_p10 = scmp.ne.s32.totalorder %s11540_s21, %s9328_s10  ;;  %p9333_p12 = scmp.lt.u32.totalorder %s11540_s21, %s11704_s13 }
 0x43f   : > { %p9334_p13 = scmp.lt.u32.totalorder %s9332_s18, %s9328_s10  ;;  %p9336_p0 = scmp.lt.u32.totalorder %s9328_s10, %s11540_s21 }
 0x440   : > { %p9330_p11 = pnand %p9329_p10, %p11705_p1 }
 0x441   : > { %p9335_p2 = por %p9334_p13, %p9333_p12 }
 0x442   : > { %p9331_p8 = pneg %p9330_p11 }
 0x443   : > { %p9337_p7 = por %p9336_p0, %p9335_p2 }
 0x445   : > { %p9338_p3 = pnand %p9337_p7, %p9331_p8 }
 0x447   : > { %9341 = shalt.err (!%p9338_p3)
}
 0x448   : > { %s9497_s14 = smov 384   ;;  %s9498_s1 = smov 24  }
 0x449   : > { %8383 = dma.vmem_to_hbm [thread:$0]  (%p11705_p1), %s11535_s15, 1536, %s11540_s21, %s7294_s19, %s9497_s14, %s9497_s14, %s9498_s1  }
 0x44a PF: > { %s11706_s26 = sld [smem:[#allocation18_spill]]  ;;  %s11707_s4 = sld [smem:[#allocation29_spill]] }
 0x44b   : > { %p8395_p6 = scmp.ge.s32.totalorder %s9474_s6, 2 }
 0x450   : > { %s7325_s27 = sand.u32 1, %s11706_s26   ;;  %p11708_p5 = scmp.ne.s32.totalorder %s11707_s4, 0 }
 0x451   : > { %s7326_s11 = scalar_lea.sflag [#allocation5], %s7325_s27 }
 0x452   : > { %p8390_p9 = pnand %p8395_p6, %p11708_p5 }
 0x454   : > { %9415 = dma.done.wait (!%p8390_p9), %s7326_s11, 1536  }
 0x455   : > { %9417 = vsyncadd (!%p8390_p9), %s7326_s11, 4294965760  ;;  %s25_s6 = sadd.s32 1, %s9474_s6   ;;  %s11710_s18 = sld [smem:[#allocation17_spill]] }
 0x456   : > { %p11574_p4 = scmp.ge.s32.totalorder %s25_s6, 6   ;;  %s11711_s9 = sld [smem:[#allocation27_spill]] }
 0x457   : > { %s11712_s15 = sld [smem:[#allocation25_spill]]  ;;  %s11713_s16 = sld [smem:[#allocation19_spill]] }
 0x458   : > { %s11714_s26 = sld [smem:[#allocation24_spill]]  ;;  %s11715_s3 = sld [smem:[#allocation22_spill]] }
 0x459   : > { %s11716_s0 = sld [smem:[#allocation23_spill]]  ;;  %s11718_s19 = smov %s9430_s20 }
 0x45a   : > { %s11720_s21 = smov %s9438_s22  ;;  %s11721_s22 = smov %s9442_s23 }
 0x45b   : > { %s11723_s24 = smov %s9450_s25  ;;  %s11725_s27 = smov %s9466_s29 }
 0x45c   : > { %s11719_s20 = smov %s11711_s9  ;;  %s11726_s28 = smov %s9470_s30 }
 0x45d   : > { %s11722_s23 = smov %s11712_s15  ;;  %s11724_s25 = smov %s11713_s16 }
 0x45e   : > { %s11727_s29 = smov %s11715_s3  ;;  %24 = sbr.rel (!%p11574_p4) target bundleno = 20 (0x14), region = 125 }
 0x45f   : > { %s11728_s30 = smov %s11716_s0 }
 0x465   :  { %7331 = vsyncpa [#allocation4], 1 }
 0x466   :  { %7333 = vsyncpa [#allocation4 + $0x1], 1 }
 0x467   :  { %7334 = vsyncpa [#allocation7], 1 }
 0x468   :  { %7336 = vsyncpa [#allocation7 + $0x1], 1 }
 0x469   :  { %7337 = vsyncpa [#allocation10], 1 }
 0x46a   :  { %7339 = vsyncpa [#allocation10 + $0x1], 1 }
 0x46b   :  { %7340 = vsyncpa [#allocation5], 1 }
 0x46c   :  { %7342 = vsyncpa [#allocation5 + $0x1], 1 }

</bundles_post_ra>
